<compile_context>
chip_gen: v6e
topology: v6e:2x2x1
jax: 0.10.0
libtpu: 0.0.40
codegen_flags: <defaults>
</compile_context>

<pallas_src>
import math
from functools import partial

import numpy as np
import jax
import jax.numpy as jnp
from jax.experimental import pallas as pl
from jax.experimental.pallas import tpu as pltpu

# ----- Bottle2neck static configuration -----
PLANES = 16
EXPANSION = 4
INPLANES = PLANES * EXPANSION            # identity residual needs Cin == Cout
CARDINALITY = 1
BASE_WIDTH = 26
SCALE = 4
NUM_SCALES = max(1, SCALE - 1)
WIDTH = int(math.floor(PLANES * (BASE_WIDTH / 64.0))) * CARDINALITY   # = 6
WIDTH_PAD = 8                            # per-branch channels padded 6 -> 8
OUTPLANES = PLANES * EXPANSION           # = 64
BN_EPS = 1e-5


def _fold_bn(gamma, beta, mean, var):
    """Fold eval-mode BatchNorm into per-channel (scale, shift)."""
    scale = gamma / jnp.sqrt(var + BN_EPS)
    shift = beta - mean * scale
    return scale.astype(jnp.float32), shift.astype(jnp.float32)


# ---------------------------------------------------------------------------
# Pallas kernel: one full Bottle2neck block for B_TILE batch elements.
# All activations are (M, lanes) with M = B_TILE*H rows and lanes = W * C.
# ---------------------------------------------------------------------------
def bottle2neck_kernel(H, x_ref, w1_ref, s1_ref, b1_ref, u_ref, sc_ref, bc_ref,
                       w3_ref, s3_ref, b3_ref, o_ref, q_ref, cat_ref):
    M = x_ref.shape[0]                    # B_TILE * H stacked rows
    BR = u_ref.shape[-1]                  # 128 lanes per branch (W * WIDTH_PAD)
    CO = 256                              # output-lane chunk (one MXU tile wide)

    # Per-image row masks for the +/-1 row shifts of the 3x3 convs.  Row r of
    # the stacked block is image r // H, line r % H; the shifted operand must
    # be zero at each image's first / last line (conv zero padding) and at the
    # block edges.  Because of these masks q_ref's pad rows never need zeroing.
    h_of_row = jax.lax.broadcasted_iota(jnp.int32, (M, BR), 0) % H
    not_top = h_of_row != 0
    not_bot = h_of_row != (H - 1)

    # ---- conv1 (1x1, all four splits fused in one block-diagonal matmul)
    #      + bn1 + relu.  Result goes straight into the conv3 concat buffer:
    #      splits 0..2 are overwritten by the branch outputs below, split 3 is
    #      the pass-through (scale>1, pool is None).
    xb = x_ref[...].astype(jnp.bfloat16)                           # (M, W*Cin)
    for j in range(cat_ref.shape[1] // CO):
        c0 = j * CO
        y = jnp.dot(xb, w1_ref[:, c0:c0 + CO],
                    preferred_element_type=jnp.float32)
        cat_ref[:, c0:c0 + CO] = jnp.maximum(
            y * s1_ref[:, c0:c0 + CO] + b1_ref[:, c0:c0 + CO], 0.0)

    # ---- Res2Net branch chain (inherently sequential).  Each 3x3 conv is three
    #      block-Toeplitz matmuls against the center / up / down row-shifted
    #      operands; the shifts go through q_ref and are boundary-masked.
    sp = None
    for i in range(NUM_SCALES):
        spx_i = cat_ref[:, i * BR:(i + 1) * BR]                    # f32 (M, BR)
        sp = spx_i if i == 0 else sp + spx_i                       # is_first == False chain
        q_ref[pl.ds(1, M), :] = sp
        spb = sp.astype(jnp.bfloat16)
        up = jnp.where(not_top, q_ref[pl.ds(0, M), :], 0.0).astype(jnp.bfloat16)
        dn = jnp.where(not_bot, q_ref[pl.ds(2, M), :], 0.0).astype(jnp.bfloat16)
        conv = jnp.dot(spb, u_ref[i, 1], preferred_element_type=jnp.float32)
        conv = conv + jnp.dot(up, u_ref[i, 0], preferred_element_type=jnp.float32)
        conv = conv + jnp.dot(dn, u_ref[i, 2], preferred_element_type=jnp.float32)
        # bn_i + relu (carried to the next branch of the chain)
        sp = jnp.maximum(conv * sc_ref[i] + bc_ref[i], 0.0)
        cat_ref[:, i * BR:(i + 1) * BR] = sp

    # ---- conv3 (1x1 over the concatenated splits, fused) + bn3 + identity
    #      residual + relu.  Chunked over 256 output lanes so each chunk's f32
    #      result stays register-sized; stores are lane-dense.
    catb = cat_ref[...].astype(jnp.bfloat16)                       # (M, SCALE*BR)
    for j in range(o_ref.shape[1] // CO):
        c0 = j * CO
        acc = jnp.dot(catb, w3_ref[:, c0:c0 + CO],
                      preferred_element_type=jnp.float32)
        out = acc * s3_ref[:, c0:c0 + CO] + b3_ref[:, c0:c0 + CO] \
            + x_ref[:, c0:c0 + CO]
        o_ref[:, c0:c0 + CO] = jnp.maximum(out, 0.0)


# ---------------------------------------------------------------------------
# Host-side weight re-layout (done once; pure placement of the original weight
# values into block-diagonal / block-Toeplitz bf16 matrices, so numerics match
# the reference up to bf16 MXU operand rounding).
# ---------------------------------------------------------------------------
def build_kernel_params(W, w1, s1, b1, wc, sc, bc, w3, s3, b3):
    Cin = w1.shape[0]
    WP = WIDTH_PAD
    eye = np.eye(W, dtype=np.float32)

    def pad_vec(v, n_groups):
        vp = np.zeros((n_groups, WP), np.float32)
        vp[:, :WIDTH] = np.asarray(v, np.float32).reshape(n_groups, WIDTH)
        return vp

    # conv1: all four splits fused into one block-diagonal weight
    w1_b = np.zeros((Cin, SCALE, WP), np.float32)
    w1_b[:, :, :WIDTH] = np.asarray(w1, np.float32).reshape(Cin, SCALE, WIDTH)
    w1a = np.einsum('wv,ise->wisve', eye, w1_b).reshape(W * Cin, SCALE * W * WP)
    s1p, b1p = pad_vec(s1, SCALE), pad_vec(b1, SCALE)
    s1a = np.broadcast_to(s1p[:, None, :], (SCALE, W, WP)).reshape(1, -1).copy()
    b1a = np.broadcast_to(b1p[:, None, :], (SCALE, W, WP)).reshape(1, -1).copy()

    # 3x3 convs: per (branch, kh) block-Toeplitz weights over the W lane blocks
    wc_p = np.zeros((NUM_SCALES, 3, 3, WP, WP), np.float32)
    wc_p[:, :, :, :WIDTH, :WIDTH] = np.asarray(wc, np.float32)
    U = np.zeros((NUM_SCALES, 3, W * WP, W * WP), np.float32)
    for kh in range(3):
        for kw in range(3):
            for wo in range(W):
                wi = wo + kw - 1
                if 0 <= wi < W:
                    U[:, kh, wi * WP:(wi + 1) * WP,
                      wo * WP:(wo + 1) * WP] = wc_p[:, kh, kw]
    scp, bcp = pad_vec(sc, NUM_SCALES), pad_vec(bc, NUM_SCALES)
    sca = np.broadcast_to(scp[:, None, :], (NUM_SCALES, W, WP)) \
        .reshape(NUM_SCALES, 1, W * WP).copy()
    bca = np.broadcast_to(bcp[:, None, :], (NUM_SCALES, W, WP)) \
        .reshape(NUM_SCALES, 1, W * WP).copy()

    # conv3: all splits fused into one block-diagonal weight
    w3_p = np.zeros((SCALE, WP, OUTPLANES), np.float32)
    w3_p[:, :WIDTH, :] = np.asarray(w3, np.float32).reshape(SCALE, WIDTH, OUTPLANES)
    w3a = np.einsum('wv,sco->swcvo', eye, w3_p).reshape(SCALE * W * WP, W * OUTPLANES)
    s3a = np.tile(np.asarray(s3, np.float32), W).reshape(1, W * OUTPLANES)
    b3a = np.tile(np.asarray(b3, np.float32), W).reshape(1, W * OUTPLANES)

    bf16 = lambda a: jnp.asarray(a, jnp.bfloat16)
    f32 = lambda a: jnp.asarray(a, jnp.float32)
    return (bf16(w1a), f32(s1a), f32(b1a),
            bf16(U), f32(sca), f32(bca),
            bf16(w3a), f32(s3a), f32(b3a))


# ---------------------------------------------------------------------------
# Wrapper
# ---------------------------------------------------------------------------
def _pick_batch_tile(n, h, max_rows=256):
    """Largest batch tile that (a) keeps >=2 grid steps when possible so v7x's
    two TensorCores both get work, (b) caps M = B_TILE*H, (c) divides n."""
    cap = max(1, min(n if n < 2 else n // 2, max(1, max_rows // h)))
    for cand in range(cap, 0, -1):
        if n % cand == 0:
            return cand
    return 1


def bottle2neck(x_nhwc, params):
    (w1a, s1a, b1a, u, sca, bca, w3a, s3a, b3a) = params
    N, H, W, Cin = x_nhwc.shape
    LIN = W * Cin
    LOUT = W * OUTPLANES
    BR = W * WIDTH_PAD
    B_TILE = _pick_batch_tile(N, H)
    M = B_TILE * H

    x2d = x_nhwc.reshape(N * H, LIN)          # lane-dense image-row layout

    out2d = pl.pallas_call(
        partial(bottle2neck_kernel, H),
        out_shape=jax.ShapeDtypeStruct((N * H, LOUT), jnp.float32),
        grid=(N // B_TILE,),
        in_specs=[
            pl.BlockSpec((M, LIN), lambda n: (n, 0)),
            pl.BlockSpec(w1a.shape, lambda n: (0, 0)),
            pl.BlockSpec(s1a.shape, lambda n: (0, 0)),
            pl.BlockSpec(b1a.shape, lambda n: (0, 0)),
            pl.BlockSpec(u.shape, lambda n: (0, 0, 0, 0)),
            pl.BlockSpec(sca.shape, lambda n: (0, 0, 0)),
            pl.BlockSpec(bca.shape, lambda n: (0, 0, 0)),
            pl.BlockSpec(w3a.shape, lambda n: (0, 0)),
            pl.BlockSpec(s3a.shape, lambda n: (0, 0)),
            pl.BlockSpec(b3a.shape, lambda n: (0, 0)),
        ],
        out_specs=pl.BlockSpec((M, LOUT), lambda n: (n, 0)),
        scratch_shapes=[
            pltpu.VMEM((M + 2, BR), jnp.float32),          # row-shift buffer
            pltpu.VMEM((M, SCALE * BR), jnp.float32),      # concat / split buffer
        ],
        compiler_params=pltpu.CompilerParams(
            dimension_semantics=("parallel",),              # split batch blocks across TCs
            vmem_limit_bytes=32 * 1024 * 1024),
    )(x2d, w1a, s1a, b1a, u, sca, bca, w3a, s3a, b3a)

    return out2d.reshape(N, H, W, OUTPLANES)


# ---------------------------------------------------------------------------
# Pure-JAX reference (for correctness check)
# ---------------------------------------------------------------------------
def bottle2neck_ref(x, params):
    w1, s1, b1, wc, sc, bc, w3, s3, b3 = params
    out = jnp.einsum('nhwc,cd->nhwd', x, w1)
    out = jax.nn.relu(out * s1 + b1)
    spx = [out[..., i * WIDTH:(i + 1) * WIDTH] for i in range(SCALE)]
    spo = []
    sp = None
    for i in range(NUM_SCALES):
        sp = spx[i] if i == 0 else sp + spx[i]
        sp = jax.lax.conv_general_dilated(
            sp, wc[i], window_strides=(1, 1), padding='SAME',
            dimension_numbers=('NHWC', 'HWIO', 'NHWC'))
        sp = jax.nn.relu(sp * sc[i] + bc[i])
        spo.append(sp)
    spo.append(spx[-1])                    # scale > 1, pool is None
    out = jnp.concatenate(spo, axis=-1)
    out = jnp.einsum('nhwc,cd->nhwd', out, w3)
    out = out * s3 + b3
    return jax.nn.relu(out + x)            # residual = x (no downsample)


if __name__ == "__main__":
    key = jax.random.PRNGKey(0)
    ks = jax.random.split(key, 16)

    # input: batch=8 (so the batch-blocked grid actually stacks images),
    # spatial=16x16, channels=INPLANES (NHWC)
    H = W = 16
    N = 8
    x = jax.random.normal(ks[0], (N, H, W, INPLANES), jnp.float32)

    # conv weights (deterministic synthetic init)
    w1 = 0.1 * jax.random.normal(ks[1], (INPLANES, WIDTH * SCALE), jnp.float32)
    wc = 0.1 * jax.random.normal(ks[2], (NUM_SCALES, 3, 3, WIDTH, WIDTH),
                                 jnp.float32)                     # HWIO per branch
    w3 = 0.1 * jax.random.normal(ks[3], (WIDTH * SCALE, OUTPLANES), jnp.float32)

    def bn_params(k, c):
        k1, k2, k3, k4 = jax.random.split(k, 4)
        gamma = 1.0 + 0.1 * jax.random.normal(k1, (c,), jnp.float32)
        beta = 0.1 * jax.random.normal(k2, (c,), jnp.float32)
        mean = 0.1 * jax.random.normal(k3, (c,), jnp.float32)
        var = jax.random.uniform(k4, (c,), jnp.float32, 0.5, 1.5)
        return _fold_bn(gamma, beta, mean, var)

    s1, b1 = bn_params(ks[4], WIDTH * SCALE)
    branch_bn = [bn_params(ks[5 + i], WIDTH) for i in range(NUM_SCALES)]
    sc = jnp.stack([p[0] for p in branch_bn])      # (NUM_SCALES, WIDTH)
    bc = jnp.stack([p[1] for p in branch_bn])
    s3, b3 = bn_params(ks[5 + NUM_SCALES], OUTPLANES)

    params_k = build_kernel_params(W, w1, s1, b1, wc, sc, bc, w3, s3, b3)

    out = bottle2neck(x, params_k)
    out = jax.block_until_ready(out)

    ref = bottle2neck_ref(x, (w1, s1, b1, wc, sc, bc, w3, s3, b3))
    assert out.shape == (N, H, W, OUTPLANES), out.shape
    max_err = float(jnp.max(jnp.abs(out - ref)))
    # Tolerance: both sides now run bf16-operand / f32-accumulate matmuls (the
    # kernel explicitly, the XLA reference via DEFAULT TPU matmul precision),
    # but accumulation orders differ, so keep a bf16-level bound.
    assert jnp.allclose(out, ref, rtol=2e-2, atol=2e-2), f"max abs err {max_err}"
    print("KERNEL_OK")
</pallas_src>

<mosaic_0001>
module attributes {stable_mosaic.version = 11 : i64} {
  func.func @bottle2neck_kernel(%arg0: i32, %arg1: memref<64x1024xf32, #tpu.memory_space<vmem>>, %arg2: memref<1024x512xbf16, #tpu.memory_space<vmem>>, %arg3: memref<1x512xf32, #tpu.memory_space<vmem>>, %arg4: memref<1x512xf32, #tpu.memory_space<vmem>>, %arg5: memref<3x3x128x128xbf16, #tpu.memory_space<vmem>>, %arg6: memref<3x1x128xf32, #tpu.memory_space<vmem>>, %arg7: memref<3x1x128xf32, #tpu.memory_space<vmem>>, %arg8: memref<512x1024xbf16, #tpu.memory_space<vmem>>, %arg9: memref<1x1024xf32, #tpu.memory_space<vmem>>, %arg10: memref<1x1024xf32, #tpu.memory_space<vmem>>, %arg11: memref<64x1024xf32, #tpu.memory_space<vmem>>, %arg12: memref<66x128xf32, #tpu.memory_space<vmem>>, %arg13: memref<64x512xf32, #tpu.memory_space<vmem>>) attributes {dimension_semantics = [#tpu.dimension_semantics<parallel>], iteration_bounds = array<i64: 2>, scalar_prefetch = 0 : i64, scratch_operands = 2 : i64, tpu.core_type = #tpu.core_type<tc>, window_params = [{transform_indices = @transform_0, window_bounds = array<i64: 64, 1024>}, {pipeline_mode = #tpu.pipeline_mode<synchronous>, transform_indices = @transform_1, window_bounds = array<i64: 1024, 512>}, {pipeline_mode = #tpu.pipeline_mode<synchronous>, transform_indices = @transform_2, window_bounds = array<i64: 1, 512>}, {pipeline_mode = #tpu.pipeline_mode<synchronous>, transform_indices = @transform_3, window_bounds = array<i64: 1, 512>}, {pipeline_mode = #tpu.pipeline_mode<synchronous>, transform_indices = @transform_4, window_bounds = array<i64: 3, 3, 128, 128>}, {pipeline_mode = #tpu.pipeline_mode<synchronous>, transform_indices = @transform_5, window_bounds = array<i64: 3, 1, 128>}, {pipeline_mode = #tpu.pipeline_mode<synchronous>, transform_indices = @transform_6, window_bounds = array<i64: 3, 1, 128>}, {pipeline_mode = #tpu.pipeline_mode<synchronous>, transform_indices = @transform_7, window_bounds = array<i64: 512, 1024>}, {pipeline_mode = #tpu.pipeline_mode<synchronous>, transform_indices = @transform_8, window_bounds = array<i64: 1, 1024>}, {pipeline_mode = #tpu.pipeline_mode<synchronous>, transform_indices = @transform_9, window_bounds = array<i64: 1, 1024>}, {transform_indices = @transform_10, window_bounds = array<i64: 64, 1024>}]} {
    %0 = tpu.iota {dimensions = array<i32: 0>} : vector<64x128xi32>
    %c16_i32 = arith.constant 16 : i32
    %c0_i32 = arith.constant 0 : i32
    %1 = arith.cmpi eq, %c16_i32, %c0_i32 : i32
    %c1_i32 = arith.constant 1 : i32
    %2 = arith.select %1, %c1_i32, %c16_i32 : i32
    %3 = vector.broadcast %2 : i32 to vector<64x128xi32>
    %4 = arith.remsi %0, %3 : vector<64x128xi32>
    %c0_i32_0 = arith.constant 0 : i32
    %5 = vector.broadcast %c0_i32_0 : i32 to vector<64x128xi32>
    %6 = arith.cmpi ne, %4, %5 : vector<64x128xi32>
    %c0_i32_1 = arith.constant 0 : i32
    %7 = vector.broadcast %c0_i32_1 : i32 to vector<64x128xi32>
    %8 = arith.cmpi slt, %4, %7 : vector<64x128xi32>
    %c0_i32_2 = arith.constant 0 : i32
    %9 = arith.cmpi slt, %2, %c0_i32_2 : i32
    %10 = vector.broadcast %9 : i1 to vector<64x128xi1>
    %11 = vector.broadcast %10 : vector<64x128xi1> to vector<64x128xi1>
    %12 = arith.xori %8, %11 : vector<64x128xi1>
    %13 = arith.andi %12, %6 : vector<64x128xi1>
    %14 = vector.broadcast %2 : i32 to vector<64x128xi32>
    %15 = arith.addi %4, %14 : vector<64x128xi32>
    %16 = arith.select %13, %15, %4 : vector<64x128xi1>, vector<64x128xi32>
    %c0_i32_3 = arith.constant 0 : i32
    %17 = vector.broadcast %c0_i32_3 : i32 to vector<64x128xi32>
    %18 = arith.cmpi ne, %16, %17 : vector<64x128xi32>
    %c15_i32 = arith.constant 15 : i32
    %19 = vector.broadcast %c15_i32 : i32 to vector<64x128xi32>
    %20 = arith.cmpi ne, %16, %19 : vector<64x128xi32>
    %c0 = arith.constant 0 : index
    %c0_4 = arith.constant 0 : index
    %21 = vector.load %arg1[%c0, %c0_4] : memref<64x1024xf32, #tpu.memory_space<vmem>>, vector<64x1024xf32>
    %22 = arith.truncf %21 : vector<64x1024xf32> to vector<64x1024xbf16>
    %c0_5 = arith.constant 0 : index
    %c0_6 = arith.constant 0 : index
    %23 = vector.load %arg2[%c0_5, %c0_6] : memref<1024x512xbf16, #tpu.memory_space<vmem>>, vector<1024x256xbf16>
    %cst = arith.constant dense<0.000000e+00> : vector<64x256xf32>
    %24 = tpu.matmul %22, %23, %cst {dimension_numbers = #tpu.dot_dimension_numbers<[1], [0], [0], [1], [0, 0, 1, 1], [], []>} : vector<64x1024xbf16>, vector<1024x256xbf16>, vector<64x256xf32> -> vector<64x256xf32>
    %c0_7 = arith.constant 0 : index
    %c0_8 = arith.constant 0 : index
    %25 = vector.load %arg3[%c0_7, %c0_8] : memref<1x512xf32, #tpu.memory_space<vmem>>, vector<1x256xf32>
    %26 = vector.broadcast %25 : vector<1x256xf32> to vector<64x256xf32>
    %27 = arith.mulf %24, %26 : vector<64x256xf32>
    %c0_9 = arith.constant 0 : index
    %c0_10 = arith.constant 0 : index
    %28 = vector.load %arg4[%c0_9, %c0_10] : memref<1x512xf32, #tpu.memory_space<vmem>>, vector<1x256xf32>
    %29 = vector.broadcast %28 : vector<1x256xf32> to vector<64x256xf32>
    %30 = arith.addf %27, %29 : vector<64x256xf32>
    %cst_11 = arith.constant 0.000000e+00 : f32
    %31 = vector.broadcast %cst_11 : f32 to vector<64x256xf32>
    %32 = arith.maximumf %30, %31 : vector<64x256xf32>
    %c0_12 = arith.constant 0 : index
    %c0_13 = arith.constant 0 : index
    %33 = vector.load %arg13[%c0_12, %c0_13] : memref<64x512xf32, #tpu.memory_space<vmem>>, vector<64x256xf32>
    tpu.vector_store %arg13[%c0_12, %c0_13], %32 {strides = array<i32>} : memref<64x512xf32, #tpu.memory_space<vmem>>, vector<64x256xf32>,
    %c0_14 = arith.constant 0 : index
    %c256 = arith.constant 256 : index
    %34 = vector.load %arg2[%c0_14, %c256] : memref<1024x512xbf16, #tpu.memory_space<vmem>>, vector<1024x256xbf16>
    %cst_15 = arith.constant dense<0.000000e+00> : vector<64x256xf32>
    %35 = tpu.matmul %22, %34, %cst_15 {dimension_numbers = #tpu.dot_dimension_numbers<[1], [0], [0], [1], [0, 0, 1, 1], [], []>} : vector<64x1024xbf16>, vector<1024x256xbf16>, vector<64x256xf32> -> vector<64x256xf32>
    %c0_16 = arith.constant 0 : index
    %c256_17 = arith.constant 256 : index
    %36 = vector.load %arg3[%c0_16, %c256_17] : memref<1x512xf32, #tpu.memory_space<vmem>>, vector<1x256xf32>
    %37 = vector.broadcast %36 : vector<1x256xf32> to vector<64x256xf32>
    %38 = arith.mulf %35, %37 : vector<64x256xf32>
    %c0_18 = arith.constant 0 : index
    %c256_19 = arith.constant 256 : index
    %39 = vector.load %arg4[%c0_18, %c256_19] : memref<1x512xf32, #tpu.memory_space<vmem>>, vector<1x256xf32>
    %40 = vector.broadcast %39 : vector<1x256xf32> to vector<64x256xf32>
    %41 = arith.addf %38, %40 : vector<64x256xf32>
    %cst_20 = arith.constant 0.000000e+00 : f32
    %42 = vector.broadcast %cst_20 : f32 to vector<64x256xf32>
    %43 = arith.maximumf %41, %42 : vector<64x256xf32>
    %c0_21 = arith.constant 0 : index
    %c256_22 = arith.constant 256 : index
    %44 = vector.load %arg13[%c0_21, %c256_22] : memref<64x512xf32, #tpu.memory_space<vmem>>, vector<64x256xf32>
    tpu.vector_store %arg13[%c0_21, %c256_22], %43 {strides = array<i32>} : memref<64x512xf32, #tpu.memory_space<vmem>>, vector<64x256xf32>,
    %c0_23 = arith.constant 0 : index
    %c0_24 = arith.constant 0 : index
    %45 = vector.load %arg13[%c0_23, %c0_24] : memref<64x512xf32, #tpu.memory_space<vmem>>, vector<64x128xf32>
    %c1 = arith.constant 1 : index
    %c0_25 = arith.constant 0 : index
    %46 = vector.load %arg12[%c1, %c0_25] : memref<66x128xf32, #tpu.memory_space<vmem>>, vector<64x128xf32>
    tpu.vector_store %arg12[%c1, %c0_25], %45 {strides = array<i32>} : memref<66x128xf32, #tpu.memory_space<vmem>>, vector<64x128xf32>,
    %47 = arith.truncf %45 : vector<64x128xf32> to vector<64x128xbf16>
    %c0_26 = arith.constant 0 : index
    %c0_27 = arith.constant 0 : index
    %48 = vector.load %arg12[%c0_26, %c0_27] : memref<66x128xf32, #tpu.memory_space<vmem>>, vector<64x128xf32>
    %cst_28 = arith.constant 0.000000e+00 : f32
    %49 = vector.broadcast %cst_28 : f32 to vector<64x128xf32>
    %50 = arith.select %18, %48, %49 : vector<64x128xi1>, vector<64x128xf32>
    %51 = arith.truncf %50 : vector<64x128xf32> to vector<64x128xbf16>
    %c2 = arith.constant 2 : index
    %c0_29 = arith.constant 0 : index
    %52 = vector.load %arg12[%c2, %c0_29] : memref<66x128xf32, #tpu.memory_space<vmem>>, vector<64x128xf32>
    %cst_30 = arith.constant 0.000000e+00 : f32
    %53 = vector.broadcast %cst_30 : f32 to vector<64x128xf32>
    %54 = arith.select %20, %52, %53 : vector<64x128xi1>, vector<64x128xf32>
    %55 = arith.truncf %54 : vector<64x128xf32> to vector<64x128xbf16>
    %c0_31 = arith.constant 0 : index
    %c1_32 = arith.constant 1 : index
    %c0_33 = arith.constant 0 : index
    %c0_34 = arith.constant 0 : index
    %56 = vector.load %arg5[%c0_31, %c1_32, %c0_33, %c0_34] : memref<3x3x128x128xbf16, #tpu.memory_space<vmem>>, vector<1x1x128x128xbf16>
    %57 = vector.shape_cast %56 : vector<1x1x128x128xbf16> to vector<128x128xbf16>
    %cst_35 = arith.constant dense<0.000000e+00> : vector<64x128xf32>
    %58 = tpu.matmul %47, %57, %cst_35 {dimension_numbers = #tpu.dot_dimension_numbers<[1], [0], [0], [1], [0, 0, 1, 1], [], []>} : vector<64x128xbf16>, vector<128x128xbf16>, vector<64x128xf32> -> vector<64x128xf32>
    %c0_36 = arith.constant 0 : index
    %c0_37 = arith.constant 0 : index
    %c0_38 = arith.constant 0 : index
    %c0_39 = arith.constant 0 : index
    %59 = vector.load %arg5[%c0_36, %c0_37, %c0_38, %c0_39] : memref<3x3x128x128xbf16, #tpu.memory_space<vmem>>, vector<1x1x128x128xbf16>
    %60 = vector.shape_cast %59 : vector<1x1x128x128xbf16> to vector<128x128xbf16>
    %cst_40 = arith.constant dense<0.000000e+00> : vector<64x128xf32>
    %61 = tpu.matmul %51, %60, %cst_40 {dimension_numbers = #tpu.dot_dimension_numbers<[1], [0], [0], [1], [0, 0, 1, 1], [], []>} : vector<64x128xbf16>, vector<128x128xbf16>, vector<64x128xf32> -> vector<64x128xf32>
    %62 = arith.addf %58, %61 : vector<64x128xf32>
    %c0_41 = arith.constant 0 : index
    %c2_42 = arith.constant 2 : index
    %c0_43 = arith.constant 0 : index
    %c0_44 = arith.constant 0 : index
    %63 = vector.load %arg5[%c0_41, %c2_42, %c0_43, %c0_44] : memref<3x3x128x128xbf16, #tpu.memory_space<vmem>>, vector<1x1x128x128xbf16>
    %64 = vector.shape_cast %63 : vector<1x1x128x128xbf16> to vector<128x128xbf16>
    %cst_45 = arith.constant dense<0.000000e+00> : vector<64x128xf32>
    %65 = tpu.matmul %55, %64, %cst_45 {dimension_numbers = #tpu.dot_dimension_numbers<[1], [0], [0], [1], [0, 0, 1, 1], [], []>} : vector<64x128xbf16>, vector<128x128xbf16>, vector<64x128xf32> -> vector<64x128xf32>
    %66 = arith.addf %62, %65 : vector<64x128xf32>
    %c0_46 = arith.constant 0 : index
    %c0_47 = arith.constant 0 : index
    %c0_48 = arith.constant 0 : index
    %67 = vector.load %arg6[%c0_46, %c0_47, %c0_48] : memref<3x1x128xf32, #tpu.memory_space<vmem>>, vector<1x1x128xf32>
    %68 = vector.shape_cast %67 : vector<1x1x128xf32> to vector<1x128xf32>
    %69 = vector.broadcast %68 : vector<1x128xf32> to vector<64x128xf32>
    %70 = arith.mulf %66, %69 : vector<64x128xf32>
    %c0_49 = arith.constant 0 : index
    %c0_50 = arith.constant 0 : index
    %c0_51 = arith.constant 0 : index
    %71 = vector.load %arg7[%c0_49, %c0_50, %c0_51] : memref<3x1x128xf32, #tpu.memory_space<vmem>>, vector<1x1x128xf32>
    %72 = vector.shape_cast %71 : vector<1x1x128xf32> to vector<1x128xf32>
    %73 = vector.broadcast %72 : vector<1x128xf32> to vector<64x128xf32>
    %74 = arith.addf %70, %73 : vector<64x128xf32>
    %cst_52 = arith.constant 0.000000e+00 : f32
    %75 = vector.broadcast %cst_52 : f32 to vector<64x128xf32>
    %76 = arith.maximumf %74, %75 : vector<64x128xf32>
    %c0_53 = arith.constant 0 : index
    %c0_54 = arith.constant 0 : index
    %77 = vector.load %arg13[%c0_53, %c0_54] : memref<64x512xf32, #tpu.memory_space<vmem>>, vector<64x128xf32>
    tpu.vector_store %arg13[%c0_53, %c0_54], %76 {strides = array<i32>} : memref<64x512xf32, #tpu.memory_space<vmem>>, vector<64x128xf32>,
    %c0_55 = arith.constant 0 : index
    %c128 = arith.constant 128 : index
    %78 = vector.load %arg13[%c0_55, %c128] : memref<64x512xf32, #tpu.memory_space<vmem>>, vector<64x128xf32>
    %79 = arith.addf %76, %78 : vector<64x128xf32>
    %c1_56 = arith.constant 1 : index
    %c0_57 = arith.constant 0 : index
    %80 = vector.load %arg12[%c1_56, %c0_57] : memref<66x128xf32, #tpu.memory_space<vmem>>, vector<64x128xf32>
    tpu.vector_store %arg12[%c1_56, %c0_57], %79 {strides = array<i32>} : memref<66x128xf32, #tpu.memory_space<vmem>>, vector<64x128xf32>,
    %81 = arith.truncf %79 : vector<64x128xf32> to vector<64x128xbf16>
    %c0_58 = arith.constant 0 : index
    %c0_59 = arith.constant 0 : index
    %82 = vector.load %arg12[%c0_58, %c0_59] : memref<66x128xf32, #tpu.memory_space<vmem>>, vector<64x128xf32>
    %cst_60 = arith.constant 0.000000e+00 : f32
    %83 = vector.broadcast %cst_60 : f32 to vector<64x128xf32>
    %84 = arith.select %18, %82, %83 : vector<64x128xi1>, vector<64x128xf32>
    %85 = arith.truncf %84 : vector<64x128xf32> to vector<64x128xbf16>
    %c2_61 = arith.constant 2 : index
    %c0_62 = arith.constant 0 : index
    %86 = vector.load %arg12[%c2_61, %c0_62] : memref<66x128xf32, #tpu.memory_space<vmem>>, vector<64x128xf32>
    %cst_63 = arith.constant 0.000000e+00 : f32
    %87 = vector.broadcast %cst_63 : f32 to vector<64x128xf32>
    %88 = arith.select %20, %86, %87 : vector<64x128xi1>, vector<64x128xf32>
    %89 = arith.truncf %88 : vector<64x128xf32> to vector<64x128xbf16>
    %c1_64 = arith.constant 1 : index
    %c1_65 = arith.constant 1 : index
    %c0_66 = arith.constant 0 : index
    %c0_67 = arith.constant 0 : index
    %90 = vector.load %arg5[%c1_64, %c1_65, %c0_66, %c0_67] : memref<3x3x128x128xbf16, #tpu.memory_space<vmem>>, vector<1x1x128x128xbf16>
    %91 = vector.shape_cast %90 : vector<1x1x128x128xbf16> to vector<128x128xbf16>
    %cst_68 = arith.constant dense<0.000000e+00> : vector<64x128xf32>
    %92 = tpu.matmul %81, %91, %cst_68 {dimension_numbers = #tpu.dot_dimension_numbers<[1], [0], [0], [1], [0, 0, 1, 1], [], []>} : vector<64x128xbf16>, vector<128x128xbf16>, vector<64x128xf32> -> vector<64x128xf32>
    %c1_69 = arith.constant 1 : index
    %c0_70 = arith.constant 0 : index
    %c0_71 = arith.constant 0 : index
    %c0_72 = arith.constant 0 : index
    %93 = vector.load %arg5[%c1_69, %c0_70, %c0_71, %c0_72] : memref<3x3x128x128xbf16, #tpu.memory_space<vmem>>, vector<1x1x128x128xbf16>
    %94 = vector.shape_cast %93 : vector<1x1x128x128xbf16> to vector<128x128xbf16>
    %cst_73 = arith.constant dense<0.000000e+00> : vector<64x128xf32>
    %95 = tpu.matmul %85, %94, %cst_73 {dimension_numbers = #tpu.dot_dimension_numbers<[1], [0], [0], [1], [0, 0, 1, 1], [], []>} : vector<64x128xbf16>, vector<128x128xbf16>, vector<64x128xf32> -> vector<64x128xf32>
    %96 = arith.addf %92, %95 : vector<64x128xf32>
    %c1_74 = arith.constant 1 : index
    %c2_75 = arith.constant 2 : index
    %c0_76 = arith.constant 0 : index
    %c0_77 = arith.constant 0 : index
    %97 = vector.load %arg5[%c1_74, %c2_75, %c0_76, %c0_77] : memref<3x3x128x128xbf16, #tpu.memory_space<vmem>>, vector<1x1x128x128xbf16>
    %98 = vector.shape_cast %97 : vector<1x1x128x128xbf16> to vector<128x128xbf16>
    %cst_78 = arith.constant dense<0.000000e+00> : vector<64x128xf32>
    %99 = tpu.matmul %89, %98, %cst_78 {dimension_numbers = #tpu.dot_dimension_numbers<[1], [0], [0], [1], [0, 0, 1, 1], [], []>} : vector<64x128xbf16>, vector<128x128xbf16>, vector<64x128xf32> -> vector<64x128xf32>
    %100 = arith.addf %96, %99 : vector<64x128xf32>
    %c1_79 = arith.constant 1 : index
    %c0_80 = arith.constant 0 : index
    %c0_81 = arith.constant 0 : index
    %101 = vector.load %arg6[%c1_79, %c0_80, %c0_81] : memref<3x1x128xf32, #tpu.memory_space<vmem>>, vector<1x1x128xf32>
    %102 = vector.shape_cast %101 : vector<1x1x128xf32> to vector<1x128xf32>
    %103 = vector.broadcast %102 : vector<1x128xf32> to vector<64x128xf32>
    %104 = arith.mulf %100, %103 : vector<64x128xf32>
    %c1_82 = arith.constant 1 : index
    %c0_83 = arith.constant 0 : index
    %c0_84 = arith.constant 0 : index
    %105 = vector.load %arg7[%c1_82, %c0_83, %c0_84] : memref<3x1x128xf32, #tpu.memory_space<vmem>>, vector<1x1x128xf32>
    %106 = vector.shape_cast %105 : vector<1x1x128xf32> to vector<1x128xf32>
    %107 = vector.broadcast %106 : vector<1x128xf32> to vector<64x128xf32>
    %108 = arith.addf %104, %107 : vector<64x128xf32>
    %cst_85 = arith.constant 0.000000e+00 : f32
    %109 = vector.broadcast %cst_85 : f32 to vector<64x128xf32>
    %110 = arith.maximumf %108, %109 : vector<64x128xf32>
    %c0_86 = arith.constant 0 : index
    %c128_87 = arith.constant 128 : index
    %111 = vector.load %arg13[%c0_86, %c128_87] : memref<64x512xf32, #tpu.memory_space<vmem>>, vector<64x128xf32>
    tpu.vector_store %arg13[%c0_86, %c128_87], %110 {strides = array<i32>} : memref<64x512xf32, #tpu.memory_space<vmem>>, vector<64x128xf32>,
    %c0_88 = arith.constant 0 : index
    %c256_89 = arith.constant 256 : index
    %112 = vector.load %arg13[%c0_88, %c256_89] : memref<64x512xf32, #tpu.memory_space<vmem>>, vector<64x128xf32>
    %113 = arith.addf %110, %112 : vector<64x128xf32>
    %c1_90 = arith.constant 1 : index
    %c0_91 = arith.constant 0 : index
    %114 = vector.load %arg12[%c1_90, %c0_91] : memref<66x128xf32, #tpu.memory_space<vmem>>, vector<64x128xf32>
    tpu.vector_store %arg12[%c1_90, %c0_91], %113 {strides = array<i32>} : memref<66x128xf32, #tpu.memory_space<vmem>>, vector<64x128xf32>,
    %115 = arith.truncf %113 : vector<64x128xf32> to vector<64x128xbf16>
    %c0_92 = arith.constant 0 : index
    %c0_93 = arith.constant 0 : index
    %116 = vector.load %arg12[%c0_92, %c0_93] : memref<66x128xf32, #tpu.memory_space<vmem>>, vector<64x128xf32>
    %cst_94 = arith.constant 0.000000e+00 : f32
    %117 = vector.broadcast %cst_94 : f32 to vector<64x128xf32>
    %118 = arith.select %18, %116, %117 : vector<64x128xi1>, vector<64x128xf32>
    %119 = arith.truncf %118 : vector<64x128xf32> to vector<64x128xbf16>
    %c2_95 = arith.constant 2 : index
    %c0_96 = arith.constant 0 : index
    %120 = vector.load %arg12[%c2_95, %c0_96] : memref<66x128xf32, #tpu.memory_space<vmem>>, vector<64x128xf32>
    %cst_97 = arith.constant 0.000000e+00 : f32
    %121 = vector.broadcast %cst_97 : f32 to vector<64x128xf32>
    %122 = arith.select %20, %120, %121 : vector<64x128xi1>, vector<64x128xf32>
    %123 = arith.truncf %122 : vector<64x128xf32> to vector<64x128xbf16>
    %c2_98 = arith.constant 2 : index
    %c1_99 = arith.constant 1 : index
    %c0_100 = arith.constant 0 : index
    %c0_101 = arith.constant 0 : index
    %124 = vector.load %arg5[%c2_98, %c1_99, %c0_100, %c0_101] : memref<3x3x128x128xbf16, #tpu.memory_space<vmem>>, vector<1x1x128x128xbf16>
    %125 = vector.shape_cast %124 : vector<1x1x128x128xbf16> to vector<128x128xbf16>
    %cst_102 = arith.constant dense<0.000000e+00> : vector<64x128xf32>
    %126 = tpu.matmul %115, %125, %cst_102 {dimension_numbers = #tpu.dot_dimension_numbers<[1], [0], [0], [1], [0, 0, 1, 1], [], []>} : vector<64x128xbf16>, vector<128x128xbf16>, vector<64x128xf32> -> vector<64x128xf32>
    %c2_103 = arith.constant 2 : index
    %c0_104 = arith.constant 0 : index
    %c0_105 = arith.constant 0 : index
    %c0_106 = arith.constant 0 : index
    %127 = vector.load %arg5[%c2_103, %c0_104, %c0_105, %c0_106] : memref<3x3x128x128xbf16, #tpu.memory_space<vmem>>, vector<1x1x128x128xbf16>
    %128 = vector.shape_cast %127 : vector<1x1x128x128xbf16> to vector<128x128xbf16>
    %cst_107 = arith.constant dense<0.000000e+00> : vector<64x128xf32>
    %129 = tpu.matmul %119, %128, %cst_107 {dimension_numbers = #tpu.dot_dimension_numbers<[1], [0], [0], [1], [0, 0, 1, 1], [], []>} : vector<64x128xbf16>, vector<128x128xbf16>, vector<64x128xf32> -> vector<64x128xf32>
    %130 = arith.addf %126, %129 : vector<64x128xf32>
    %c2_108 = arith.constant 2 : index
    %c2_109 = arith.constant 2 : index
    %c0_110 = arith.constant 0 : index
    %c0_111 = arith.constant 0 : index
    %131 = vector.load %arg5[%c2_108, %c2_109, %c0_110, %c0_111] : memref<3x3x128x128xbf16, #tpu.memory_space<vmem>>, vector<1x1x128x128xbf16>
    %132 = vector.shape_cast %131 : vector<1x1x128x128xbf16> to vector<128x128xbf16>
    %cst_112 = arith.constant dense<0.000000e+00> : vector<64x128xf32>
    %133 = tpu.matmul %123, %132, %cst_112 {dimension_numbers = #tpu.dot_dimension_numbers<[1], [0], [0], [1], [0, 0, 1, 1], [], []>} : vector<64x128xbf16>, vector<128x128xbf16>, vector<64x128xf32> -> vector<64x128xf32>
    %134 = arith.addf %130, %133 : vector<64x128xf32>
    %c2_113 = arith.constant 2 : index
    %c0_114 = arith.constant 0 : index
    %c0_115 = arith.constant 0 : index
    %135 = vector.load %arg6[%c2_113, %c0_114, %c0_115] : memref<3x1x128xf32, #tpu.memory_space<vmem>>, vector<1x1x128xf32>
    %136 = vector.shape_cast %135 : vector<1x1x128xf32> to vector<1x128xf32>
    %137 = vector.broadcast %136 : vector<1x128xf32> to vector<64x128xf32>
    %138 = arith.mulf %134, %137 : vector<64x128xf32>
    %c2_116 = arith.constant 2 : index
    %c0_117 = arith.constant 0 : index
    %c0_118 = arith.constant 0 : index
    %139 = vector.load %arg7[%c2_116, %c0_117, %c0_118] : memref<3x1x128xf32, #tpu.memory_space<vmem>>, vector<1x1x128xf32>
    %140 = vector.shape_cast %139 : vector<1x1x128xf32> to vector<1x128xf32>
    %141 = vector.broadcast %140 : vector<1x128xf32> to vector<64x128xf32>
    %142 = arith.addf %138, %141 : vector<64x128xf32>
    %cst_119 = arith.constant 0.000000e+00 : f32
    %143 = vector.broadcast %cst_119 : f32 to vector<64x128xf32>
    %144 = arith.maximumf %142, %143 : vector<64x128xf32>
    %c0_120 = arith.constant 0 : index
    %c256_121 = arith.constant 256 : index
    %145 = vector.load %arg13[%c0_120, %c256_121] : memref<64x512xf32, #tpu.memory_space<vmem>>, vector<64x128xf32>
    tpu.vector_store %arg13[%c0_120, %c256_121], %144 {strides = array<i32>} : memref<64x512xf32, #tpu.memory_space<vmem>>, vector<64x128xf32>,
    %c0_122 = arith.constant 0 : index
    %c0_123 = arith.constant 0 : index
    %146 = vector.load %arg13[%c0_122, %c0_123] : memref<64x512xf32, #tpu.memory_space<vmem>>, vector<64x512xf32>
    %147 = arith.truncf %146 : vector<64x512xf32> to vector<64x512xbf16>
    %c0_124 = arith.constant 0 : index
    %c0_125 = arith.constant 0 : index
    %148 = vector.load %arg8[%c0_124, %c0_125] : memref<512x1024xbf16, #tpu.memory_space<vmem>>, vector<512x256xbf16>
    %cst_126 = arith.constant dense<0.000000e+00> : vector<64x256xf32>
    %149 = tpu.matmul %147, %148, %cst_126 {dimension_numbers = #tpu.dot_dimension_numbers<[1], [0], [0], [1], [0, 0, 1, 1], [], []>} : vector<64x512xbf16>, vector<512x256xbf16>, vector<64x256xf32> -> vector<64x256xf32>
    %c0_127 = arith.constant 0 : index
    %c0_128 = arith.constant 0 : index
    %150 = vector.load %arg9[%c0_127, %c0_128] : memref<1x1024xf32, #tpu.memory_space<vmem>>, vector<1x256xf32>
    %151 = vector.broadcast %150 : vector<1x256xf32> to vector<64x256xf32>
    %152 = arith.mulf %149, %151 : vector<64x256xf32>
    %c0_129 = arith.constant 0 : index
    %c0_130 = arith.constant 0 : index
    %153 = vector.load %arg10[%c0_129, %c0_130] : memref<1x1024xf32, #tpu.memory_space<vmem>>, vector<1x256xf32>
    %154 = vector.broadcast %153 : vector<1x256xf32> to vector<64x256xf32>
    %155 = arith.addf %152, %154 : vector<64x256xf32>
    %c0_131 = arith.constant 0 : index
    %c0_132 = arith.constant 0 : index
    %156 = vector.load %arg1[%c0_131, %c0_132] : memref<64x1024xf32, #tpu.memory_space<vmem>>, vector<64x256xf32>
    %157 = arith.addf %155, %156 : vector<64x256xf32>
    %cst_133 = arith.constant 0.000000e+00 : f32
    %158 = vector.broadcast %cst_133 : f32 to vector<64x256xf32>
    %159 = arith.maximumf %157, %158 : vector<64x256xf32>
    %c0_134 = arith.constant 0 : index
    %c0_135 = arith.constant 0 : index
    %160 = vector.load %arg11[%c0_134, %c0_135] : memref<64x1024xf32, #tpu.memory_space<vmem>>, vector<64x256xf32>
    tpu.vector_store %arg11[%c0_134, %c0_135], %159 {strides = array<i32>} : memref<64x1024xf32, #tpu.memory_space<vmem>>, vector<64x256xf32>,
    %c0_136 = arith.constant 0 : index
    %c256_137 = arith.constant 256 : index
    %161 = vector.load %arg8[%c0_136, %c256_137] : memref<512x1024xbf16, #tpu.memory_space<vmem>>, vector<512x256xbf16>
    %cst_138 = arith.constant dense<0.000000e+00> : vector<64x256xf32>
    %162 = tpu.matmul %147, %161, %cst_138 {dimension_numbers = #tpu.dot_dimension_numbers<[1], [0], [0], [1], [0, 0, 1, 1], [], []>} : vector<64x512xbf16>, vector<512x256xbf16>, vector<64x256xf32> -> vector<64x256xf32>
    %c0_139 = arith.constant 0 : index
    %c256_140 = arith.constant 256 : index
    %163 = vector.load %arg9[%c0_139, %c256_140] : memref<1x1024xf32, #tpu.memory_space<vmem>>, vector<1x256xf32>
    %164 = vector.broadcast %163 : vector<1x256xf32> to vector<64x256xf32>
    %165 = arith.mulf %162, %164 : vector<64x256xf32>
    %c0_141 = arith.constant 0 : index
    %c256_142 = arith.constant 256 : index
    %166 = vector.load %arg10[%c0_141, %c256_142] : memref<1x1024xf32, #tpu.memory_space<vmem>>, vector<1x256xf32>
    %167 = vector.broadcast %166 : vector<1x256xf32> to vector<64x256xf32>
    %168 = arith.addf %165, %167 : vector<64x256xf32>
    %c0_143 = arith.constant 0 : index
    %c256_144 = arith.constant 256 : index
    %169 = vector.load %arg1[%c0_143, %c256_144] : memref<64x1024xf32, #tpu.memory_space<vmem>>, vector<64x256xf32>
    %170 = arith.addf %168, %169 : vector<64x256xf32>
    %cst_145 = arith.constant 0.000000e+00 : f32
    %171 = vector.broadcast %cst_145 : f32 to vector<64x256xf32>
    %172 = arith.maximumf %170, %171 : vector<64x256xf32>
    %c0_146 = arith.constant 0 : index
    %c256_147 = arith.constant 256 : index
    %173 = vector.load %arg11[%c0_146, %c256_147] : memref<64x1024xf32, #tpu.memory_space<vmem>>, vector<64x256xf32>
    tpu.vector_store %arg11[%c0_146, %c256_147], %172 {strides = array<i32>} : memref<64x1024xf32, #tpu.memory_space<vmem>>, vector<64x256xf32>,
    %c0_148 = arith.constant 0 : index
    %c512 = arith.constant 512 : index
    %174 = vector.load %arg8[%c0_148, %c512] : memref<512x1024xbf16, #tpu.memory_space<vmem>>, vector<512x256xbf16>
    %cst_149 = arith.constant dense<0.000000e+00> : vector<64x256xf32>
    %175 = tpu.matmul %147, %174, %cst_149 {dimension_numbers = #tpu.dot_dimension_numbers<[1], [0], [0], [1], [0, 0, 1, 1], [], []>} : vector<64x512xbf16>, vector<512x256xbf16>, vector<64x256xf32> -> vector<64x256xf32>
    %c0_150 = arith.constant 0 : index
    %c512_151 = arith.constant 512 : index
    %176 = vector.load %arg9[%c0_150, %c512_151] : memref<1x1024xf32, #tpu.memory_space<vmem>>, vector<1x256xf32>
    %177 = vector.broadcast %176 : vector<1x256xf32> to vector<64x256xf32>
    %178 = arith.mulf %175, %177 : vector<64x256xf32>
    %c0_152 = arith.constant 0 : index
    %c512_153 = arith.constant 512 : index
    %179 = vector.load %arg10[%c0_152, %c512_153] : memref<1x1024xf32, #tpu.memory_space<vmem>>, vector<1x256xf32>
    %180 = vector.broadcast %179 : vector<1x256xf32> to vector<64x256xf32>
    %181 = arith.addf %178, %180 : vector<64x256xf32>
    %c0_154 = arith.constant 0 : index
    %c512_155 = arith.constant 512 : index
    %182 = vector.load %arg1[%c0_154, %c512_155] : memref<64x1024xf32, #tpu.memory_space<vmem>>, vector<64x256xf32>
    %183 = arith.addf %181, %182 : vector<64x256xf32>
    %cst_156 = arith.constant 0.000000e+00 : f32
    %184 = vector.broadcast %cst_156 : f32 to vector<64x256xf32>
    %185 = arith.maximumf %183, %184 : vector<64x256xf32>
    %c0_157 = arith.constant 0 : index
    %c512_158 = arith.constant 512 : index
    %186 = vector.load %arg11[%c0_157, %c512_158] : memref<64x1024xf32, #tpu.memory_space<vmem>>, vector<64x256xf32>
    tpu.vector_store %arg11[%c0_157, %c512_158], %185 {strides = array<i32>} : memref<64x1024xf32, #tpu.memory_space<vmem>>, vector<64x256xf32>,
    %c0_159 = arith.constant 0 : index
    %c768 = arith.constant 768 : index
    %187 = vector.load %arg8[%c0_159, %c768] : memref<512x1024xbf16, #tpu.memory_space<vmem>>, vector<512x256xbf16>
    %cst_160 = arith.constant dense<0.000000e+00> : vector<64x256xf32>
    %188 = tpu.matmul %147, %187, %cst_160 {dimension_numbers = #tpu.dot_dimension_numbers<[1], [0], [0], [1], [0, 0, 1, 1], [], []>} : vector<64x512xbf16>, vector<512x256xbf16>, vector<64x256xf32> -> vector<64x256xf32>
    %c0_161 = arith.constant 0 : index
    %c768_162 = arith.constant 768 : index
    %189 = vector.load %arg9[%c0_161, %c768_162] : memref<1x1024xf32, #tpu.memory_space<vmem>>, vector<1x256xf32>
    %190 = vector.broadcast %189 : vector<1x256xf32> to vector<64x256xf32>
    %191 = arith.mulf %188, %190 : vector<64x256xf32>
    %c0_163 = arith.constant 0 : index
    %c768_164 = arith.constant 768 : index
    %192 = vector.load %arg10[%c0_163, %c768_164] : memref<1x1024xf32, #tpu.memory_space<vmem>>, vector<1x256xf32>
    %193 = vector.broadcast %192 : vector<1x256xf32> to vector<64x256xf32>
    %194 = arith.addf %191, %193 : vector<64x256xf32>
    %c0_165 = arith.constant 0 : index
    %c768_166 = arith.constant 768 : index
    %195 = vector.load %arg1[%c0_165, %c768_166] : memref<64x1024xf32, #tpu.memory_space<vmem>>, vector<64x256xf32>
    %196 = arith.addf %194, %195 : vector<64x256xf32>
    %cst_167 = arith.constant 0.000000e+00 : f32
    %197 = vector.broadcast %cst_167 : f32 to vector<64x256xf32>
    %198 = arith.maximumf %196, %197 : vector<64x256xf32>
    %c0_168 = arith.constant 0 : index
    %c768_169 = arith.constant 768 : index
    %199 = vector.load %arg11[%c0_168, %c768_169] : memref<64x1024xf32, #tpu.memory_space<vmem>>, vector<64x256xf32>
    tpu.vector_store %arg11[%c0_168, %c768_169], %198 {strides = array<i32>} : memref<64x1024xf32, #tpu.memory_space<vmem>>, vector<64x256xf32>,
    return
  }
  func.func @transform_0(%arg0: i32) -> (i32, i32) {
    %c0_i32 = arith.constant 0 : i32
    %c0_i32_0 = arith.constant 0 : i32
    return %arg0, %c0_i32 : i32, i32
  }
  func.func @transform_1(%arg0: i32) -> (i32, i32) {
    %c0_i32 = arith.constant 0 : i32
    %c0_i32_0 = arith.constant 0 : i32
    %c0_i32_1 = arith.constant 0 : i32
    return %c0_i32, %c0_i32_0 : i32, i32
  }
  func.func @transform_2(%arg0: i32) -> (i32, i32) {
    %c0_i32 = arith.constant 0 : i32
    %c0_i32_0 = arith.constant 0 : i32
    %c0_i32_1 = arith.constant 0 : i32
    return %c0_i32, %c0_i32_0 : i32, i32
  }
  func.func @transform_3(%arg0: i32) -> (i32, i32) {
    %c0_i32 = arith.constant 0 : i32
    %c0_i32_0 = arith.constant 0 : i32
    %c0_i32_1 = arith.constant 0 : i32
    return %c0_i32, %c0_i32_0 : i32, i32
  }
  func.func @transform_4(%arg0: i32) -> (i32, i32, i32, i32) {
    %c0_i32 = arith.constant 0 : i32
    %c0_i32_0 = arith.constant 0 : i32
    %c0_i32_1 = arith.constant 0 : i32
    %c0_i32_2 = arith.constant 0 : i32
    %c0_i32_3 = arith.constant 0 : i32
    return %c0_i32, %c0_i32_0, %c0_i32_1, %c0_i32_2 : i32, i32, i32, i32
  }
  func.func @transform_5(%arg0: i32) -> (i32, i32, i32) {
    %c0_i32 = arith.constant 0 : i32
    %c0_i32_0 = arith.constant 0 : i32
    %c0_i32_1 = arith.constant 0 : i32
    %c0_i32_2 = arith.constant 0 : i32
    return %c0_i32, %c0_i32_0, %c0_i32_1 : i32, i32, i32
  }
  func.func @transform_6(%arg0: i32) -> (i32, i32, i32) {
    %c0_i32 = arith.constant 0 : i32
    %c0_i32_0 = arith.constant 0 : i32
    %c0_i32_1 = arith.constant 0 : i32
    %c0_i32_2 = arith.constant 0 : i32
    return %c0_i32, %c0_i32_0, %c0_i32_1 : i32, i32, i32
  }
  func.func @transform_7(%arg0: i32) -> (i32, i32) {
    %c0_i32 = arith.constant 0 : i32
    %c0_i32_0 = arith.constant 0 : i32
    %c0_i32_1 = arith.constant 0 : i32
    return %c0_i32, %c0_i32_0 : i32, i32
  }
  func.func @transform_8(%arg0: i32) -> (i32, i32) {
    %c0_i32 = arith.constant 0 : i32
    %c0_i32_0 = arith.constant 0 : i32
    %c0_i32_1 = arith.constant 0 : i32
    return %c0_i32, %c0_i32_0 : i32, i32
  }
  func.func @transform_9(%arg0: i32) -> (i32, i32) {
    %c0_i32 = arith.constant 0 : i32
    %c0_i32_0 = arith.constant 0 : i32
    %c0_i32_1 = arith.constant 0 : i32
    return %c0_i32, %c0_i32_0 : i32, i32
  }
  func.func @transform_10(%arg0: i32) -> (i32, i32) {
    %c0_i32 = arith.constant 0 : i32
    %c0_i32_0 = arith.constant 0 : i32
    return %arg0, %c0_i32 : i32, i32
  }
}

</mosaic_0001>

<bundles_post_ra>
// kernel: tpu_custom_call.1
= control target key start
LH: loop header
LB: loop body
LE: loop exit
PB: predicated region body
PF: predicated region fallthrough
CT: control target
= control target key end

     0   :  { %s10686_s0 = inlined_call_operand.hbm [shape: f32[128,1024], index: 0, kind: input, shape index: {}]   ;;  %s10687_s1 = inlined_call_operand.hbm [shape: bf16[1024,512], index: 1, kind: input, shape index: {}]   ;;  %s10688_s2 = inlined_call_operand.hbm [shape: f32[1,512], index: 2, kind: input, shape index: {}]   ;;  %s10689_s3 = inlined_call_operand.hbm [shape: f32[1,512], index: 3, kind: input, shape index: {}]   ;;  %s10690_s4 = inlined_call_operand.hbm [shape: bf16[3,3,128,128], index: 4, kind: input, shape index: {}]   ;;  %s10691_s5 = inlined_call_operand.hbm [shape: f32[3,1,128], index: 5, kind: input, shape index: {}]   ;;  %s10692_s6 = inlined_call_operand.hbm [shape: f32[3,1,128], index: 6, kind: input, shape index: {}]   ;;  %s10693_s7 = inlined_call_operand.hbm [shape: bf16[512,1024], index: 7, kind: input, shape index: {}]   ;;  %s10694_s8 = inlined_call_operand.vmem [shape: f32[1,1024], index: 8, kind: input, shape index: {}]   ;;  %s10695_s9 = inlined_call_operand.vmem [shape: f32[1,1024], index: 9, kind: input, shape index: {}]   ;;  %s10696_s10 = inlined_call_operand.hbm [shape: f32[128,1024], index: 10, kind: output, shape index: {}]  }
   0x1   :  { %10703 = sst [smem:[#allocation25_spill]] %s10687_s1 }
   0x2   :  { %10704 = sst [smem:[#allocation26_spill]] %s10688_s2 }
   0x3   :  { %10705 = sst [smem:[#allocation27_spill]] %s10689_s3 }
   0x4   :  { %10706 = sst [smem:[#allocation28_spill]] %s10690_s4 }
   0x5   :  { %15 = vsyncpa [#allocation5], 0 }
   0x6   :  { %17 = vsyncpa [#allocation5 + $0x1], 0 }
   0x7   :  { %18 = vsyncpa [#allocation8], 0 }
   0x8   :  { %19 = vsyncpa [#allocation11], 0 }
   0x9   :  { %20 = vsyncpa [#allocation14], 0 }
   0xa   :  { %21 = vsyncpa [#allocation17], 0 }
   0xb   :  { %22 = vsyncpa [#allocation6], 0 }
   0xc   :  { %24 = vsyncpa [#allocation6 + $0x1], 0  ;;  %s9298_s13 = smov 0   ;;  %s9300_s14 = smov 0  }
   0xd   :  { %s9302_s15 = smov 0   ;;  %s9304_s16 = smov 0  }
   0xe LB: > { %s9223_s17 = smov [#allocation7]   ;;  %s9319_s19 = sadd.s32 4294967295, %s9221_s16   ;;  %s9221_s16 = sphi %s9304_s16, %s10756_s16   ;;  %s9217_s15 = sphi %s9302_s15, %s10755_s15   ;;  %s9213_s14 = sphi %s9300_s14, %s10754_s14   ;;  %s9209_s13 = sphi %s9298_s13, %s10753_s13  }
   0xf   : > { %s288_s18 = sshll.u32 %s9223_s17, 4  ;;  %p7328_p0 = scmp.ge.s32.totalorder %s9221_s16, 1  ;;  %s289_s18 = int_to_ptr.vmem [resolvable:$true] %s288_s18 }
  0x10   : > { %p10697_p1 = scmp.eq.s32.totalorder %s9319_s19, 0  ;;  %p276_p2 = scmp.lt.s32.totalorder %s9221_s16, 3 }
  0x11   : > { %s9224_s21 = smov [#allocation10]   ;;  %s9225_s24 = smov [#allocation13]  }
  0x12   : > { %p9324_p3 = pnand %p7328_p0, %p276_p2  ;;  %s313_s22 = sshll.u32 %s9224_s21, 4  ;;  %s314_s22 = int_to_ptr.vmem [resolvable:$true] %s313_s22 }
  0x13   : > { %s336_s25 = sshll.u32 %s9225_s24, 4  ;;  %s8942_s27 = scalar_lea.vmem %s289_s18, 32768  ;;  %s9337_s25 = int_to_ptr.vmem [resolvable:$true] %s336_s25 }
  0x14   : > { %s10707_s20 = scalar_select %p9324_p3, 1, 0 }
  0x15   : > { %p8379_p5 = pneg %p9324_p3  ;;  %p8943_p8 = scmp.ne.s32.totalorder %s289_s18, %s8942_s27 }
  0x16   : > { %p8950_p11 = scmp.lt.s32.totalorder %s289_s18, %s289_s18  ;;  %p8951_p12 = scmp.lt.s32.totalorder %s8942_s27, %s8942_s27 }
  0x17   : > { %p9333_p6 = pnand %p8379_p5, %p10697_p1 }
  0x18   : > { %p8952_p13 = por %p8951_p12, %p8950_p11 }
  0x19   : > { %p9341_p7 = pneg %p9333_p6 }
  0x1b   : > { %p8945_p9 = pnand %p8943_p8, %p9341_p7 }
  0x1d   : > { %p8946_p10 = pneg %p8945_p9 }
  0x1f   : > { %p8953_p0 = pnand %p8952_p13, %p8946_p10 }
  0x21   : > { %8956 = shalt.err (!%p8953_p0)
}
  0x22   : > { %s9226_s28 = smov 256   ;;  %s10699_s29 = smov 16  }
  0x23   : > { %s10710_s1 = sld [smem:[#allocation25_spill]]  ;;  %s8968_s12 = scalar_lea.vmem %s314_s22, 64 }
  0x24   : > { %p8969_p2 = scmp.ne.s32.totalorder %s314_s22, %s8968_s12  ;;  %p8976_p9 = scmp.lt.s32.totalorder %s314_s22, %s314_s22 }
  0x25   : > { %p8977_p4 = scmp.lt.s32.totalorder %s8968_s12, %s8968_s12 }
  0x26   : > { %p8971_p5 = pnand %p8969_p2, %p9341_p7 }
  0x27   : > { %p8978_p11 = por %p8977_p4, %p8976_p9 }
  0x28   : > { %p8972_p8 = pneg %p8971_p5 }
  0x29   : > { %8382 = dma.hbm_to_vmem [thread:$0]  (!%p9333_p6), %s10710_s1, 32768, %s289_s18, [#allocation8], %s9226_s28, %s9226_s28, %s10699_s29  }
  0x2a   : > { %p8979_p10 = pnand %p8978_p11, %p8972_p8 }
  0x2c   : > { %8982 = shalt.err (!%p8979_p10)
}
  0x2d   : > { %s10711_s3 = sld [smem:[#allocation27_spill]]  ;;  %s8994_s18 = scalar_lea.vmem %s9337_s25, 48 }
  0x2e   : > { %p8995_p12 = scmp.ne.s32.totalorder %s9337_s25, %s8994_s18  ;;  %s9001_s24 = scalar_lea.vmem %s9337_s25, 64 }
  0x2f   : > { %p9002_p4 = scmp.lt.s32.totalorder %s9337_s25, %s9337_s25  ;;  %p9003_p2 = scmp.lt.s32.totalorder %s9001_s24, %s8994_s18 }
  0x30   : > { %p8997_p13 = pnand %p8995_p12, %p9341_p7 }
  0x31   : > { %p9004_p5 = por %p9003_p2, %p9002_p4 }
  0x32   : > { %p8998_p0 = pneg %p8997_p13 }
  0x33   : > { %8388 = dma.hbm_to_vmem [thread:$0]  (!%p9333_p6), %s10711_s3, 64, %s314_s22, [#allocation11]  }
  0x34   : > { %p9005_p8 = pnand %p9004_p5, %p8998_p0 }
  0x36   : > { %9008 = shalt.err (!%p9005_p8)
}
  0x37   : > { %s9228_s27 = smov 1   ;;  %s9229_s30 = smov [#allocation9]  }
  0x38   : > { %8394 = dma.hbm_to_vmem [thread:$0]  (!%p9333_p6), %s10691_s5, 48, %s9337_s25, [#allocation14], %s10699_s29, %s10699_s29, %s9228_s27  }
  0x39   : > { %s302_s11 = sshll.u32 %s9229_s30, 4  ;;  %s9230_s12 = smov [#allocation12]   ;;  %s303_s11 = int_to_ptr.vmem [resolvable:$true] %s302_s11 }
  0x3a   : > { %s323_s17 = sshll.u32 %s9230_s12, 4  ;;  %s9020_s21 = scalar_lea.vmem %s303_s11, 64  ;;  %s324_s17 = int_to_ptr.vmem [resolvable:$true] %s323_s17 }
  0x3b   : > { %p9021_p9 = scmp.ne.s32.totalorder %s303_s11, %s9020_s21  ;;  %p9028_p12 = scmp.lt.s32.totalorder %s303_s11, %s303_s11 }
  0x3c   : > { %p9029_p13 = scmp.lt.s32.totalorder %s9020_s21, %s9020_s21 }
  0x3d   : > { %p9023_p11 = pnand %p9021_p9, %p9341_p7 }
  0x3e   : > { %p9030_p0 = por %p9029_p13, %p9028_p12 }
  0x3f   : > { %p9024_p10 = pneg %p9023_p11 }
  0x41   : > { %p9031_p4 = pnand %p9030_p0, %p9024_p10 }
  0x43   : > { %9034 = shalt.err (!%p9031_p4)
}
  0x44   : > { %s10712_s2 = sld [smem:[#allocation26_spill]]  ;;  %s9046_s24 = scalar_lea.vmem %s324_s17, 9216 }
  0x45   : > { %p9047_p2 = scmp.ne.s32.totalorder %s324_s17, %s9046_s24  ;;  %p9054_p1 = scmp.lt.s32.totalorder %s324_s17, %s324_s17 }
  0x46   : > { %p9055_p9 = scmp.lt.s32.totalorder %s9046_s24, %s9046_s24 }
  0x47   : > { %p9049_p5 = pnand %p9047_p2, %p9341_p7 }
  0x48   : > { %p9056_p11 = por %p9055_p9, %p9054_p1 }
  0x49   : > { %p9050_p8 = pneg %p9049_p5 }
  0x4a   : > { %8385 = dma.hbm_to_vmem [thread:$0]  (!%p9333_p6), %s10712_s2, 64, %s303_s11, [#allocation8]  }
  0x4b   : > { %p9057_p3 = pnand %p9056_p11, %p9050_p8 }
  0x4d   : > { %9060 = shalt.err (!%p9057_p3)
}
  0x4e   : > { %s10700_s22 = smov 64   ;;  %s9232_s28 = smov 4  }
  0x4f   : > { %s10713_s4 = sld [smem:[#allocation28_spill]]  ;;  %s9233_s11 = smov [#allocation15]  }
  0x50   : > { %s349_s21 = sshll.u32 %s9233_s11, 4  ;;  %s9234_s18 = smov [#allocation16]   ;;  %s350_s21 = int_to_ptr.vmem [resolvable:$true] %s349_s21 }
  0x51   : > { %s362_s25 = sshll.u32 %s9234_s18, 4  ;;  %s9072_s24 = scalar_lea.vmem %s350_s21, 48  ;;  %s363_s25 = int_to_ptr.vmem [resolvable:$true] %s362_s25 }
  0x52   : > { %p9073_p1 = scmp.ne.s32.totalorder %s350_s21, %s9072_s24  ;;  %s9079_s29 = scalar_lea.vmem %s350_s21, 64 }
  0x53   : > { %p9080_p12 = scmp.lt.s32.totalorder %s350_s21, %s350_s21  ;;  %p9081_p13 = scmp.lt.s32.totalorder %s9079_s29, %s9072_s24 }
  0x54   : > { %p9075_p3 = pnand %p9073_p1, %p9341_p7 }
  0x55   : > { %8391 = dma.hbm_to_vmem [thread:$0]  (!%p9333_p6), %s10713_s4, 9216, %s324_s17, [#allocation11], %s10700_s22, %s10700_s22, %s9232_s28  }
  0x56   : > { %p9076_p10 = pneg %p9075_p3  ;;  %p9082_p0 = por %p9081_p13, %p9080_p12 }
  0x58   : > { %p9083_p4 = pnand %p9082_p0, %p9076_p10 }
  0x5a   : > { %9086 = shalt.err (!%p9083_p4)
}
  0x5b   : > { %s10714_s17 = smov 16   ;;  %s9098_s12 = scalar_lea.vmem %s363_s25, 32768 }
  0x5c   : > { %8397 = dma.hbm_to_vmem [thread:$0]  (!%p9333_p6), %s10692_s6, 48, %s350_s21, [#allocation14], %s10714_s17, %s10714_s17, %s9228_s27  }
  0x5d   : > { %p9099_p2 = scmp.ne.s32.totalorder %s363_s25, %s9098_s12  ;;  %p9106_p9 = scmp.lt.s32.totalorder %s363_s25, %s363_s25 }
  0x5e   : > { %p9107_p11 = scmp.lt.s32.totalorder %s9098_s12, %s9098_s12 }
  0x5f   : > { %p9101_p5 = pnand %p9099_p2, %p9341_p7 }
  0x60   : > { %p9108_p1 = por %p9107_p11, %p9106_p9 }
  0x61   : > { %p9102_p8 = pneg %p9101_p5 }
  0x63   : > { %p9109_p3 = pnand %p9108_p1, %p9102_p8 }
  0x65   : > { %9112 = shalt.err (!%p9109_p3)
}
  0x66   : > { %s9235_s29 = smov 512   ;;  %s9236_s26 = smov 32  }
  0x67   : > { %8400 = dma.hbm_to_vmem [thread:$0]  (!%p9333_p6), %s10693_s7, 32768, %s363_s25, [#allocation17], %s9235_s29, %s9235_s29, %s9236_s26  }
  0x68   : > { %s7327_s21 = sadd.s32 4294967294, %s9221_s16   ;;  %s9411_s18 = sadd.s32 1, %s9221_s16  }
  0x69   : > { %s34_s24 = ssub.s32 %s9221_s16, %s9411_s18  ;;  %s37_s17 = sadd.s32 1, %s9217_s15 }
  0x6a   : > { %p35_p7 = scmp.eq.s32.totalorder %s34_s24, 0  ;;  %p44_p10 = scmp.ne.s32.totalorder %s9217_s15, %s9213_s14 }
  0x6b   : > { %p45_p12 = scmp.eq.s32.totalorder %s9221_s16, 0  ;;  %p50_p13 = scmp.ne.s32.totalorder %s9213_s14, %s9209_s13 }
  0x6c   : > { %s9422_s28 = scalar_select %p35_p7, %s9217_s15, %s37_s17  }
  0x6d   : > { %p9424_p0 = por %p45_p12, %p44_p10  ;;  %p10716_p4 = scmp.eq.s32.totalorder %s9319_s19, 0 }
  0x6e   : > { %p263_p2 = scmp.eq.s32.totalorder %s9319_s19, 1  ;;  %p269_p5 = scmp.eq.s32.totalorder %s7327_s21, 1 }
  0x6f   : > { %p9430_p6 = por %p10716_p4, %p50_p13  ;;  %p8416_p8 = scmp.lt.s32.totalorder %s9221_s16, 2 }
  0x70   : > { %s382_s30 = sand.u32 1, %s9217_s15   ;;  %p9437_p9 = por %p263_p2, %p44_p10 }
  0x71   : > { %s10717_s25 = scalar_select %p9430_p6, 1, 0 }
  0x72   : > { %s10718_s12 = scalar_select %p9437_p9, 1, 0 }
  0x73   : > { %p9441_p11 = por %p269_p5, %p50_p13  ;;  %s7337_s26 = sshll.u32 %s382_s30, 9 }
  0x74   : > { %s8020_s27 = sshll.u32 %s9221_s16, 13  ;;  %s386_s21 = scalar_lea.vmem [#allocation4], %s7337_s26 }
  0x75   : > { %s10719_s29 = scalar_select %p9441_p11, 1, 0 }
  0x76   : > { %s9449_s17 = scalar_lea.hbm %s10686_s0, %s8020_s27  ;;  %s394_s22 = sshll.u32 %s386_s21, 4  ;;  %s9451_s22 = int_to_ptr.vmem [resolvable:$true] %s394_s22 }
  0x77   : > { %p9455_p1 = pnand %p8416_p8, %p9424_p0  ;;  %s9459_s2 = scalar_lea.sflag [#allocation5], %s382_s30 }
  0x78   : > { %s9113_s3 = scalar_lea.hbm %s9449_s17, 8192  ;;  %s9118_s26 = scalar_lea.hbm %s10686_s0, 16384 }
  0x79   : > { %p9114_p3 = scmp.ne.s32.totalorder %s9449_s17, %s9113_s3  ;;  %p9115_p7 = pneg %p9455_p1 }
  0x7a   : > { %p9119_p13 = scmp.lt.s32.totalorder %s9449_s17, %s10686_s0  ;;  %p9120_p0 = scmp.lt.s32.totalorder %s9118_s26, %s9113_s3 }
  0x7b   : > { %p9116_p10 = pnand %p9115_p7, %p9114_p3 }
  0x7c   : > { %p9121_p4 = por %p9120_p0, %p9119_p13 }
  0x7d   : > { %p9117_p12 = pneg %p9116_p10 }
  0x7f   : > { %p9122_p2 = pnand %p9121_p4, %p9117_p12 }
  0x81   : > { %9125 = shalt.err (!%p9122_p2)
}
  0x82   : > { %s9126_s23 = scalar_lea.vmem %s9451_s22, 8192  ;;  %s9237_s30 = smov [#allocation4]  }
  0x83   : > { %p9127_p5 = scmp.ne.s32.totalorder %s9451_s22, %s9126_s23  ;;  %s9131_s4 = sshll.u32 %s9237_s30, 4  ;;  %s9132_s4 = int_to_ptr.vmem [resolvable:$false] %s9131_s4 }
  0x84   : > { %s9133_s27 = scalar_lea.vmem %s9132_s4, 16384  ;;  %p9134_p10 = scmp.lt.s32.totalorder %s9451_s22, %s9132_s4 }
  0x85   : > { %p9129_p8 = pnand %p9127_p5, %p9115_p7  ;;  %p9135_p11 = scmp.lt.s32.totalorder %s9133_s27, %s9126_s23 }
  0x87   : > { %p9130_p3 = pneg %p9129_p8  ;;  %p9136_p9 = por %p9135_p11, %p9134_p10 }
  0x89   : > { %p9137_p6 = pnand %p9136_p9, %p9130_p3 }
  0x8b   : > { %9140 = shalt.err (!%p9137_p6)
}
  0x8c   : > { %s9238_s3 = smov 1024   ;;  %s10721_s11 = smov 64  }
  0x8d   : > { %8404 = dma.hbm_to_vmem [thread:$0]  (!%p9455_p1), %s9449_s17, 8192, %s9451_s22, %s9459_s2, %s9238_s3, %s9238_s3, %s10721_s11  }
  0x8e   : > { %p10722_p7 = scmp.ne.s32.totalorder %s10707_s20, 0 }
  0x8f   : > { %s9484_s26 = sand.u32 (!%p10722_p7), 1, %s9213_s14   ;;  %p10723_p6 = scmp.ne.s32.totalorder (!%p10722_p7), %s10717_s25, 0 }
  0x90   : > { %406 = sbr.rel (%p10722_p7) target bundleno = 1703 (0x6a7), region = 60  ;;  %s7342_s4 = sshll.u32 (!%p10722_p7), %s9484_s26, 9 }
  0x91   : > { %s409_s24 = scalar_lea.sflag (!%p10722_p7), [#allocation5], %s9484_s26  ;;  %s9490_s21 = scalar_lea.vmem (!%p10722_p7), [#allocation4], %s7342_s4 }
  0x95   : > { %9184 = dma.done.wait (%p10723_p6), %s409_s24, 8192  }
  0x96   : > { %9186 = vsyncadd (%p10723_p6), %s409_s24, 4294959104  ;;  %p10724_p9 = scmp.eq.s32.totalorder %s9319_s19, 0 }
  0x98   : > { %9188 = dma.done.wait (%p10724_p9), [#allocation8], 32832   ;;  %p10725_p11 = pmov %p10724_p9 }
  0x99   : > { %p10726_p1 = pmov %p10724_p9 }
  0x9a   : > { %9190 = vsyncadd (%p10725_p11), [#allocation8], 4294934464 }
  0x9b   : > { %9192 = dma.done.wait (%p10726_p1), [#allocation11], 9280   ;;  %p10727_p12 = pmov %p10726_p1 }
  0x9c   : > { %p10728_p13 = pmov %p10726_p1 }
  0x9d   : > { %9194 = vsyncadd (%p10727_p12), [#allocation11], 4294958016 }
  0x9e   : > { %9196 = dma.done.wait (%p10728_p13), [#allocation14], 96   ;;  %p10729_p0 = pmov %p10726_p1 }
  0xa0   : > { %9198 = vsyncadd (%p10729_p0), [#allocation14], 4294967200  ;;  %p10730_p4 = pmov %p10729_p0 }
  0xa1   : > { %p10731_p2 = pmov %p10729_p0 }
  0xa2   : > { %9200 = dma.done.wait (%p10730_p4), [#allocation17], 32768  }
  0xa3   : > { %9202 = vsyncadd (%p10731_p2), [#allocation17], 4294934528  ;;  %v8475_v0 = vld [vmem:[#allocation7 + $0xe4] ss:$16 sps:$4 sm:$0xff]   ;;  %v8479_v2 = vld [vmem:[#allocation7 + $0xe0] ss:$16 sps:$4 sm:$0xff]  }
  0xa4   : > { %v8477_v1 = vld [vmem:[#allocation7 + $0x2e4] ss:$16 sps:$4 sm:$0xff]   ;;  %1465 = vmatprep.subr.bf16.mxu0 %v8475_v0  ;;  %v8480_v3 = vld [vmem:[#allocation7 + $0x2e0] ss:$16 sps:$4 sm:$0xff]   ;;  %v602_v46 = vld [vmem:[%s9490_s21 + $0x8] sm:$0xff]  ;;  %vm9239_vm1 = vmmov 1  }
  0xa5   : > { %1538 = vmatprep.subr.bf16.mxu1 %v8477_v1  ;;  %v8481_v4 = vld [vmem:[#allocation7 + $0xc4] ss:$16 sps:$4 sm:$0xff]   ;;  %1466 = vmatpush1.bf16.msra.mxu0 %v8479_v2  ;;  %v8485_v6 = vld [vmem:[#allocation7 + $0xc0] ss:$16 sps:$4 sm:$0xff]   ;;  %v610_v47 = vld [vmem:[%s9490_s21 + $0x48] sm:$0xff]  ;;  %s10332_s25 = scalar_lea.vmem [#allocation18], %s7342_s4 }
  0xa6   : > { %1539 = vmatpush1.bf16.msra.mxu1 %v8480_v3  ;;  %v8483_v5 = vld [vmem:[#allocation7 + $0x2c4] ss:$16 sps:$4 sm:$0xff]   ;;  %1467 = vmatprep.subr.bf16.mxu0 %v8481_v4  ;;  %v8486_v7 = vld [vmem:[#allocation7 + $0x2c0] ss:$16 sps:$4 sm:$0xff]   ;;  %v604_v48 = vld [vmem:[%s9490_s21 + $0x18] sm:$0xff]  ;;  %v9516_v53 = vpack.c.bf16 %v610_v47, %v602_v46  ;;  %s8022_s17 = sshll.u32 %s9319_s19, 13 }
  0xa7   : > { %1540 = vmatprep.subr.bf16.mxu1 %v8483_v5  ;;  %v8487_v8 = vld [vmem:[#allocation7 + $0xa4] ss:$16 sps:$4 sm:$0xff]   ;;  %v8491_v10 = vld [vmem:[#allocation7 + $0xa0] ss:$16 sps:$4 sm:$0xff]   ;;  %v612_v49 = vld [vmem:[%s9490_s21 + $0x58] sm:$0xff]  ;;  %s7187_s23 = sshll.u32 %s10332_s25, 4  ;;  %s10639_s3 = scalar_lea.hbm %s10696_s10, %s8022_s17  ;;  %s10641_s23 = int_to_ptr.vmem [resolvable:$true] %s7187_s23 }
  0xa8   : > { %v8489_v9 = vld [vmem:[#allocation7 + $0x2a4] ss:$16 sps:$4 sm:$0xff]   ;;  %v8492_v11 = vld [vmem:[#allocation7 + $0x2a0] ss:$16 sps:$4 sm:$0xff]   ;;  %v9518_v54 = vpack.c.bf16 %v612_v49, %v604_v48  ;;  %1497 = vmatprep.mubr.bf16.mxu0 %v9516_v53  ;;  %v636_v47 = vld [vmem:[%s9490_s21 + $0x118] sm:$0xff]  ;;  %s9141_s19 = scalar_lea.vmem %s10641_s23, 8192 }
  0xa9   : > { %1468 = vmatpush1.bf16.msra.mxu0 %v8485_v6  ;;  %v8493_v12 = vld [vmem:[#allocation7 + $0x84] ss:$16 sps:$4 sm:$0xff]   ;;  %v8497_v14 = vld [vmem:[#allocation7 + $0x80] ss:$16 sps:$4 sm:$0xff]   ;;  %v644_v48 = vld [vmem:[%s9490_s21 + $0x158] sm:$0xff]  ;;  %p9142_p5 = scmp.ne.s32.totalorder %s10641_s23, %s9141_s19  ;;  %p10750_p8 = scmp.ne.s32.totalorder %s10718_s12, 0 }
  0xaa   : > { %1541 = vmatpush1.bf16.msra.mxu1 %v8486_v7  ;;  %1469 = vmatprep.subr.bf16.mxu0 %v8487_v8  ;;  %v8495_v13 = vld [vmem:[#allocation7 + $0x284] ss:$16 sps:$4 sm:$0xff]   ;;  %v8498_v15 = vld [vmem:[#allocation7 + $0x280] ss:$16 sps:$4 sm:$0xff]   ;;  %s9240_s11 = smov [#allocation18]  }
  0xab   : > { %1542 = vmatprep.subr.bf16.mxu1 %v8489_v9  ;;  %v8499_v16 = vld [vmem:[#allocation7 + $0x64] ss:$16 sps:$4 sm:$0xff]   ;;  %v8503_v18 = vld [vmem:[#allocation7 + $0x60] ss:$16 sps:$4 sm:$0xff]   ;;  %1570 = vmatprep.mubr.bf16.mxu1 %v9518_v54  ;;  %p9143_p3 = pnand %p9142_p5, %p10750_p8  ;;  %s9145_s4 = sshll.u32 %s9240_s11, 4  ;;  %s9146_s4 = int_to_ptr.vmem [resolvable:$false] %s9145_s4 }
  0xac   : > { %v8501_v17 = vld [vmem:[#allocation7 + $0x264] ss:$16 sps:$4 sm:$0xff]   ;;  %v8504_v19 = vld [vmem:[#allocation7 + $0x260] ss:$16 sps:$4 sm:$0xff]   ;;  %s9147_s24 = scalar_lea.vmem %s9146_s4, 16384  ;;  %p9148_p7 = scmp.lt.s32.totalorder %s10641_s23, %s9146_s4 }
  0xad   : > { %1470 = vmatpush1.bf16.msra.mxu0 %v8491_v10  ;;  %v8505_v20 = vld [vmem:[#allocation7 + $0x44] ss:$16 sps:$4 sm:$0xff]   ;;  %v8509_v22 = vld [vmem:[#allocation7 + $0x40] ss:$16 sps:$4 sm:$0xff]   ;;  %p9144_p10 = pneg %p9143_p3  ;;  %p9149_p6 = scmp.lt.s32.totalorder %s9147_s24, %s9141_s19 }
  0xae   : > { %1543 = vmatpush1.bf16.msra.mxu1 %v8492_v11  ;;  %1471 = vmatprep.subr.bf16.mxu0 %v8493_v12  ;;  %v8507_v21 = vld [vmem:[#allocation7 + $0x244] ss:$16 sps:$4 sm:$0xff]   ;;  %v8510_v23 = vld [vmem:[#allocation7 + $0x240] ss:$16 sps:$4 sm:$0xff]  }
  0xaf   : > { %1544 = vmatprep.subr.bf16.mxu1 %v8495_v13  ;;  %v8511_v24 = vld [vmem:[#allocation7 + $0x24] ss:$16 sps:$4 sm:$0xff]   ;;  %v8515_v26 = vld [vmem:[#allocation7 + $0x20] ss:$16 sps:$4 sm:$0xff]   ;;  %p9150_p9 = por %p9149_p6, %p9148_p7 }
  0xb0   : > { %v8513_v25 = vld [vmem:[#allocation7 + $0x224] ss:$16 sps:$4 sm:$0xff]   ;;  %v8516_v27 = vld [vmem:[#allocation7 + $0x220] ss:$16 sps:$4 sm:$0xff]  }
  0xb1   : > { %1472 = vmatpush1.bf16.msra.mxu0 %v8497_v14  ;;  %v8517_v28 = vld [vmem:[#allocation7 + $0x4] ss:$16 sps:$4 sm:$0xff]   ;;  %v8521_v30 = vld [vmem:[#allocation7] ss:$16 sps:$4 sm:$0xff]   ;;  %p9151_p11 = pnand %p9150_p9, %p9144_p10 }
  0xb2   : > { %1545 = vmatpush1.bf16.msra.mxu1 %v8498_v15  ;;  %1473 = vmatprep.subr.bf16.mxu0 %v8499_v16  ;;  %v8519_v29 = vld [vmem:[#allocation7 + $0x204] ss:$16 sps:$4 sm:$0xff]   ;;  %v8522_v31 = vld [vmem:[#allocation7 + $0x200] ss:$16 sps:$4 sm:$0xff]  }
  0xb3   : > { %1546 = vmatprep.subr.bf16.mxu1 %v8501_v17  ;;  %v8523_v32 = vld [vmem:[#allocation7 + $0x1e4] ss:$16 sps:$4 sm:$0xff]   ;;  %v8527_v34 = vld [vmem:[#allocation7 + $0x1e0] ss:$16 sps:$4 sm:$0xff]  }
  0xb4   : > { %v8525_v33 = vld [vmem:[#allocation7 + $0x3e4] ss:$16 sps:$4 sm:$0xff]   ;;  %v8528_v35 = vld [vmem:[#allocation7 + $0x3e0] ss:$16 sps:$4 sm:$0xff]  }
  0xb5   : > { %1474 = vmatpush1.bf16.msra.mxu0 %v8503_v18  ;;  %v8529_v36 = vld [vmem:[#allocation7 + $0x1c4] ss:$16 sps:$4 sm:$0xff]   ;;  %v8533_v38 = vld [vmem:[#allocation7 + $0x1c0] ss:$16 sps:$4 sm:$0xff]  }
  0xb6   : > { %1547 = vmatpush1.bf16.msra.mxu1 %v8504_v19  ;;  %1475 = vmatprep.subr.bf16.mxu0 %v8505_v20  ;;  %v8531_v37 = vld [vmem:[#allocation7 + $0x3c4] ss:$16 sps:$4 sm:$0xff]   ;;  %v8534_v39 = vld [vmem:[#allocation7 + $0x3c0] ss:$16 sps:$4 sm:$0xff]  }
  0xb7   : > { %1548 = vmatprep.subr.bf16.mxu1 %v8507_v21  ;;  %v8535_v40 = vld [vmem:[#allocation7 + $0x1a4] ss:$16 sps:$4 sm:$0xff]   ;;  %v8539_v42 = vld [vmem:[#allocation7 + $0x1a0] ss:$16 sps:$4 sm:$0xff]  }
  0xb8   : > { %v8537_v41 = vld [vmem:[#allocation7 + $0x3a4] ss:$16 sps:$4 sm:$0xff]   ;;  %v8540_v43 = vld [vmem:[#allocation7 + $0x3a0] ss:$16 sps:$4 sm:$0xff]  }
  0xb9   : > { %1476 = vmatpush1.bf16.msra.mxu0 %v8509_v22  ;;  %v8541_v44 = vld [vmem:[#allocation7 + $0x184] ss:$16 sps:$4 sm:$0xff]   ;;  %v8545_v50 = vld [vmem:[#allocation7 + $0x180] ss:$16 sps:$4 sm:$0xff]   ;;  %v618_v22 = vld [vmem:[%s9490_s21 + $0x88] sm:$0xff] }
  0xba   : > { %1549 = vmatpush1.bf16.msra.mxu1 %v8510_v23  ;;  %1477 = vmatprep.subr.bf16.mxu0 %v8511_v24  ;;  %v8543_v45 = vld [vmem:[#allocation7 + $0x384] ss:$16 sps:$4 sm:$0xff]   ;;  %v8546_v51 = vld [vmem:[#allocation7 + $0x380] ss:$16 sps:$4 sm:$0xff]   ;;  %v626_v23 = vld [vmem:[%s9490_s21 + $0xc8] sm:$0xff] }
  0xbb   : > { %1550 = vmatprep.subr.bf16.mxu1 %v8513_v25  ;;  %v8547_v52 = vld [vmem:[#allocation7 + $0x164] ss:$16 sps:$4 sm:$0xff]   ;;  %v8551_v56 = vld [vmem:[#allocation7 + $0x160] ss:$16 sps:$4 sm:$0xff]  }
  0xbc   : > { %v8549_v55 = vld [vmem:[#allocation7 + $0x364] ss:$16 sps:$4 sm:$0xff]   ;;  %v8552_v57 = vld [vmem:[#allocation7 + $0x360] ss:$16 sps:$4 sm:$0xff]  }
  0xbd   : > { %1478 = vmatpush1.bf16.msra.mxu0 %v8515_v26  ;;  %v8553_v58 = vld [vmem:[#allocation7 + $0x144] ss:$16 sps:$4 sm:$0xff]   ;;  %v8557_v60 = vld [vmem:[#allocation7 + $0x140] ss:$16 sps:$4 sm:$0xff]   ;;  %v9534_v26 = vpack.c.bf16 %v626_v23, %v618_v22 }
  0xbe   : > { %1551 = vmatpush1.bf16.msra.mxu1 %v8516_v27  ;;  %1479 = vmatprep.subr.bf16.mxu0 %v8517_v28  ;;  %v8555_v59 = vld [vmem:[#allocation7 + $0x344] ss:$16 sps:$4 sm:$0xff]   ;;  %v8558_v61 = vld [vmem:[#allocation7 + $0x340] ss:$16 sps:$4 sm:$0xff]   ;;  %v620_v27 = vld [vmem:[%s9490_s21 + $0x98] sm:$0xff] }
  0xbf   : > { %1552 = vmatprep.subr.bf16.mxu1 %v8519_v29  ;;  %v8559_v62 = vld [vmem:[#allocation7 + $0x124] ss:$16 sps:$4 sm:$0xff]   ;;  %v8563_v0 = vld [vmem:[#allocation7 + $0x120] ss:$16 sps:$4 sm:$0xff]   ;;  %v628_v28 = vld [vmem:[%s9490_s21 + $0xd8] sm:$0xff] }
  0xc0   : > { %v8561_v63 = vld [vmem:[#allocation7 + $0x324] ss:$16 sps:$4 sm:$0xff]   ;;  %v8564_v1 = vld [vmem:[#allocation7 + $0x320] ss:$16 sps:$4 sm:$0xff]  }
  0xc1   : > { %1480 = vmatpush1.bf16.msra.mxu0 %v8521_v30  ;;  %v8565_v2 = vld [vmem:[#allocation7 + $0x104] ss:$16 sps:$4 sm:$0xff]   ;;  %v8569_v4 = vld [vmem:[#allocation7 + $0x100] ss:$16 sps:$4 sm:$0xff]   ;;  %v9539_v30 = vpack.c.bf16 %v628_v28, %v620_v27  ;;  %v608_v27 = vld [vmem:[%s9490_s21 + $0x38] sm:$0xff] }
  0xc2   : > { %1553 = vmatpush1.bf16.msra.mxu1 %v8522_v31  ;;  %1481 = vmatprep.subr.bf16.mxu0 %v8523_v32  ;;  %v8567_v3 = vld [vmem:[#allocation7 + $0x304] ss:$16 sps:$4 sm:$0xff]   ;;  %v8570_v5 = vld [vmem:[#allocation7 + $0x300] ss:$16 sps:$4 sm:$0xff]  }
  0xc3   : > { %1554 = vmatprep.subr.bf16.mxu1 %v8525_v33  ;;  %v601_v6 = vld [vmem:[%s9490_s21] sm:$0xff]  ;;  %v603_v8 = vld [vmem:[%s9490_s21 + $0x10] sm:$0xff] }
  0xc4   : > { %v609_v7 = vld [vmem:[%s9490_s21 + $0x40] sm:$0xff]  ;;  %v611_v9 = vld [vmem:[%s9490_s21 + $0x50] sm:$0xff] }
  0xc5   : > { %1482 = vmatpush2.bf16.msra.mxu0 %v8527_v34  ;;  %v8573_v10 = vld [vmem:[#allocation7 + $0x4e4] ss:$16 sps:$4 sm:$0xff]   ;;  %v9526_v12 = vpack.c.bf16 %v609_v7, %v601_v6  ;;  %v9528_v13 = vpack.c.bf16 %v611_v9, %v603_v8  ;;  %v8571_v14 = vld [vmem:[#allocation7 + $0x4e0] ss:$16 sps:$4 sm:$0xff]   ;;  %v660_v6 = vld [vmem:[%s9490_s21 + $0x1d8] sm:$0xff] }
  0xc6   : > { %1555 = vmatpush2.bf16.msra.mxu1 %v8528_v35  ;;  %1483 = vmatprep.subr.bf16.mxu0 %v8529_v36  ;;  %v8576_v11 = vld [vmem:[#allocation7 + $0x6e4] ss:$16 sps:$4 sm:$0xff]   ;;  %v8574_v15 = vld [vmem:[#allocation7 + $0x6e0] ss:$16 sps:$4 sm:$0xff]  }
  0xc7   : > { %1556 = vmatprep.subr.bf16.mxu1 %v8531_v37  ;;  %v8579_v16 = vld [vmem:[#allocation7 + $0x4c4] ss:$16 sps:$4 sm:$0xff]   ;;  %v8577_v18 = vld [vmem:[#allocation7 + $0x4c0] ss:$16 sps:$4 sm:$0xff]  }
  0xc8   : > { %v8582_v17 = vld [vmem:[#allocation7 + $0x6c4] ss:$16 sps:$4 sm:$0xff]   ;;  %v8580_v19 = vld [vmem:[#allocation7 + $0x6c0] ss:$16 sps:$4 sm:$0xff]  }
  0xc9   : > { %1484 = vmatpush2.bf16.msra.mxu0 %v8533_v38  ;;  %v8585_v20 = vld [vmem:[#allocation7 + $0x4a4] ss:$16 sps:$4 sm:$0xff]   ;;  %v8583_v24 = vld [vmem:[#allocation7 + $0x4a0] ss:$16 sps:$4 sm:$0xff]  }
  0xca   : > { %1557 = vmatpush2.bf16.msra.mxu1 %v8534_v39  ;;  %1485 = vmatprep.subr.bf16.mxu0 %v8535_v40  ;;  %v8588_v21 = vld [vmem:[#allocation7 + $0x6a4] ss:$16 sps:$4 sm:$0xff]   ;;  %v8586_v25 = vld [vmem:[#allocation7 + $0x6a0] ss:$16 sps:$4 sm:$0xff]  }
  0xcb   : > { %1558 = vmatprep.subr.bf16.mxu1 %v8537_v41  ;;  %v617_v29 = vld [vmem:[%s9490_s21 + $0x80] sm:$0xff]  ;;  %v619_v32 = vld [vmem:[%s9490_s21 + $0x90] sm:$0xff] }
  0xcc   : > { %v625_v31 = vld [vmem:[%s9490_s21 + $0xc0] sm:$0xff]  ;;  %v627_v33 = vld [vmem:[%s9490_s21 + $0xd0] sm:$0xff] }
  0xcd   : > { %1486 = vmatpush2.bf16.msra.mxu0 %v8539_v42  ;;  %v8591_v34 = vld [vmem:[#allocation7 + $0x484] ss:$16 sps:$4 sm:$0xff]   ;;  %v9544_v35 = vpack.c.bf16 %v625_v31, %v617_v29  ;;  %v9546_v36 = vpack.c.bf16 %v627_v33, %v619_v32  ;;  %v8589_v38 = vld [vmem:[#allocation7 + $0x480] ss:$16 sps:$4 sm:$0xff]   ;;  %v634_v42 = vld [vmem:[%s9490_s21 + $0x108] sm:$0xff] }
  0xce   : > { %1559 = vmatpush2.bf16.msra.mxu1 %v8540_v43  ;;  %1487 = vmatprep.subr.bf16.mxu0 %v8541_v44  ;;  %v8594_v37 = vld [vmem:[#allocation7 + $0x684] ss:$16 sps:$4 sm:$0xff]   ;;  %v8592_v39 = vld [vmem:[#allocation7 + $0x680] ss:$16 sps:$4 sm:$0xff]   ;;  %v642_v43 = vld [vmem:[%s9490_s21 + $0x148] sm:$0xff] }
  0xcf   : > { %1560 = vmatprep.subr.bf16.mxu1 %v8543_v45  ;;  %v8597_v40 = vld [vmem:[#allocation7 + $0x464] ss:$16 sps:$4 sm:$0xff]   ;;  %v8595_v44 = vld [vmem:[#allocation7 + $0x460] ss:$16 sps:$4 sm:$0xff]   ;;  %v9554_v46 = vpack.c.bf16 %v642_v43, %v634_v42  ;;  %v616_v32 = vld [vmem:[%s9490_s21 + $0x78] sm:$0xff] }
  0xd0   : > { %v8600_v41 = vld [vmem:[#allocation7 + $0x664] ss:$16 sps:$4 sm:$0xff]   ;;  %v8598_v45 = vld [vmem:[#allocation7 + $0x660] ss:$16 sps:$4 sm:$0xff]   ;;  %v9598_v33 = vpack.c.bf16 %v616_v32, %v608_v27  ;;  %v8673_v27 = vld [vmem:[#allocation7 + $0xc8] ss:$16 sps:$4 sm:$0xff]  }
  0xd1   : > { %1488 = vmatpush2.bf16.msra.mxu0 %v8545_v50  ;;  %v633_v49 = vld [vmem:[%s9490_s21 + $0x100] sm:$0xff]  ;;  %v9559_v50 = vpack.c.bf16 %v644_v48, %v636_v47 }
  0xd2   : > { %1561 = vmatpush2.bf16.msra.mxu1 %v8546_v51  ;;  %1489 = vmatprep.subr.bf16.mxu0 %v8547_v52  ;;  %v641_v51 = vld [vmem:[%s9490_s21 + $0x140] sm:$0xff]  ;;  %v635_v52 = vld [vmem:[%s9490_s21 + $0x110] sm:$0xff] }
  0xd3   : > { %1562 = vmatprep.subr.bf16.mxu1 %v8549_v55  ;;  %v643_v55 = vld [vmem:[%s9490_s21 + $0x150] sm:$0xff]  ;;  %v649_v7 = vld [vmem:[%s9490_s21 + $0x180] sm:$0xff] }
  0xd4   : > { %v657_v9 = vld [vmem:[%s9490_s21 + $0x1c0] sm:$0xff] }
  0xd5   : > { %1490 = vmatpush2.bf16.msra.mxu0 %v8551_v56  ;;  %v8603_v56 = vld [vmem:[#allocation7 + $0x444] ss:$16 sps:$4 sm:$0xff]   ;;  %v8619_v22 = vld [vmem:[#allocation7 + $0x5e0] ss:$16 sps:$4 sm:$0xff]  }
  0xd6   : > { %1563 = vmatpush2.bf16.msra.mxu1 %v8552_v57  ;;  %1491 = vmatprep.subr.bf16.mxu0 %v8553_v58  ;;  %v9564_v57 = vpack.c.bf16 %v641_v51, %v633_v49  ;;  %v9566_v58 = vpack.c.bf16 %v643_v55, %v635_v52  ;;  %v8622_v23 = vld [vmem:[#allocation7 + $0x7e0] ss:$16 sps:$4 sm:$0xff]   ;;  %v8627_v28 = vld [vmem:[#allocation7 + $0x5c4] ss:$16 sps:$4 sm:$0xff]  }
  0xd7   : > { %1564 = vmatprep.subr.bf16.mxu1 %v8555_v59  ;;  %v8606_v59 = vld [vmem:[#allocation7 + $0x644] ss:$16 sps:$4 sm:$0xff]   ;;  %v8643_v49 = vld [vmem:[#allocation7 + $0x560] ss:$16 sps:$4 sm:$0xff]  }
  0xd8   : > { %v8630_v29 = vld [vmem:[#allocation7 + $0x7c4] ss:$16 sps:$4 sm:$0xff]   ;;  %v8646_v51 = vld [vmem:[#allocation7 + $0x760] ss:$16 sps:$4 sm:$0xff]  }
  0xd9   : > { %1492 = vmatpush2.bf16.msra.mxu0 %v8557_v60  ;;  %v8601_v60 = vld [vmem:[#allocation7 + $0x440] ss:$16 sps:$4 sm:$0xff]   ;;  %v8639_v42 = vld [vmem:[#allocation7 + $0x584] ss:$16 sps:$4 sm:$0xff]  }
  0xda   : > { %1565 = vmatpush2.bf16.msra.mxu1 %v8558_v61  ;;  %1493 = vmatprep.subr.bf16.mxu0 %v8559_v62  ;;  %v8604_v61 = vld [vmem:[#allocation7 + $0x640] ss:$16 sps:$4 sm:$0xff]   ;;  %v8609_v62 = vld [vmem:[#allocation7 + $0x424] ss:$16 sps:$4 sm:$0xff]  }
  0xdb   : > { %1566 = vmatprep.subr.bf16.mxu1 %v8561_v63  ;;  %v8612_v63 = vld [vmem:[#allocation7 + $0x624] ss:$16 sps:$4 sm:$0xff]  }
  0xdc   : > { %v8642_v43 = vld [vmem:[#allocation7 + $0x784] ss:$16 sps:$4 sm:$0xff]  }
  0xdd   : > { %1494 = vmatpush2.bf16.msra.mxu0 %v8563_v0  ;;  %v650_v0 = vld [vmem:[%s9490_s21 + $0x188] sm:$0xff]  ;;  %v8645_v47 = vld [vmem:[#allocation7 + $0x564] ss:$16 sps:$4 sm:$0xff]  }
  0xde   : > { %1567 = vmatpush2.bf16.msra.mxu1 %v8564_v1  ;;  %1495 = vmatprep.subr.bf16.mxu0 %v8565_v2  ;;  %v658_v1 = vld [vmem:[%s9490_s21 + $0x1c8] sm:$0xff]  ;;  %v8607_v2 = vld [vmem:[#allocation7 + $0x420] ss:$16 sps:$4 sm:$0xff]   ;;  %v8648_v48 = vld [vmem:[#allocation7 + $0x764] ss:$16 sps:$4 sm:$0xff]  }
  0xdf   : > { %1568 = vmatprep.subr.bf16.mxu1 %v8567_v3  ;;  %v8610_v3 = vld [vmem:[#allocation7 + $0x620] ss:$16 sps:$4 sm:$0xff]   ;;  %v8651_v52 = vld [vmem:[#allocation7 + $0x544] ss:$16 sps:$4 sm:$0xff]  }
  0xe0   : > { %v8654_v55 = vld [vmem:[#allocation7 + $0x744] ss:$16 sps:$4 sm:$0xff]  }
  0xe1   : > { %1496 = vmatpush2.bf16.msra.mxu0 %v8569_v4  ;;  %v9574_v4 = vpack.c.bf16 %v658_v1, %v650_v0  ;;  %v8663_v0 = vld [vmem:[#allocation7 + $0x504] ss:$16 sps:$4 sm:$0xff]  }
  0xe2   : > { %1569 = vmatpush2.bf16.msra.mxu1 %v8570_v5  ;;  %1611 = vmatprep.subr.bf16.mxu0 %v8573_v10  ;;  %v652_v5 = vld [vmem:[%s9490_s21 + $0x198] sm:$0xff]  ;;  %v651_v10 = vld [vmem:[%s9490_s21 + $0x190] sm:$0xff] }
  0xe3   : > { %1684 = vmatprep.subr.bf16.mxu1 %v8576_v11  ;;  %v9579_v8 = vpack.c.bf16 %v660_v6, %v652_v5  ;;  %v659_v11 = vld [vmem:[%s9490_s21 + $0x1d0] sm:$0xff]  ;;  %v605_v5 = vld [vmem:[%s9490_s21 + $0x20] sm:$0xff] }
  0xe4   : > { %1498 = vmatmul.mubr.bf16.vlgmr.msra.gmra.mxu0 %v9526_v12  ;;  %v8666_v1 = vld [vmem:[#allocation7 + $0x704] ss:$16 sps:$4 sm:$0xff]  }
  0xe5   : > { %1571 = vmatmul.mubr.bf16.vlgmr.msra.gmra.mxu1 %v9528_v13  ;;  %1612 = vmatpush1.bf16.msra.mxu0 %v8571_v14  ;;  %v8615_v14 = vld [vmem:[#allocation7 + $0x404] ss:$16 sps:$4 sm:$0xff]  }
  0xe6   : > { %1685 = vmatpush1.bf16.msra.mxu1 %v8574_v15  ;;  %1613 = vmatprep.subr.bf16.mxu0 %v8579_v16  ;;  %v9584_v15 = vpack.c.bf16 %v657_v9, %v649_v7  ;;  %v9586_v16 = vpack.c.bf16 %v659_v11, %v651_v10  ;;  %v613_v6 = vld [vmem:[%s9490_s21 + $0x60] sm:$0xff]  ;;  %v607_v7 = vld [vmem:[%s9490_s21 + $0x30] sm:$0xff]  ;;  %v8669_v10 = vld [vmem:[#allocation7 + $0xec] ss:$16 sps:$4 sm:$0xff]  }
  0xe7   : > { %1686 = vmatprep.subr.bf16.mxu1 %v8582_v17  ;;  %1507 = vmatprep.mubr.bf16.mxu0 %v9534_v26  ;;  %v8618_v17 = vld [vmem:[#allocation7 + $0x604] ss:$16 sps:$4 sm:$0xff]   ;;  %v8672_v11 = vld [vmem:[#allocation7 + $0x2ec] ss:$16 sps:$4 sm:$0xff]  }
  0xe8   : > { %1580 = vmatprep.mubr.bf16.mxu1 %v9539_v30  ;;  %v615_v9 = vld [vmem:[%s9490_s21 + $0x70] sm:$0xff] }
  0xe9   : > { %1614 = vmatpush1.bf16.msra.mxu0 %v8577_v18  ;;  %v8613_v18 = vld [vmem:[#allocation7 + $0x400] ss:$16 sps:$4 sm:$0xff]  }
  0xea   : > { %1687 = vmatpush1.bf16.msra.mxu1 %v8580_v19  ;;  %1615 = vmatprep.subr.bf16.mxu0 %v8585_v20  ;;  %v8616_v19 = vld [vmem:[#allocation7 + $0x600] ss:$16 sps:$4 sm:$0xff]   ;;  %v8621_v20 = vld [vmem:[#allocation7 + $0x5e4] ss:$16 sps:$4 sm:$0xff]  }
  0xeb   : > { %1688 = vmatprep.subr.bf16.mxu1 %v8588_v21  ;;  %v8624_v21 = vld [vmem:[#allocation7 + $0x7e4] ss:$16 sps:$4 sm:$0xff]  }
  0xec   : > { %1508 = vmatmul.mubr.bf16.gmra.mxu0 %v9544_v35 }
  0xed   : > { %1581 = vmatmul.mubr.bf16.gmra.mxu1 %v9546_v36  ;;  %1616 = vmatpush1.bf16.msra.mxu0 %v8583_v24  ;;  %v606_v24 = vld [vmem:[%s9490_s21 + $0x28] sm:$0xff] }
  0xee   : > { %1689 = vmatpush1.bf16.msra.mxu1 %v8586_v25  ;;  %1617 = vmatprep.subr.bf16.mxu0 %v8591_v34  ;;  %v614_v25 = vld [vmem:[%s9490_s21 + $0x68] sm:$0xff]  ;;  %v8625_v34 = vld [vmem:[#allocation7 + $0x5c0] ss:$16 sps:$4 sm:$0xff]  }
  0xef   : > { %1690 = vmatprep.subr.bf16.mxu1 %v8594_v37  ;;  %1517 = vmatprep.mubr.bf16.mxu0 %v9554_v46  ;;  %v9595_v31 = vpack.c.bf16 %v614_v25, %v606_v24  ;;  %v8628_v37 = vld [vmem:[#allocation7 + $0x7c0] ss:$16 sps:$4 sm:$0xff]   ;;  %v8675_v24 = vld [vmem:[#allocation7 + $0xcc] ss:$16 sps:$4 sm:$0xff]  }
  0xf0   : > { %1590 = vmatprep.mubr.bf16.mxu1 %v9559_v50  ;;  %v8678_v25 = vld [vmem:[#allocation7 + $0x2cc] ss:$16 sps:$4 sm:$0xff]  }
  0xf1   : > { %1618 = vmatpush1.bf16.msra.mxu0 %v8589_v38  ;;  %v8633_v38 = vld [vmem:[#allocation7 + $0x5a4] ss:$16 sps:$4 sm:$0xff]  }
  0xf2   : > { %1691 = vmatpush1.bf16.msra.mxu1 %v8592_v39  ;;  %1619 = vmatprep.subr.bf16.mxu0 %v8597_v40  ;;  %v8636_v39 = vld [vmem:[#allocation7 + $0x7a4] ss:$16 sps:$4 sm:$0xff]   ;;  %v8631_v40 = vld [vmem:[#allocation7 + $0x5a0] ss:$16 sps:$4 sm:$0xff]  }
  0xf3   : > { %1692 = vmatprep.subr.bf16.mxu1 %v8600_v41  ;;  %v8634_v41 = vld [vmem:[#allocation7 + $0x7a0] ss:$16 sps:$4 sm:$0xff]  }
  0xf4   : > { %1518 = vmatmul.mubr.bf16.gmra.mxu0 %v9564_v57 }
  0xf5   : > { %1591 = vmatmul.mubr.bf16.gmra.mxu1 %v9566_v58  ;;  %1620 = vmatpush1.bf16.msra.mxu0 %v8595_v44  ;;  %v8637_v44 = vld [vmem:[#allocation7 + $0x580] ss:$16 sps:$4 sm:$0xff]  }
  0xf6   : > { %1693 = vmatpush1.bf16.msra.mxu1 %v8598_v45  ;;  %1621 = vmatprep.subr.bf16.mxu0 %v8603_v56  ;;  %v8640_v45 = vld [vmem:[#allocation7 + $0x780] ss:$16 sps:$4 sm:$0xff]  }
  0xf7   : > { %1694 = vmatprep.subr.bf16.mxu1 %v8606_v59  ;;  %1527 = vmatprep.mubr.bf16.mxu0 %v9574_v4  ;;  %v8649_v56 = vld [vmem:[#allocation7 + $0x540] ss:$16 sps:$4 sm:$0xff]  }
  0xf8   : > { %1600 = vmatprep.mubr.bf16.mxu1 %v9579_v8  ;;  %v8652_v59 = vld [vmem:[#allocation7 + $0x740] ss:$16 sps:$4 sm:$0xff]  }
  0xf9   : > { %1622 = vmatpush1.bf16.msra.mxu0 %v8601_v60  ;;  %v8657_v60 = vld [vmem:[#allocation7 + $0x524] ss:$16 sps:$4 sm:$0xff]  }
  0xfa   : > { %1695 = vmatpush1.bf16.msra.mxu1 %v8604_v61  ;;  %1623 = vmatprep.subr.bf16.mxu0 %v8609_v62  ;;  %v8660_v61 = vld [vmem:[#allocation7 + $0x724] ss:$16 sps:$4 sm:$0xff]   ;;  %v8655_v62 = vld [vmem:[#allocation7 + $0x520] ss:$16 sps:$4 sm:$0xff]  }
  0xfb   : > { %1696 = vmatprep.subr.bf16.mxu1 %v8612_v63  ;;  %v8658_v63 = vld [vmem:[#allocation7 + $0x720] ss:$16 sps:$4 sm:$0xff]  }
  0xfc   : > { %1528 = vmatmul.mubr.bf16.gmra.mxu0 %v9584_v15 }
  0xfd   : > { %1601 = vmatmul.mubr.bf16.gmra.mxu1 %v9586_v16  ;;  %1624 = vmatpush1.bf16.msra.mxu0 %v8607_v2  ;;  %v8661_v2 = vld [vmem:[#allocation7 + $0x500] ss:$16 sps:$4 sm:$0xff]  }
  0xfe   : > { %1697 = vmatpush1.bf16.msra.mxu1 %v8610_v3  ;;  %1625 = vmatprep.subr.bf16.mxu0 %v8615_v14  ;;  %v8664_v3 = vld [vmem:[#allocation7 + $0x700] ss:$16 sps:$4 sm:$0xff]   ;;  %v8667_v14 = vld [vmem:[#allocation7 + $0xe8] ss:$16 sps:$4 sm:$0xff]  }
  0xff   : > { %1698 = vmatprep.subr.bf16.mxu1 %v8618_v17  ;;  %1643 = vmatprep.mubr.bf16.mxu0 %v9595_v31  ;;  %v8670_v17 = vld [vmem:[#allocation7 + $0x2e8] ss:$16 sps:$4 sm:$0xff]  }
 0x100   : > { %1716 = vmatprep.mubr.bf16.mxu1 %v9598_v33 }
 0x101   : > { %1626 = vmatpush1.bf16.msra.mxu0 %v8613_v18  ;;  %v622_v18 = vld [vmem:[%s9490_s21 + $0xa8] sm:$0xff] }
 0x102   : > { %1699 = vmatpush1.bf16.msra.mxu1 %v8616_v19  ;;  %1627 = vmatprep.subr.bf16.mxu0 %v8621_v20  ;;  %v630_v19 = vld [vmem:[%s9490_s21 + $0xe8] sm:$0xff]  ;;  %v9608_v20 = vpack.c.bf16 %v613_v6, %v605_v5 }
 0x103   : > { %1700 = vmatprep.subr.bf16.mxu1 %v8624_v21  ;;  %v9610_v21 = vpack.c.bf16 %v615_v9, %v607_v7  ;;  %v8691_v5 = vld [vmem:[#allocation7 + $0x68] ss:$16 sps:$4 sm:$0xff]  }
 0x104   : > { %v8694_v6 = vld [vmem:[#allocation7 + $0x268] ss:$16 sps:$4 sm:$0xff]  }
 0x105   : > { %1628 = vmatpush2.bf16.msra.mxu0 %v8619_v22  ;;  %v624_v22 = vld [vmem:[%s9490_s21 + $0xb8] sm:$0xff]  ;;  %v654_v7 = vld [vmem:[%s9490_s21 + $0x1a8] sm:$0xff] }
 0x106   : > { %1701 = vmatpush2.bf16.msra.mxu1 %v8622_v23  ;;  %1629 = vmatprep.subr.bf16.mxu0 %v8627_v28  ;;  %v632_v23 = vld [vmem:[%s9490_s21 + $0xf8] sm:$0xff]  ;;  %v662_v9 = vld [vmem:[%s9490_s21 + $0x1e8] sm:$0xff] }
 0x107   : > { %1702 = vmatprep.subr.bf16.mxu1 %v8630_v29  ;;  %v8676_v28 = vld [vmem:[#allocation7 + $0x2c8] ss:$16 sps:$4 sm:$0xff]   ;;  %v9614_v29 = vpack.c.bf16 %v630_v19, %v622_v18  ;;  %v9616_v32 = vpack.c.bf16 %v632_v23, %v624_v22  ;;  %v8699_v18 = vld [vmem:[#allocation7 + $0x4c] ss:$16 sps:$4 sm:$0xff]  }
 0x108   : > { %v8702_v19 = vld [vmem:[#allocation7 + $0x24c] ss:$16 sps:$4 sm:$0xff]   ;;  %v8697_v22 = vld [vmem:[#allocation7 + $0x48] ss:$16 sps:$4 sm:$0xff]  }
 0x109   : > { %1630 = vmatpush2.bf16.msra.mxu0 %v8625_v34  ;;  %v621_v34 = vld [vmem:[%s9490_s21 + $0xa0] sm:$0xff]  ;;  %v8700_v23 = vld [vmem:[#allocation7 + $0x248] ss:$16 sps:$4 sm:$0xff]  }
 0x10a   : > { %1703 = vmatpush2.bf16.msra.mxu1 %v8628_v37  ;;  %1631 = vmatprep.subr.bf16.mxu0 %v8633_v38  ;;  %v629_v37 = vld [vmem:[%s9490_s21 + $0xe0] sm:$0xff]  ;;  %v623_v38 = vld [vmem:[%s9490_s21 + $0xb0] sm:$0xff] }
 0x10b   : > { %1704 = vmatprep.subr.bf16.mxu1 %v8636_v39  ;;  %v631_v39 = vld [vmem:[%s9490_s21 + $0xf0] sm:$0xff] }
 0x10d   : > { %1632 = vmatpush2.bf16.msra.mxu0 %v8631_v40  ;;  %v8681_v40 = vld [vmem:[#allocation7 + $0xac] ss:$16 sps:$4 sm:$0xff]  }
 0x10e   : > { %1705 = vmatpush2.bf16.msra.mxu1 %v8634_v41  ;;  %1633 = vmatprep.subr.bf16.mxu0 %v8639_v42  ;;  %v8684_v41 = vld [vmem:[#allocation7 + $0x2ac] ss:$16 sps:$4 sm:$0xff]   ;;  %v8679_v42 = vld [vmem:[#allocation7 + $0xa8] ss:$16 sps:$4 sm:$0xff]  }
 0x10f   : > { %1706 = vmatprep.subr.bf16.mxu1 %v8642_v43  ;;  %v8682_v43 = vld [vmem:[#allocation7 + $0x2a8] ss:$16 sps:$4 sm:$0xff]  }
 0x111   : > { %1634 = vmatpush2.bf16.msra.mxu0 %v8637_v44  ;;  %v638_v44 = vld [vmem:[%s9490_s21 + $0x128] sm:$0xff] }
 0x112   : > { %1707 = vmatpush2.bf16.msra.mxu1 %v8640_v45  ;;  %1635 = vmatprep.subr.bf16.mxu0 %v8645_v47  ;;  %v646_v45 = vld [vmem:[%s9490_s21 + $0x168] sm:$0xff]  ;;  %v9628_v47 = vpack.c.bf16 %v629_v37, %v621_v34  ;;  %v655_v37 = vld [vmem:[%s9490_s21 + $0x1b0] sm:$0xff] }
 0x113   : > { %1708 = vmatprep.subr.bf16.mxu1 %v8648_v48  ;;  %v9630_v48 = vpack.c.bf16 %v631_v39, %v623_v38  ;;  %v8705_v34 = vld [vmem:[#allocation7 + $0x2c] ss:$16 sps:$4 sm:$0xff]   ;;  %v663_v38 = vld [vmem:[%s9490_s21 + $0x1f0] sm:$0xff] }
 0x114   : > { %v8708_v39 = vld [vmem:[#allocation7 + $0x22c] ss:$16 sps:$4 sm:$0xff]  }
 0x115   : > { %1636 = vmatpush2.bf16.msra.mxu0 %v8643_v49  ;;  %v640_v49 = vld [vmem:[%s9490_s21 + $0x138] sm:$0xff] }
 0x116   : > { %1709 = vmatpush2.bf16.msra.mxu1 %v8646_v51  ;;  %1637 = vmatprep.subr.bf16.mxu0 %v8651_v52  ;;  %v648_v51 = vld [vmem:[%s9490_s21 + $0x178] sm:$0xff] }
 0x117   : > { %1710 = vmatprep.subr.bf16.mxu1 %v8654_v55  ;;  %v8687_v52 = vld [vmem:[#allocation7 + $0x8c] ss:$16 sps:$4 sm:$0xff]  }
 0x118   : > { %v8690_v55 = vld [vmem:[#allocation7 + $0x28c] ss:$16 sps:$4 sm:$0xff]  }
 0x119   : > { %1638 = vmatpush2.bf16.msra.mxu0 %v8649_v56  ;;  %v8685_v56 = vld [vmem:[#allocation7 + $0x88] ss:$16 sps:$4 sm:$0xff]  }
 0x11a   : > { %1711 = vmatpush2.bf16.msra.mxu1 %v8652_v59  ;;  %1639 = vmatprep.subr.bf16.mxu0 %v8657_v60  ;;  %v8688_v59 = vld [vmem:[#allocation7 + $0x288] ss:$16 sps:$4 sm:$0xff]   ;;  %v9634_v60 = vpack.c.bf16 %v646_v45, %v638_v44  ;;  %v8711_v44 = vld [vmem:[#allocation7 + $0xc] ss:$16 sps:$4 sm:$0xff]  }
 0x11b   : > { %1712 = vmatprep.subr.bf16.mxu1 %v8660_v61  ;;  %v637_v61 = vld [vmem:[%s9490_s21 + $0x120] sm:$0xff]  ;;  %v8714_v45 = vld [vmem:[#allocation7 + $0x20c] ss:$16 sps:$4 sm:$0xff]  }
 0x11d   : > { %1640 = vmatpush2.bf16.msra.mxu0 %v8655_v62  ;;  %v645_v62 = vld [vmem:[%s9490_s21 + $0x160] sm:$0xff] }
 0x11e   : > { %1713 = vmatpush2.bf16.msra.mxu1 %v8658_v63  ;;  %1641 = vmatprep.subr.bf16.mxu0 %v8663_v0  ;;  %v9638_v63 = vpack.c.bf16 %v648_v51, %v640_v49  ;;  %v8693_v0 = vld [vmem:[#allocation7 + $0x6c] ss:$16 sps:$4 sm:$0xff]   ;;  %v8709_v49 = vld [vmem:[#allocation7 + $0x8] ss:$16 sps:$4 sm:$0xff]  }
 0x11f   : > { %1714 = vmatprep.subr.bf16.mxu1 %v8666_v1  ;;  %v639_v1 = vld [vmem:[%s9490_s21 + $0x130] sm:$0xff]  ;;  %v8712_v51 = vld [vmem:[#allocation7 + $0x208] ss:$16 sps:$4 sm:$0xff]  }
 0x121   : > { %1642 = vmatpush2.bf16.msra.mxu0 %v8661_v2  ;;  %v647_v2 = vld [vmem:[%s9490_s21 + $0x170] sm:$0xff] }
 0x122   : > { %1715 = vmatpush2.bf16.msra.mxu1 %v8664_v3  ;;  %2613 = vmatprep.subr.bf16.mxu0 %v8669_v10  ;;  %v8696_v3 = vld [vmem:[#allocation7 + $0x26c] ss:$16 sps:$4 sm:$0xff]   ;;  %v9648_v10 = vpack.c.bf16 %v645_v62, %v637_v61 }
 0x123   : > { %2686 = vmatprep.subr.bf16.mxu1 %v8672_v11  ;;  %v9650_v11 = vpack.c.bf16 %v647_v2, %v639_v1  ;;  %v8723_v61 = vld [vmem:[#allocation7 + $0x1cc] ss:$16 sps:$4 sm:$0xff]   ;;  %v8724_v1 = vld [vmem:[#allocation7 + $0x3c8] ss:$16 sps:$4 sm:$0xff]  }
 0x124   : > { %1644 = vmatmul.mubr.bf16.vlgmr.msra.gmra.mxu0 %v9608_v20  ;;  %v8726_v62 = vld [vmem:[#allocation7 + $0x3cc] ss:$16 sps:$4 sm:$0xff]  }
 0x125   : > { %1717 = vmatmul.mubr.bf16.vlgmr.msra.gmra.mxu1 %v9610_v21  ;;  %2614 = vmatpush1.bf16.msra.mxu0 %v8667_v14  ;;  %v656_v14 = vld [vmem:[%s9490_s21 + $0x1b8] sm:$0xff] }
 0x126   : > { %2687 = vmatpush1.bf16.msra.mxu1 %v8670_v17  ;;  %2615 = vmatprep.subr.bf16.mxu0 %v8675_v24  ;;  %v664_v17 = vld [vmem:[%s9490_s21 + $0x1f8] sm:$0xff]  ;;  %v9654_v24 = vpack.c.bf16 %v662_v9, %v654_v7 }
 0x127   : > { %2688 = vmatprep.subr.bf16.mxu1 %v8678_v25  ;;  %1653 = vmatprep.mubr.bf16.mxu0 %v9614_v29  ;;  %v653_v25 = vld [vmem:[%s9490_s21 + $0x1a0] sm:$0xff]  ;;  %v8729_v2 = vld [vmem:[#allocation7 + $0x1ac] ss:$16 sps:$4 sm:$0xff]   ;;  %v8733_v7 = vld [vmem:[#allocation7 + $0x188] ss:$16 sps:$4 sm:$0xff]  }
 0x128   : > { %1726 = vmatprep.mubr.bf16.mxu1 %v9616_v32  ;;  %v8736_v9 = vld [vmem:[#allocation7 + $0x388] ss:$16 sps:$4 sm:$0xff]  }
 0x129   : > { %2616 = vmatpush1.bf16.msra.mxu0 %v8673_v27  ;;  %v661_v27 = vld [vmem:[%s9490_s21 + $0x1e0] sm:$0xff] }
 0x12a   : > { %2689 = vmatpush1.bf16.msra.mxu1 %v8676_v28  ;;  %2617 = vmatprep.subr.bf16.mxu0 %v8681_v40  ;;  %v9658_v28 = vpack.c.bf16 %v664_v17, %v656_v14  ;;  %v9666_v40 = vpack.c.bf16 %v661_v27, %v653_v25  ;;  %v8741_v14 = vld [vmem:[#allocation7 + $0x16c] ss:$16 sps:$4 sm:$0xff]   ;;  %v8745_v25 = vld [vmem:[#allocation7 + $0x148] ss:$16 sps:$4 sm:$0xff]  }
 0x12b   : > { %2690 = vmatprep.subr.bf16.mxu1 %v8684_v41  ;;  %v8703_v41 = vld [vmem:[#allocation7 + $0x28] ss:$16 sps:$4 sm:$0xff]   ;;  %v8744_v17 = vld [vmem:[#allocation7 + $0x36c] ss:$16 sps:$4 sm:$0xff]  }
 0x12c   : > { %1654 = vmatmul.mubr.bf16.gmra.mxu0 %v9628_v47  ;;  %v8748_v27 = vld [vmem:[#allocation7 + $0x348] ss:$16 sps:$4 sm:$0xff]  }
 0x12d   : > { %1727 = vmatmul.mubr.bf16.gmra.mxu1 %v9630_v48  ;;  %2618 = vmatpush1.bf16.msra.mxu0 %v8679_v42  ;;  %v9668_v42 = vpack.c.bf16 %v663_v38, %v655_v37  ;;  %v8756_v37 = vld [vmem:[#allocation7 + $0x32c] ss:$16 sps:$4 sm:$0xff]   ;;  %v8751_v38 = vld [vmem:[#allocation7 + $0x128] ss:$16 sps:$4 sm:$0xff]  }
 0x12e   : > { %2691 = vmatpush1.bf16.msra.mxu1 %v8682_v43  ;;  %2619 = vmatprep.subr.bf16.mxu0 %v8687_v52  ;;  %v8706_v43 = vld [vmem:[#allocation7 + $0x228] ss:$16 sps:$4 sm:$0xff]   ;;  %v8717_v52 = vld [vmem:[#allocation7 + $0x1ec] ss:$16 sps:$4 sm:$0xff]  }
 0x12f   : > { %2692 = vmatprep.subr.bf16.mxu1 %v8690_v55  ;;  %1663 = vmatprep.mubr.bf16.mxu0 %v9634_v60  ;;  %v8720_v55 = vld [vmem:[#allocation7 + $0x3ec] ss:$16 sps:$4 sm:$0xff]  }
 0x130   : > { %1736 = vmatprep.mubr.bf16.mxu1 %v9638_v63 }
 0x131   : > { %2620 = vmatpush1.bf16.msra.mxu0 %v8685_v56  ;;  %v8715_v56 = vld [vmem:[#allocation7 + $0x1e8] ss:$16 sps:$4 sm:$0xff]  }
 0x132   : > { %2693 = vmatpush1.bf16.msra.mxu1 %v8688_v59  ;;  %2621 = vmatprep.subr.bf16.mxu0 %v8693_v0  ;;  %v8718_v59 = vld [vmem:[#allocation7 + $0x3e8] ss:$16 sps:$4 sm:$0xff]  }
 0x133   : > { %2694 = vmatprep.subr.bf16.mxu1 %v8696_v3  ;;  %v8721_v0 = vld [vmem:[#allocation7 + $0x1c8] ss:$16 sps:$4 sm:$0xff]   ;;  %v8732_v3 = vld [vmem:[#allocation7 + $0x3ac] ss:$16 sps:$4 sm:$0xff]  }
 0x134   : > { %1664 = vmatmul.mubr.bf16.gmra.mxu0 %v9648_v10 }
 0x135   : > { %1737 = vmatmul.mubr.bf16.gmra.mxu1 %v9650_v11  ;;  %2622 = vmatpush1.bf16.msra.mxu0 %v8691_v5  ;;  %v8727_v5 = vld [vmem:[#allocation7 + $0x1a8] ss:$16 sps:$4 sm:$0xff]  }
 0x136   : > { %2695 = vmatpush1.bf16.msra.mxu1 %v8694_v6  ;;  %2623 = vmatprep.subr.bf16.mxu0 %v8699_v18  ;;  %v8738_v6 = vld [vmem:[#allocation7 + $0x38c] ss:$16 sps:$4 sm:$0xff]   ;;  %v8739_v18 = vld [vmem:[#allocation7 + $0x168] ss:$16 sps:$4 sm:$0xff]  }
 0x137   : > { %2696 = vmatprep.subr.bf16.mxu1 %v8702_v19  ;;  %1673 = vmatprep.mubr.bf16.mxu0 %v9654_v24  ;;  %v8742_v19 = vld [vmem:[#allocation7 + $0x368] ss:$16 sps:$4 sm:$0xff]  }
 0x138   : > { %1746 = vmatprep.mubr.bf16.mxu1 %v9658_v28 }
 0x139   : > { %2624 = vmatpush1.bf16.msra.mxu0 %v8697_v22  ;;  %v8747_v22 = vld [vmem:[#allocation7 + $0x14c] ss:$16 sps:$4 sm:$0xff]  }
 0x13a   : > { %2697 = vmatpush1.bf16.msra.mxu1 %v8700_v23  ;;  %2625 = vmatprep.subr.bf16.mxu0 %v8705_v34  ;;  %v8750_v23 = vld [vmem:[#allocation7 + $0x34c] ss:$16 sps:$4 sm:$0xff]  }
 0x13b   : > { %2698 = vmatprep.subr.bf16.mxu1 %v8708_v39  ;;  %v8753_v34 = vld [vmem:[#allocation7 + $0x12c] ss:$16 sps:$4 sm:$0xff]   ;;  %v8754_v39 = vld [vmem:[#allocation7 + $0x328] ss:$16 sps:$4 sm:$0xff]  }
 0x13c   : > { %1674 = vmatmul.mubr.bf16.gmra.mxu0 %v9666_v40 }
 0x13d   : > { %1747 = vmatmul.mubr.bf16.gmra.mxu1 %v9668_v42  ;;  %2626 = vmatpush1.bf16.msra.mxu0 %v8703_v41  ;;  %v8759_v41 = vld [vmem:[#allocation7 + $0x10c] ss:$16 sps:$4 sm:$0xff]  }
 0x13e   : > { %2699 = vmatpush1.bf16.msra.mxu1 %v8706_v43  ;;  %2627 = vmatprep.subr.bf16.mxu0 %v8711_v44  ;;  %v8762_v43 = vld [vmem:[#allocation7 + $0x30c] ss:$16 sps:$4 sm:$0xff]   ;;  %v8757_v44 = vld [vmem:[#allocation7 + $0x108] ss:$16 sps:$4 sm:$0xff]  }
 0x13f   : > { %2700 = vmatprep.subr.bf16.mxu1 %v8714_v45  ;;  %2645 = vmatprep.mubr.bf16.mxu0 %v9516_v53  ;;  %v8730_v53 = vld [vmem:[#allocation7 + $0x3a8] ss:$16 sps:$4 sm:$0xff]  }
 0x140   : > { %2718 = vmatprep.mubr.bf16.mxu1 %v9518_v54  ;;  %v8735_v54 = vld [vmem:[#allocation7 + $0x18c] ss:$16 sps:$4 sm:$0xff]   ;;  %v8760_v45 = vld [vmem:[#allocation7 + $0x308] ss:$16 sps:$4 sm:$0xff]  }
 0x141   : > { %2628 = vmatpush1.bf16.msra.mxu0 %v8709_v49  ;;  %v8765_v49 = vld [vmem:[#allocation7 + $0x4ec] ss:$16 sps:$4 sm:$0xff]  }
 0x142   : > { %2701 = vmatpush1.bf16.msra.mxu1 %v8712_v51  ;;  %2629 = vmatprep.subr.bf16.mxu0 %v8717_v52  ;;  %v8768_v51 = vld [vmem:[#allocation7 + $0x6ec] ss:$16 sps:$4 sm:$0xff]   ;;  %v8763_v52 = vld [vmem:[#allocation7 + $0x4e8] ss:$16 sps:$4 sm:$0xff]  }
 0x143   : > { %2702 = vmatprep.subr.bf16.mxu1 %v8720_v55  ;;  %v8766_v55 = vld [vmem:[#allocation7 + $0x6e8] ss:$16 sps:$4 sm:$0xff]  }
 0x145   : > { %2630 = vmatpush2.bf16.msra.mxu0 %v8715_v56  ;;  %v8771_v56 = vld [vmem:[#allocation7 + $0x4cc] ss:$16 sps:$4 sm:$0xff]  }
 0x146   : > { %2703 = vmatpush2.bf16.msra.mxu1 %v8718_v59  ;;  %2631 = vmatprep.subr.bf16.mxu0 %v8723_v61  ;;  %v8774_v59 = vld [vmem:[#allocation7 + $0x6cc] ss:$16 sps:$4 sm:$0xff]   ;;  %v8769_v61 = vld [vmem:[#allocation7 + $0x4c8] ss:$16 sps:$4 sm:$0xff]  }
 0x147   : > { %2704 = vmatprep.subr.bf16.mxu1 %v8726_v62  ;;  %v8772_v62 = vld [vmem:[#allocation7 + $0x6c8] ss:$16 sps:$4 sm:$0xff]  }
 0x149   : > { %2632 = vmatpush2.bf16.msra.mxu0 %v8721_v0  ;;  %v8777_v0 = vld [vmem:[#allocation7 + $0x4ac] ss:$16 sps:$4 sm:$0xff]  }
 0x14a   : > { %2705 = vmatpush2.bf16.msra.mxu1 %v8724_v1  ;;  %2633 = vmatprep.subr.bf16.mxu0 %v8729_v2  ;;  %v8780_v1 = vld [vmem:[#allocation7 + $0x6ac] ss:$16 sps:$4 sm:$0xff]   ;;  %v8775_v2 = vld [vmem:[#allocation7 + $0x4a8] ss:$16 sps:$4 sm:$0xff]  }
 0x14b   : > { %2706 = vmatprep.subr.bf16.mxu1 %v8732_v3  ;;  %v8778_v3 = vld [vmem:[#allocation7 + $0x6a8] ss:$16 sps:$4 sm:$0xff]  }
 0x14d   : > { %2634 = vmatpush2.bf16.msra.mxu0 %v8727_v5  ;;  %v8783_v5 = vld [vmem:[#allocation7 + $0x48c] ss:$16 sps:$4 sm:$0xff]  }
 0x14e   : > { %2707 = vmatpush2.bf16.msra.mxu1 %v8730_v53  ;;  %2635 = vmatprep.subr.bf16.mxu0 %v8735_v54  ;;  %v8786_v53 = vld [vmem:[#allocation7 + $0x68c] ss:$16 sps:$4 sm:$0xff]  }
 0x14f   : > { %2708 = vmatprep.subr.bf16.mxu1 %v8738_v6  ;;  %v8789_v54 = vld [vmem:[#allocation7 + $0x46c] ss:$16 sps:$4 sm:$0xff]  }
 0x150   : > { %v8792_v6 = vld [vmem:[#allocation7 + $0x66c] ss:$16 sps:$4 sm:$0xff]  }
 0x151   : > { %2636 = vmatpush2.bf16.msra.mxu0 %v8733_v7  ;;  %v8795_v7 = vld [vmem:[#allocation7 + $0x44c] ss:$16 sps:$4 sm:$0xff]  }
 0x152   : > { %2709 = vmatpush2.bf16.msra.mxu1 %v8736_v9  ;;  %2637 = vmatprep.subr.bf16.mxu0 %v8741_v14  ;;  %v8798_v9 = vld [vmem:[#allocation7 + $0x64c] ss:$16 sps:$4 sm:$0xff]   ;;  %v8793_v14 = vld [vmem:[#allocation7 + $0x448] ss:$16 sps:$4 sm:$0xff]  }
 0x153   : > { %2710 = vmatprep.subr.bf16.mxu1 %v8744_v17  ;;  %v8801_v17 = vld [vmem:[#allocation7 + $0x42c] ss:$16 sps:$4 sm:$0xff]  }
 0x155   : > { %2638 = vmatpush2.bf16.msra.mxu0 %v8739_v18  ;;  %v8807_v18 = vld [vmem:[#allocation7 + $0x40c] ss:$16 sps:$4 sm:$0xff]  }
 0x156   : > { %2711 = vmatpush2.bf16.msra.mxu1 %v8742_v19  ;;  %2639 = vmatprep.subr.bf16.mxu0 %v8747_v22  ;;  %v8810_v19 = vld [vmem:[#allocation7 + $0x60c] ss:$16 sps:$4 sm:$0xff]   ;;  %v8805_v22 = vld [vmem:[#allocation7 + $0x408] ss:$16 sps:$4 sm:$0xff]  }
 0x157   : > { %2712 = vmatprep.subr.bf16.mxu1 %v8750_v23  ;;  %v8813_v23 = vld [vmem:[#allocation7 + $0x5ec] ss:$16 sps:$4 sm:$0xff]  }
 0x159   : > { %2640 = vmatpush2.bf16.msra.mxu0 %v8745_v25  ;;  %v8819_v25 = vld [vmem:[#allocation7 + $0x5cc] ss:$16 sps:$4 sm:$0xff]  }
 0x15a   : > { %2713 = vmatpush2.bf16.msra.mxu1 %v8748_v27  ;;  %2641 = vmatprep.subr.bf16.mxu0 %v8753_v34  ;;  %v8822_v27 = vld [vmem:[#allocation7 + $0x7cc] ss:$16 sps:$4 sm:$0xff]   ;;  %v8820_v34 = vld [vmem:[#allocation7 + $0x7c8] ss:$16 sps:$4 sm:$0xff]  }
 0x15b   : > { %2714 = vmatprep.subr.bf16.mxu1 %v8756_v37  ;;  %v8828_v37 = vld [vmem:[#allocation7 + $0x7ac] ss:$16 sps:$4 sm:$0xff]  }
 0x15d   : > { %2642 = vmatpush2.bf16.msra.mxu0 %v8751_v38  ;;  %v8823_v38 = vld [vmem:[#allocation7 + $0x5a8] ss:$16 sps:$4 sm:$0xff]  }
 0x15e   : > { %2715 = vmatpush2.bf16.msra.mxu1 %v8754_v39  ;;  %2643 = vmatprep.subr.bf16.mxu0 %v8759_v41  ;;  %v8826_v39 = vld [vmem:[#allocation7 + $0x7a8] ss:$16 sps:$4 sm:$0xff]   ;;  %v8831_v41 = vld [vmem:[#allocation7 + $0x58c] ss:$16 sps:$4 sm:$0xff]  }
 0x15f   : > { %2716 = vmatprep.subr.bf16.mxu1 %v8762_v43  ;;  %v8832_v43 = vld [vmem:[#allocation7 + $0x788] ss:$16 sps:$4 sm:$0xff]  }
 0x161   : > { %2644 = vmatpush2.bf16.msra.mxu0 %v8757_v44  ;;  %v8837_v44 = vld [vmem:[#allocation7 + $0x56c] ss:$16 sps:$4 sm:$0xff]  }
 0x162   : > { %2717 = vmatpush2.bf16.msra.mxu1 %v8760_v45  ;;  %2759 = vmatprep.subr.bf16.mxu0 %v8765_v49  ;;  %v8840_v45 = vld [vmem:[#allocation7 + $0x76c] ss:$16 sps:$4 sm:$0xff]   ;;  %v8835_v49 = vld [vmem:[#allocation7 + $0x568] ss:$16 sps:$4 sm:$0xff]  }
 0x163   : > { %2832 = vmatprep.subr.bf16.mxu1 %v8768_v51  ;;  %v8838_v51 = vld [vmem:[#allocation7 + $0x768] ss:$16 sps:$4 sm:$0xff]  }
 0x164   : > { %2646 = vmatmul.mubr.bf16.vlgmr.msra.gmra.mxu0 %v9526_v12  ;;  %v8781_v12 = vld [vmem:[#allocation7 + $0x488] ss:$16 sps:$4 sm:$0xff]  }
 0x165   : > { %2719 = vmatmul.mubr.bf16.vlgmr.msra.gmra.mxu1 %v9528_v13  ;;  %2760 = vmatpush1.bf16.msra.mxu0 %v8763_v52  ;;  %v8784_v13 = vld [vmem:[#allocation7 + $0x688] ss:$16 sps:$4 sm:$0xff]   ;;  %v8843_v52 = vld [vmem:[#allocation7 + $0x54c] ss:$16 sps:$4 sm:$0xff]  }
 0x166   : > { %2833 = vmatpush1.bf16.msra.mxu1 %v8766_v55  ;;  %2761 = vmatprep.subr.bf16.mxu0 %v8771_v56  ;;  %v8846_v55 = vld [vmem:[#allocation7 + $0x74c] ss:$16 sps:$4 sm:$0xff]   ;;  %v8841_v56 = vld [vmem:[#allocation7 + $0x548] ss:$16 sps:$4 sm:$0xff]  }
 0x167   : > { %2834 = vmatprep.subr.bf16.mxu1 %v8774_v59  ;;  %2655 = vmatprep.mubr.bf16.mxu0 %v9534_v26  ;;  %v8787_v26 = vld [vmem:[#allocation7 + $0x468] ss:$16 sps:$4 sm:$0xff]  }
 0x168   : > { %2728 = vmatprep.mubr.bf16.mxu1 %v9539_v30  ;;  %v8790_v30 = vld [vmem:[#allocation7 + $0x668] ss:$16 sps:$4 sm:$0xff]  }
 0x169   : > { %2762 = vmatpush1.bf16.msra.mxu0 %v8769_v61  ;;  %v8844_v59 = vld [vmem:[#allocation7 + $0x748] ss:$16 sps:$4 sm:$0xff]   ;;  %v8849_v61 = vld [vmem:[#allocation7 + $0x52c] ss:$16 sps:$4 sm:$0xff]  }
 0x16a   : > { %2835 = vmatpush1.bf16.msra.mxu1 %v8772_v62  ;;  %2763 = vmatprep.subr.bf16.mxu0 %v8777_v0  ;;  %v8852_v62 = vld [vmem:[#allocation7 + $0x72c] ss:$16 sps:$4 sm:$0xff]   ;;  %v8847_v0 = vld [vmem:[#allocation7 + $0x528] ss:$16 sps:$4 sm:$0xff]  }
 0x16b   : > { %2836 = vmatprep.subr.bf16.mxu1 %v8780_v1  ;;  %v8850_v1 = vld [vmem:[#allocation7 + $0x728] ss:$16 sps:$4 sm:$0xff]  }
 0x16c   : > { %2656 = vmatmul.mubr.bf16.gmra.mxu0 %v9544_v35  ;;  %v8796_v35 = vld [vmem:[#allocation7 + $0x648] ss:$16 sps:$4 sm:$0xff]  }
 0x16d   : > { %2729 = vmatmul.mubr.bf16.gmra.mxu1 %v9546_v36  ;;  %2764 = vmatpush1.bf16.msra.mxu0 %v8775_v2  ;;  %v8804_v36 = vld [vmem:[#allocation7 + $0x62c] ss:$16 sps:$4 sm:$0xff]  }
 0x16e   : > { %2837 = vmatpush1.bf16.msra.mxu1 %v8778_v3  ;;  %2765 = vmatprep.subr.bf16.mxu0 %v8783_v5  ;;  %v8855_v2 = vld [vmem:[#allocation7 + $0x50c] ss:$16 sps:$4 sm:$0xff]   ;;  %v8853_v5 = vld [vmem:[#allocation7 + $0x508] ss:$16 sps:$4 sm:$0xff]  }
 0x16f   : > { %2838 = vmatprep.subr.bf16.mxu1 %v8786_v53  ;;  %2665 = vmatprep.mubr.bf16.mxu0 %v9554_v46  ;;  %v8799_v46 = vld [vmem:[#allocation7 + $0x428] ss:$16 sps:$4 sm:$0xff]   ;;  %v8858_v3 = vld [vmem:[#allocation7 + $0x70c] ss:$16 sps:$4 sm:$0xff]  }
 0x170   : > { %2738 = vmatprep.mubr.bf16.mxu1 %v9559_v50  ;;  %v8802_v50 = vld [vmem:[#allocation7 + $0x628] ss:$16 sps:$4 sm:$0xff]  }
 0x171   : > { %2766 = vmatpush1.bf16.msra.mxu0 %v8781_v12  ;;  %v8856_v53 = vld [vmem:[#allocation7 + $0x708] ss:$16 sps:$4 sm:$0xff]   ;;  %v8859_v12 = vld [vmem:[#allocation12 + $0x78] sm:$0xff]  }
 0x172   : > { %2839 = vmatpush1.bf16.msra.mxu1 %v8784_v13  ;;  %2767 = vmatprep.subr.bf16.mxu0 %v8789_v54  ;;  %v8861_v13 = vld [vmem:[#allocation12 + $0x38] sm:$0xff]   ;;  %v8860_v54 = vld [vmem:[#allocation12 + $0x70] sm:$0xff]  }
 0x173   : > { %2840 = vmatprep.subr.bf16.mxu1 %v8792_v6  ;;  %v8863_v6 = vld [vmem:[#allocation12 + $0x30] sm:$0xff]  }
 0x174   : > { %2666 = vmatmul.mubr.bf16.gmra.mxu0 %v9564_v57  ;;  %v8808_v57 = vld [vmem:[#allocation7 + $0x608] ss:$16 sps:$4 sm:$0xff]  }
 0x175   : > { %2739 = vmatmul.mubr.bf16.gmra.mxu1 %v9566_v58  ;;  %2768 = vmatpush1.bf16.msra.mxu0 %v8787_v26  ;;  %v8816_v58 = vld [vmem:[#allocation7 + $0x7ec] ss:$16 sps:$4 sm:$0xff]  }
 0x176   : > { %2841 = vmatpush1.bf16.msra.mxu1 %v8790_v30  ;;  %2769 = vmatprep.subr.bf16.mxu0 %v8795_v7 }
 0x177   : > { %2842 = vmatprep.subr.bf16.mxu1 %v8798_v9  ;;  %2675 = vmatprep.mubr.bf16.mxu0 %v9574_v4  ;;  %v8811_v4 = vld [vmem:[#allocation7 + $0x5e8] ss:$16 sps:$4 sm:$0xff]  }
 0x178   : > { %2748 = vmatprep.mubr.bf16.mxu1 %v9579_v8  ;;  %v8814_v8 = vld [vmem:[#allocation7 + $0x7e8] ss:$16 sps:$4 sm:$0xff]  }
 0x179   : > { %2770 = vmatpush1.bf16.msra.mxu0 %v8793_v14 }
 0x17a   : > { %2843 = vmatpush1.bf16.msra.mxu1 %v8796_v35  ;;  %2771 = vmatprep.subr.bf16.mxu0 %v8801_v17  ;;  %v8862_v35 = vld [vmem:[#allocation12 + $0x68] sm:$0xff]  }
 0x17b   : > { %2844 = vmatprep.subr.bf16.mxu1 %v8804_v36  ;;  %v8865_v17 = vld [vmem:[#allocation12 + $0x28] sm:$0xff]  }
 0x17c   : > { %2676 = vmatmul.mubr.bf16.gmra.mxu0 %v9584_v15  ;;  %v8817_v15 = vld [vmem:[#allocation7 + $0x5c8] ss:$16 sps:$4 sm:$0xff]  }
 0x17d   : > { %2749 = vmatmul.mubr.bf16.gmra.mxu1 %v9586_v16  ;;  %2772 = vmatpush1.bf16.msra.mxu0 %v8799_v46  ;;  %v8825_v16 = vld [vmem:[#allocation7 + $0x5ac] ss:$16 sps:$4 sm:$0xff]  }
 0x17e   : > { %2845 = vmatpush1.bf16.msra.mxu1 %v8802_v50  ;;  %2773 = vmatprep.subr.bf16.mxu0 %v8807_v18 }
 0x17f   : > { %2846 = vmatprep.subr.bf16.mxu1 %v8810_v19  ;;  %2791 = vmatprep.mubr.bf16.mxu0 %v9595_v31  ;;  %v8834_v31 = vld [vmem:[#allocation7 + $0x78c] ss:$16 sps:$4 sm:$0xff]  }
 0x180   : > { %2864 = vmatprep.mubr.bf16.mxu1 %v9598_v33  ;;  %v8829_v33 = vld [vmem:[#allocation7 + $0x588] ss:$16 sps:$4 sm:$0xff]  }
 0x181   : > { %2774 = vmatpush1.bf16.msra.mxu0 %v8805_v22 }
 0x182   : > { %2847 = vmatpush1.bf16.msra.mxu1 %v8808_v57  ;;  %2775 = vmatprep.subr.bf16.mxu0 %v8813_v23  ;;  %v8866_v23 = vld [vmem:[#allocation12 + $0x58] sm:$0xff]  }
 0x183   : > { %2848 = vmatprep.subr.bf16.mxu1 %v8816_v58  ;;  %v8869_v58 = vld [vmem:[#allocation12 + $0x18] sm:$0xff]  }
 0x185   : > { %2776 = vmatpush2.bf16.msra.mxu0 %v8811_v4 }
 0x186   : > { %2849 = vmatpush2.bf16.msra.mxu1 %v8814_v8  ;;  %2777 = vmatprep.subr.bf16.mxu0 %v8819_v25 }
 0x187   : > { %2850 = vmatprep.subr.bf16.mxu1 %v8822_v27 }
 0x189   : > { %2778 = vmatpush2.bf16.msra.mxu0 %v8817_v15 }
 0x18a   : > { %2851 = vmatpush2.bf16.msra.mxu1 %v8820_v34  ;;  %2779 = vmatprep.subr.bf16.mxu0 %v8825_v16 }
 0x18b   : > { %2852 = vmatprep.subr.bf16.mxu1 %v8828_v37  ;;  %v8870_v37 = vld [vmem:[#allocation12 + $0x48] sm:$0xff]  }
 0x18d   : > { %2780 = vmatpush2.bf16.msra.mxu0 %v8823_v38  ;;  %v8873_v38 = vld [vmem:[#allocation12 + $0x8] sm:$0xff]  }
 0x18e   : > { %2853 = vmatpush2.bf16.msra.mxu1 %v8826_v39  ;;  %2781 = vmatprep.subr.bf16.mxu0 %v8831_v41 }
 0x18f   : > { %2854 = vmatprep.subr.bf16.mxu1 %v8834_v31 }
 0x191   : > { %2782 = vmatpush2.bf16.msra.mxu0 %v8829_v33 }
 0x192   : > { %2855 = vmatpush2.bf16.msra.mxu1 %v8832_v43  ;;  %2783 = vmatprep.subr.bf16.mxu0 %v8837_v44 }
 0x193   : > { %2856 = vmatprep.subr.bf16.mxu1 %v8840_v45 }
 0x195   : > { %2784 = vmatpush2.bf16.msra.mxu0 %v8835_v49  ;;  %v9752_v49 = vld [vmem:[#allocation12 + $0xb8] sm:$0xff]  }
 0x196   : > { %2857 = vmatpush2.bf16.msra.mxu1 %v8838_v51  ;;  %2785 = vmatprep.subr.bf16.mxu0 %v8843_v52  ;;  %v480_v51 = vlaneseq }
 0x197   : > { %2858 = vmatprep.subr.bf16.mxu1 %v8846_v55 }
 0x198   : > { %v9755_v52 = vshrl.u32 %v480_v51, 7 }
 0x199   : > { %2786 = vmatpush2.bf16.msra.mxu0 %v8841_v56 }
 0x19a   : > { %2859 = vmatpush2.bf16.msra.mxu1 %v8844_v59  ;;  %2787 = vmatprep.subr.bf16.mxu0 %v8849_v61  ;;  %v9762_v55 = vsub.s32 0, %v9755_v52  ;;  %v1757_v61 = vld [vmem:[#allocation9] sm:$0x3] }
 0x19b   : > { %2860 = vmatprep.subr.bf16.mxu1 %v8852_v62 }
 0x19d   : > { %2788 = vmatpush2.bf16.msra.mxu0 %v8847_v0  ;;  %v1785_v0 = vld [vmem:[#allocation10] sm:$0x3] }
 0x19e   : > { %2861 = vmatpush2.bf16.msra.mxu1 %v8850_v1  ;;  %2789 = vmatprep.subr.bf16.mxu0 %v8855_v2  ;;  %v9771_v1 = vsub.s32 1, %v9755_v52 }
 0x19f   : > { %2862 = vmatprep.subr.bf16.mxu1 %v8858_v3 }
 0x1a1   : > { %2790 = vmatpush2.bf16.msra.mxu0 %v8853_v5 }
 0x1a2   : > { %2863 = vmatpush2.bf16.msra.mxu1 %v8856_v53  ;;  %8131 = vmatprep.subr.bf16.mxu0 %v8861_v13  ;;  %v9774_v53 = vrot.slane %v1757_v61, %v9762_v55 }
 0x1a3   : > { %8155 = vmatprep.subr.bf16.mxu1 %v8859_v12 }
 0x1a4   : > { %v9690_v26 = vpop.f32.mrf.mxu0  ;;  %2792 = vmatmul.mubr.bf16.vlgmr.msra.gmra.mxu0 %v9608_v20 }
 0x1a5   : > { %v9692_v30 = vpop.f32.mrf.mxu1  ;;  %2865 = vmatmul.mubr.bf16.vlgmr.msra.gmra.mxu1 %v9610_v21  ;;  %2801 = vmatprep.mubr.bf16.mxu0 %v9614_v29  ;;  %v8864_v29 = vld [vmem:[#allocation12 + $0x60] sm:$0xff]  }
 0x1a6   : > { %2874 = vmatprep.mubr.bf16.mxu1 %v9616_v32  ;;  %v1501_v7 = vpop.f32.mrf.mxu0  ;;  %8156 = vmatpush3.bf16.msra.mxu1 %v8859_v12  ;;  %v8867_v32 = vld [vmem:[#allocation12 + $0x20] sm:$0xff]   ;;  %v1573_v62 = vadd.f32 %v9692_v30, %v9690_v26  ;;  %v9777_v12 = vrot.slane %v1785_v0, %v9762_v55  ;;  %v9783_v30 = vrot.slane %v1757_v61, %v9771_v1 }
 0x1a7   : > { %v1574_v9 = vpop.f32.mrf.mxu1  ;;  %8132 = vmatpush3.bf16.msra.mxu0 %v8861_v13  ;;  %8157 = vmatprep.subr.bf16.mxu1 %v8860_v54 }
 0x1a8   : > { %v9698_v14 = vadd.f32 %v1574_v9, %v1501_v7  ;;  %8133 = vmatprep.subr.bf16.mxu0 %v8863_v6  ;;  %v9700_v36 = vpop.f32.mrf.mxu0  ;;  %v9786_v9 = vrot.slane %v1785_v0, %v9771_v1 }
 0x1a9   : > { %v9702_v46 = vpop.f32.mrf.mxu1 }
 0x1aa   : > { %v9704_v20 = vpop.f32.mrf.mxu0  ;;  %8158 = vmatpush3.bf16.msra.mxu1 %v8860_v54 }
 0x1ab   : > { %v9706_v21 = vpop.f32.mrf.mxu1  ;;  %8134 = vmatpush3.bf16.msra.mxu0 %v8863_v6  ;;  %8159 = vmatprep.subr.bf16.mxu1 %v8862_v35  ;;  %v1577_v6 = vadd.f32 %v9702_v46, %v9700_v36 }
 0x1ac   : > { %8135 = vmatprep.subr.bf16.mxu0 %v8865_v17  ;;  %v9708_v50 = vpop.f32.mrf.mxu0  ;;  %2802 = vmatmul.mubr.bf16.gmra.mxu0 %v9628_v47 }
 0x1ad   : > { %v9710_v18 = vpop.f32.mrf.mxu1  ;;  %2875 = vmatmul.mubr.bf16.gmra.mxu1 %v9630_v48  ;;  %2811 = vmatprep.mubr.bf16.mxu0 %v9634_v60  ;;  %v8868_v60 = vld [vmem:[#allocation12 + $0x50] sm:$0xff]  }
 0x1ae   : > { %2884 = vmatprep.mubr.bf16.mxu1 %v9638_v63  ;;  %v1511_v19 = vpop.f32.mrf.mxu0  ;;  %8160 = vmatpush3.bf16.msra.mxu1 %v8862_v35  ;;  %v8871_v63 = vld [vmem:[#allocation12 + $0x10] sm:$0xff]  }
 0x1af   : > { %v1584_v22 = vpop.f32.mrf.mxu1  ;;  %8136 = vmatpush3.bf16.msra.mxu0 %v8865_v17  ;;  %8161 = vmatprep.subr.bf16.mxu1 %v8864_v29 }
 0x1b0   : > { %v9716_v57 = vadd.f32 %v1584_v22, %v1511_v19  ;;  %8137 = vmatprep.subr.bf16.mxu0 %v8867_v32  ;;  %v9718_v4 = vpop.f32.mrf.mxu0 }
 0x1b1   : > { %v9720_v8 = vpop.f32.mrf.mxu1 }
 0x1b2   : > { %v9722_v47 = vpop.f32.mrf.mxu0  ;;  %8162 = vmatpush3.bf16.msra.mxu1 %v8864_v29  ;;  %v1579_v29 = vadd.f32 %v9706_v21, %v9704_v20 }
 0x1b3   : > { %v9724_v48 = vpop.f32.mrf.mxu1  ;;  %8138 = vmatpush3.bf16.msra.mxu0 %v8867_v32  ;;  %8163 = vmatprep.subr.bf16.mxu1 %v8866_v23 }
 0x1b4   : > { %8139 = vmatprep.subr.bf16.mxu0 %v8869_v58  ;;  %v9726_v25 = vpop.f32.mrf.mxu0  ;;  %2812 = vmatmul.mubr.bf16.gmra.mxu0 %v9648_v10  ;;  %v1589_v61 = vadd.f32 %v9724_v48, %v9722_v47 }
 0x1b5   : > { %v9728_v27 = vpop.f32.mrf.mxu1  ;;  %2885 = vmatmul.mubr.bf16.gmra.mxu1 %v9650_v11  ;;  %2821 = vmatprep.mubr.bf16.mxu0 %v9654_v24  ;;  %v8872_v24 = vld [vmem:[#allocation12 + $0x40] sm:$0xff]  }
 0x1b6   : > { %2894 = vmatprep.mubr.bf16.mxu1 %v9658_v28  ;;  %v1521_v15 = vpop.f32.mrf.mxu0  ;;  %8164 = vmatpush3.bf16.msra.mxu1 %v8866_v23  ;;  %v8874_v28 = vld [vmem:[#allocation12] sm:$0xff]  }
 0x1b7   : > { %v1594_v34 = vpop.f32.mrf.mxu1  ;;  %8140 = vmatpush3.bf16.msra.mxu0 %v8869_v58  ;;  %8165 = vmatprep.subr.bf16.mxu1 %v8868_v60 }
 0x1b8   : > { %v9734_v16 = vadd.f32 %v1594_v34, %v1521_v15  ;;  %8141 = vmatprep.subr.bf16.mxu0 %v8871_v63  ;;  %v9736_v39 = vpop.f32.mrf.mxu0 }
 0x1b9   : > { %v9738_v41 = vpop.f32.mrf.mxu1 }
 0x1ba   : > { %v9740_v10 = vpop.f32.mrf.mxu0  ;;  %8166 = vmatpush3.bf16.msra.mxu1 %v8868_v60 }
 0x1bb   : > { %v9742_v11 = vpop.f32.mrf.mxu1  ;;  %8142 = vmatpush3.bf16.msra.mxu0 %v8871_v63  ;;  %8167 = vmatprep.subr.bf16.mxu1 %v8870_v37  ;;  %v1583_v63 = vadd.f32 %v9710_v18, %v9708_v50 }
 0x1bc   : > { %8143 = vmatprep.subr.bf16.mxu0 %v8873_v38  ;;  %v9744_v31 = vpop.f32.mrf.mxu0  ;;  %2822 = vmatmul.mubr.bf16.gmra.mxu0 %v9666_v40 }
 0x1bd   : > { %v9746_v33 = vpop.f32.mrf.mxu1  ;;  %2895 = vmatmul.mubr.bf16.gmra.mxu1 %v9668_v42 }
 0x1be   : > { %v1531_v43 = vpop.f32.mrf.mxu0  ;;  %8168 = vmatpush3.bf16.msra.mxu1 %v8870_v37 }
 0x1bf   : > { %v1604_v44 = vpop.f32.mrf.mxu1  ;;  %8144 = vmatpush3.bf16.msra.mxu0 %v8873_v38  ;;  %8169 = vmatprep.subr.bf16.mxu1 %v8872_v24 }
 0x1c0   : > { %v9750_v45 = vadd.f32 %v1604_v44, %v1531_v43  ;;  %8145 = vmatprep.subr.bf16.mxu0 %v8874_v28  ;;  %v9757_v40 = vpop.f32.mrf.mxu0  ;;  %v1587_v44 = vadd.f32 %v9720_v8, %v9718_v4 }
 0x1c1   : > { %v9759_v42 = vpop.f32.mrf.mxu1 }
 0x1c2   : > { %8170 = vmatpush3.bf16.msra.mxu1 %v8872_v24  ;;  %v9764_v56 = vpop.f32.mrf.mxu0 }
 0x1c3   : > { %8146 = vmatpush3.bf16.msra.mxu0 %v8874_v28  ;;  %v9766_v59 = vpop.f32.mrf.mxu1 }
 0x1c4   : > { %8179 = vmatprep.subr.bf16.mxu0 %v9752_v49 }
 0x1e4   : > { %v1645_v2 = vpop.f32.mrf.mxu0 }
 0x1e5   : > { %v1718_v3 = vpop.f32.mrf.mxu1  ;;  %v1646_v5 = vadd.f32 %v1645_v2, %v1573_v62 }
 0x1e6   : > { %v1647_v13 = vpop.f32.mrf.mxu0 }
 0x1e7   : > { %v1720_v54 = vpop.f32.mrf.mxu1  ;;  %v1719_v7 = vadd.f32 %v1718_v3, %v1646_v5  ;;  %v1648_v26 = vadd.f32 %v1647_v13, %v9698_v14 }
 0x1e8   : > { %v1649_v35 = vpop.f32.mrf.mxu0 }
 0x1e9   : > { %v1722_v17 = vpop.f32.mrf.mxu1  ;;  %v1769_v32 = vmul.f32 %v9774_v53, %v1719_v7  ;;  %v1721_v19 = vadd.f32 %v1720_v54, %v1648_v26  ;;  %v1650_v22 = vadd.f32 %v1649_v35, %v1577_v6  ;;  %v493_v7 = vand.u32 15, %v9755_v52 }
 0x1ea   : > { %v1651_v23 = vpop.f32.mrf.mxu0 }
 0x1eb   : > { %v1724_v36 = vpop.f32.mrf.mxu1  ;;  %v1797_v46 = vadd.f32 %v9777_v12, %v1769_v32  ;;  %v1770_v14 = vmul.f32 %v9783_v30, %v1721_v19  ;;  %v1723_v58 = vadd.f32 %v1722_v17, %v1650_v22  ;;  %v1652_v60 = vadd.f32 %v1651_v23, %v1579_v29 }
 0x1ec   : > { %v1655_v15 = vpop.f32.mrf.mxu0  ;;  %vm9819_vm0 = vcmp.ne.s32.totalorder %v493_v7, 0 }
 0x1ed   : > { %v1728_v34 = vpop.f32.mrf.mxu1  ;;  %v1813_v37 = vmax.f32 %v1797_v46, 0.0  ;;  %v9796_v20 = vadd.f32 %v9786_v9, %v1770_v14  ;;  %v1771_v21 = vmul.f32 %v9774_v53, %v1723_v58  ;;  %v1725_v38 = vadd.f32 %v1724_v36, %v1652_v60  ;;  %vm9841_vm2 = vmpackc.low %vm9239_vm1, %vm9819_vm0 }
 0x1ee   : > { %v1656_v24 = vadd.f32 %v1655_v15, %v1583_v63  ;;  %v1657_v28 = vpop.f32.mrf.mxu0  ;;  %v1597_v58 = vadd.f32 %v9738_v41, %v9736_v39 }
 0x1ef   : > { %v1730_v43 = vpop.f32.mrf.mxu1  ;;  %3001 = vst [vmem:[#allocation2 + $0x1] sm:$0xff] %v1813_v37  ;;  %v1799_v51 = vadd.f32 %v9777_v12, %v1771_v21  ;;  %v1772_v50 = vmul.f32 %v9783_v30, %v1725_v38  ;;  %v1658_v18 = vadd.f32 %v1657_v28, %v9716_v57  ;;  %v1593_v57 = vadd.f32 %v9728_v27, %v9726_v25 }
 0x1f0   : > { %v1729_v62 = vadd.f32 %v1728_v34, %v1656_v24  ;;  %v1659_v0 = vpop.f32.mrf.mxu0  ;;  %v1599_v34 = vadd.f32 %v9742_v11, %v9740_v10  ;;  %v483_v24 = vadd.s32 16, %v9755_v52  ;;  %v1603_v10 = vadd.f32 %v9746_v33, %v9744_v31 }
 0x1f1   : > { %v1732_v2 = vpop.f32.mrf.mxu1  ;;  %v1815_v3 = vmax.f32 %v1799_v51, 0.0  ;;  %v9807_v5 = vadd.f32 %v9786_v9, %v1772_v50  ;;  %v1731_v13 = vadd.f32 %v1730_v43, %v1658_v18  ;;  %v1660_v54 = vadd.f32 %v1659_v0, %v1587_v44 }
 0x1f2   : > { %v1773_v4 = vmul.f32 %v9774_v53, %v1729_v62  ;;  %v1661_v8 = vpop.f32.mrf.mxu0  ;;  %v507_v33 = vand.u32 15, %v483_v24  ;;  %v8876_v24 = vld [vmem:[#allocation12 + $0xb0] sm:$0xff]  }
 0x1f3   : > { %v1734_v6 = vpop.f32.mrf.mxu1  ;;  %3002 = vst [vmem:[#allocation2 + $0x9] sm:$0xff] %v1815_v3  ;;  %v1774_v47 = vmul.f32 %v9783_v30, %v1731_v13  ;;  %v1733_v48 = vadd.f32 %v1732_v2, %v1660_v54  ;;  %v1662_v26 = vadd.f32 %v1661_v8, %v1589_v61  ;;  %v3009_v29 = vpack.c.bf16 %v1815_v3, %v1813_v37 }
 0x1f4   : > { %v1801_v35 = vadd.f32 %v9777_v12, %v1773_v4  ;;  %v1665_v17 = vpop.f32.mrf.mxu0  ;;  %vm587_vm3 = vcmp.ne.s32.totalorder %v507_v33, 0 }
 0x1f5   : > { %v1738_v32 = vpop.f32.mrf.mxu1  ;;  %v9816_v19 = vadd.f32 %v9786_v9, %v1774_v47  ;;  %v1775_v22 = vmul.f32 %v9774_v53, %v1733_v48  ;;  %v1735_v23 = vadd.f32 %v1734_v6, %v1662_v26  ;;  %v1666_v36 = vadd.f32 %v1665_v17, %v1593_v57  ;;  %8171 = vmatprep.mubr.bf16.mxu1 %v3009_v29  ;;  %vm9867_vm4 = vmpackc.low %vm9239_vm1, %vm587_vm3 }
 0x1f6   : > { %v1817_v46 = vmax.f32 %v1801_v35, 0.0  ;;  %v1667_v25 = vpop.f32.mrf.mxu0  ;;  %v3013_v62 = vld [vmem:[#allocation2] sm:$0xff]  ;;  %v1607_v26 = vadd.f32 %v9759_v42, %v9757_v40 }
 0x1f7   : > { %v1740_v27 = vpop.f32.mrf.mxu1  ;;  %v1803_v60 = vadd.f32 %v9777_v12, %v1775_v22  ;;  %v1776_v63 = vmul.f32 %v9783_v30, %v1735_v23  ;;  %v1668_v15 = vadd.f32 %v1667_v25, %v9734_v16  ;;  %v1739_v37 = vadd.f32 %v1738_v32, %v1666_v36 }
 0x1f8   : > { %3003 = vst [vmem:[#allocation2 + $0x11] sm:$0xff] %v1817_v46  ;;  %v1669_v21 = vpop.f32.mrf.mxu0  ;;  %v1609_v32 = vadd.f32 %v9766_v59, %v9764_v56 }
 0x1f9   : > { %v1742_v38 = vpop.f32.mrf.mxu1  ;;  %v1819_v28 = vmax.f32 %v1803_v60, 0.0  ;;  %v9832_v43 = vadd.f32 %v9786_v9, %v1776_v63  ;;  %v1670_v39 = vadd.f32 %v1669_v21, %v1597_v58  ;;  %v1741_v41 = vadd.f32 %v1740_v27, %v1668_v15 }
 0x1fa   : > { %v1777_v44 = vmul.f32 %v9774_v53, %v1739_v37  ;;  %v1671_v51 = vpop.f32.mrf.mxu0  ;;  %v3014_v16 = vld [vmem:[#allocation2 + $0x8] sm:$0xff] }
 0x1fb   : > { %v1744_v50 = vpop.f32.mrf.mxu1  ;;  %3004 = vst [vmem:[#allocation2 + $0x19] sm:$0xff] %v1819_v28  ;;  %v3010_v11 = vpack.c.bf16 %v1819_v28, %v1817_v46  ;;  %v1778_v18 = vmul.f32 %v9783_v30, %v1741_v41  ;;  %v1672_v61 = vadd.f32 %v1671_v51, %v1599_v34  ;;  %v1743_v3 = vadd.f32 %v1742_v38, %v1670_v39 }
 0x1fc   : > { %v1805_v2 = vadd.f32 %v9777_v12, %v1777_v44  ;;  %v1675_v13 = vpop.f32.mrf.mxu0  ;;  %v7616_v54 = vpack.c.bf16 %v3014_v16, %v3013_v62  ;;  %v485_v46 = vadd.s32 32, %v9755_v52 }
 0x1fd   : > { %v1748_v31 = vpop.f32.mrf.mxu1  ;;  %v9847_v4 = vadd.f32 %v9786_v9, %v1778_v18  ;;  %v1676_v8 = vadd.f32 %v1675_v13, %v1603_v10  ;;  %v1745_v6 = vadd.f32 %v1744_v50, %v1672_v61  ;;  %8172 = vmatmul.mubr.bf16.vlgmr.msra.gmra.mxu1 %v3010_v11  ;;  %v1779_v57 = vmul.f32 %v9774_v53, %v1743_v3  ;;  %v8877_v10 = vld [vmem:[#allocation12 + $0xa8] sm:$0xff]   ;;  %v8878_v3 = vld [vmem:[#allocation12 + $0xa0] sm:$0xff]  }
 0x1fe   : > { %v1821_v7 = vmax.f32 %v1805_v2, 0.0  ;;  %8147 = vmatprep.mubr.msk.bf16.mxu0 %vm9841_vm2, %v7616_v54  ;;  %v1677_v47 = vpop.f32.mrf.mxu0  ;;  %v521_v28 = vand.u32 15, %v485_v46  ;;  %v487_v11 = vadd.s32 48, %v9755_v52 }
 0x1ff   : > { %v1750_v48 = vpop.f32.mrf.mxu1  ;;  %v1780_v35 = vmul.f32 %v9783_v30, %v1745_v6  ;;  %v1678_v17 = vadd.f32 %v1677_v47, %v9750_v45  ;;  %v1749_v29 = vadd.f32 %v1748_v31, %v1676_v8  ;;  %v1807_v22 = vadd.f32 %v9777_v12, %v1779_v57  ;;  %v3015_v15 = vld [vmem:[#allocation2 + $0x10] sm:$0xff]  ;;  %v3033_v57 = vld [vmem:[#allocation2 + $0x2] sm:$0xff]  ;;  %v8929_v47 = vld [vmem:[#allocation12 + $0x208] sm:$0xff]  }
 0x200   : > { %3005 = vst [vmem:[#allocation2 + $0x21] sm:$0xff] %v1821_v7  ;;  %v1679_v23 = vpop.f32.mrf.mxu0  ;;  %vm589_vm5 = vcmp.ne.s32.totalorder %v521_v28, 0  ;;  %v535_v13 = vand.u32 15, %v487_v11  ;;  %v3034_v31 = vld [vmem:[#allocation2 + $0xa] sm:$0xff]  ;;  %v8928_v6 = vld [vmem:[#allocation12 + $0x210] sm:$0xff]  }
 0x201   : > { %v1752_v36 = vpop.f32.mrf.mxu1  ;;  %v9861_v25 = vadd.f32 %v9786_v9, %v1780_v35  ;;  %v1781_v40 = vmul.f32 %v9774_v53, %v1749_v29  ;;  %v1680_v42 = vadd.f32 %v1679_v23, %v1607_v26  ;;  %v1751_v27 = vadd.f32 %v1750_v48, %v1678_v17  ;;  %vm9886_vm6 = vmpackc.low %vm9239_vm1, %vm589_vm5  ;;  %v8880_v48 = vld [vmem:[#allocation12 + $0x90] sm:$0xff]   ;;  %v8881_v35 = vld [vmem:[#allocation12 + $0x88] sm:$0xff]  }
 0x202   : > { %v1823_v45 = vmax.f32 %v1807_v22, 0.0  ;;  %v1681_v14 = vpop.f32.mrf.mxu0  ;;  %v3016_v60 = vld [vmem:[#allocation2 + $0x18] sm:$0xff]  ;;  %vm591_vm7 = vcmp.ne.s32.totalorder %v535_v13, 0  ;;  %v7644_v26 = vpack.c.bf16 %v3034_v31, %v3033_v57  ;;  %v484_v17 = vadd.s32 24, %v9755_v52 }
 0x203   : > { %v1754_v58 = vpop.f32.mrf.mxu1  ;;  %v1809_v56 = vadd.f32 %v9777_v12, %v1781_v40  ;;  %v1782_v59 = vmul.f32 %v9783_v30, %v1751_v27  ;;  %v1682_v63 = vadd.f32 %v1681_v14, %v1609_v32  ;;  %v1753_v37 = vadd.f32 %v1752_v36, %v1680_v42  ;;  %vm9893_vm9 = vmpackc.low %vm9239_vm1, %vm591_vm7  ;;  %v8882_v32 = vld [vmem:[#allocation12 + $0x80] sm:$0xff]  }
 0x204   : > { %3006 = vst [vmem:[#allocation2 + $0x29] sm:$0xff] %v1823_v45  ;;  %v7619_v21 = vpack.c.bf16 %v3016_v60, %v3015_v15  ;;  %v3011_v38 = vpack.c.bf16 %v1823_v45, %v1821_v7  ;;  %v486_v29 = vadd.s32 40, %v9755_v52  ;;  %v514_v22 = vand.u32 15, %v484_v17  ;;  %v3035_v42 = vld [vmem:[#allocation2 + $0x12] sm:$0xff] }
 0x205   : > { %v1825_v39 = vmax.f32 %v1809_v56, 0.0  ;;  %v9872_v41 = vadd.f32 %v9786_v9, %v1782_v59  ;;  %v1755_v44 = vadd.f32 %v1754_v58, %v1682_v63  ;;  %v1783_v51 = vmul.f32 %v9774_v53, %v1753_v37 }
 0x206   : > { %8148 = vmatmul.mubr.msk.bf16.vlgmr.msra.gmra.mxu0 %vm9867_vm4, %v7619_v21  ;;  %8175 = vmatprep.mubr.bf16.mxu1 %v3011_v38  ;;  %v482_v53 = vadd.s32 8, %v9755_v52  ;;  %v528_v23 = vand.u32 15, %v486_v29  ;;  %vm596_vm11 = vcmp.ne.s32.totalorder %v514_v22, 15  ;;  %v488_v36 = vadd.s32 56, %v9755_v52 }
 0x207   : > { %3007 = vst [vmem:[#allocation2 + $0x31] sm:$0xff] %v1825_v39  ;;  %v1784_v50 = vmul.f32 %v9783_v30, %v1755_v44  ;;  %8180 = vmatpush3.bf16.msra.mxu0 %v9752_v49  ;;  %v1811_v16 = vadd.f32 %v9777_v12, %v1783_v51  ;;  %v3017_v62 = vld [vmem:[#allocation2 + $0x20] sm:$0xff]  ;;  %vm9910_vm13 = vmpackc.low %vm596_vm11, %vm9239_vm1 }
 0x208   : > { %8181 = vmatprep.subr.bf16.mxu0 %v8876_v24  ;;  %v500_v54 = vand.u32 15, %v482_v53  ;;  %v3036_v46 = vld [vmem:[#allocation2 + $0x1a] sm:$0xff]  ;;  %vm598_vm12 = vcmp.ne.s32.totalorder %v528_v23, 15  ;;  %v542_v60 = vand.u32 15, %v488_v36 }
 0x209   : > { %v9882_v18 = vadd.f32 %v9786_v9, %v1784_v50  ;;  %v1827_v61 = vmax.f32 %v1811_v16, 0.0  ;;  %v8879_v9 = vld [vmem:[#allocation12 + $0x98] sm:$0xff]   ;;  %v7647_v45 = vpack.c.bf16 %v3036_v46, %v3035_v42  ;;  %vm9915_vm14 = vmpackc.low %vm598_vm12, %vm9239_vm1 }
 0x20a   : > { %vm594_vm8 = vcmp.ne.s32.totalorder %v500_v54, 15  ;;  %vm600_vm15 = vcmp.ne.s32.totalorder %v542_v60, 15 }
 0x20b   : > { %8182 = vmatpush3.bf16.msra.mxu0 %v8876_v24  ;;  %v3018_v2 = vld [vmem:[#allocation2 + $0x28] sm:$0xff]  ;;  %3008 = vst [vmem:[#allocation2 + $0x39] sm:$0xff] %v1827_v61  ;;  %v3012_v12 = vpack.c.bf16 %v1827_v61, %v1825_v39  ;;  %vm9898_vm10 = vmpackc.low %vm594_vm8, %vm9239_vm1 }
 0x20c   : > { %8183 = vmatprep.subr.bf16.mxu0 %v8877_v10  ;;  %v7622_v49 = vpack.c.bf16 %v3018_v2, %v3017_v62  ;;  %v3037_v14 = vld [vmem:[#allocation2 + $0x22] sm:$0xff]  ;;  %vm9934_vm0 = vmpackc.low %vm600_vm15, %vm9239_vm1 }
 0x20d   : > { %8176 = vmatmul.mubr.bf16.gmra.mxu1 %v3012_v12 }
 0x20e   : > { %8151 = vmatprep.mubr.msk.bf16.mxu0 %vm9886_vm6, %v7622_v49  ;;  %v3019_v33 = vld [vmem:[#allocation2 + $0x30] sm:$0xff] }
 0x20f   : > { %8184 = vmatpush3.bf16.msra.mxu0 %v8877_v10  ;;  %v3038_v40 = vld [vmem:[#allocation2 + $0x2a] sm:$0xff] }
 0x210   : > { %8185 = vmatprep.subr.bf16.mxu0 %v8878_v3  ;;  %v7650_v59 = vpack.c.bf16 %v3038_v40, %v3037_v14 }
 0x212   : > { %v3020_v8 = vld [vmem:[#allocation2 + $0x38] sm:$0xff] }
 0x213   : > { %8186 = vmatpush3.bf16.msra.mxu0 %v8878_v3  ;;  %v7625_v7 = vpack.c.bf16 %v3020_v8, %v3019_v33  ;;  %v3039_v28 = vld [vmem:[#allocation2 + $0x32] sm:$0xff]  ;;  %v3040_v39 = vld [vmem:[#allocation2 + $0x3a] sm:$0xff] }
 0x214   : > { %8187 = vmatprep.subr.bf16.mxu0 %v8879_v9  ;;  %v7653_v10 = vpack.c.bf16 %v3040_v39, %v3039_v28 }
 0x215   : > { %8152 = vmatmul.mubr.msk.bf16.gmra.mxu0 %vm9893_vm9, %v7625_v7 }
 0x216   : > { %8195 = vmatprep.mubr.msk.bf16.mxu0 %vm9898_vm10, %v7644_v26 }
 0x217   : > { %8188 = vmatpush3.bf16.msra.mxu0 %v8879_v9 }
 0x218   : > { %8189 = vmatprep.subr.bf16.mxu0 %v8880_v48 }
 0x21b   : > { %8190 = vmatpush3.bf16.msra.mxu0 %v8880_v48 }
 0x21c   : > { %8191 = vmatprep.subr.bf16.mxu0 %v8881_v35 }
 0x21f   : > { %8192 = vmatpush3.bf16.msra.mxu0 %v8881_v35 }
 0x220   : > { %8193 = vmatprep.subr.bf16.mxu0 %v8882_v32 }
 0x223   : > { %8194 = vmatpush3.bf16.msra.mxu0 %v8882_v32 }
 0x224   : > { %v2647_v56 = vpop.f32.mrf.mxu0 }
 0x225   : > { %v2720_v52 = vpop.f32.mrf.mxu1 }
 0x226   : > { %v9919_v63 = vadd.f32 %v2720_v52, %v2647_v56  ;;  %8196 = vmatmul.mubr.msk.bf16.vlgmr.msra.gmra.mxu0 %vm9910_vm13, %v7647_v45  ;;  %v2649_v15 = vpop.f32.mrf.mxu0  ;;  %v8883_v56 = vld [vmem:[#allocation12 + $0x138] sm:$0xff]   ;;  %v8884_v52 = vld [vmem:[#allocation12 + $0x130] sm:$0xff]  }
 0x227   : > { %v2722_v37 = vpop.f32.mrf.mxu1  ;;  %8199 = vmatprep.mubr.msk.bf16.mxu0 %vm9915_vm14, %v7650_v59  ;;  %8227 = vmatprep.subr.bf16.mxu0 %v8883_v56  ;;  %v8885_v59 = vld [vmem:[#allocation12 + $0xf8] sm:$0xff]  }
 0x228   : > { %v9925_v21 = vadd.f32 %v2722_v37, %v2649_v15  ;;  %v2651_v38 = vpop.f32.mrf.mxu0  ;;  %8228 = vmatpush3.bf16.msra.mxu0 %v8883_v56  ;;  %v8886_v15 = vld [vmem:[#allocation12 + $0x128] sm:$0xff]   ;;  %v8887_v37 = vld [vmem:[#allocation12 + $0xf0] sm:$0xff]   ;;  %8203 = vmatprep.subr.bf16.mxu1 %v8885_v59 }
 0x229   : > { %v2724_v24 = vpop.f32.mrf.mxu1  ;;  %8229 = vmatprep.subr.bf16.mxu0 %v8884_v52  ;;  %8204 = vmatpush3.bf16.msra.mxu1 %v8885_v59  ;;  %v8892_v59 = vld [vmem:[#allocation12 + $0x110] sm:$0xff]  }
 0x22a   : > { %v9927_v44 = vadd.f32 %v2724_v24, %v2651_v38  ;;  %v9929_v51 = vpop.f32.mrf.mxu0  ;;  %8205 = vmatprep.subr.bf16.mxu1 %v8887_v37 }
 0x22b   : > { %v9931_v50 = vpop.f32.mrf.mxu1 }
 0x22c   : > { %v2657_v11 = vpop.f32.mrf.mxu0  ;;  %8230 = vmatpush3.bf16.msra.mxu0 %v8884_v52  ;;  %v8891_v52 = vld [vmem:[#allocation12 + $0xe0] sm:$0xff]  }
 0x22d   : > { %v2730_v53 = vpop.f32.mrf.mxu1  ;;  %8231 = vmatprep.subr.bf16.mxu0 %v8886_v15  ;;  %8206 = vmatpush3.bf16.msra.mxu1 %v8887_v37 }
 0x22e   : > { %v9938_v61 = vadd.f32 %v2730_v53, %v2657_v11  ;;  %8200 = vmatmul.mubr.msk.bf16.gmra.mxu0 %vm9934_vm0, %v7653_v10  ;;  %v2659_v62 = vpop.f32.mrf.mxu0  ;;  %v9970_v10 = vld [vmem:[#allocation9 + $0x2] sm:$0x3]  ;;  %v8888_v11 = vld [vmem:[#allocation12 + $0x120] sm:$0xff]  }
 0x22f   : > { %v2732_v2 = vpop.f32.mrf.mxu1 }
 0x230   : > { %v9942_v49 = vadd.f32 %v2732_v2, %v2659_v62  ;;  %v2661_v12 = vpop.f32.mrf.mxu0  ;;  %8232 = vmatpush3.bf16.msra.mxu0 %v8886_v15 }
 0x231   : > { %v2734_v3 = vpop.f32.mrf.mxu1  ;;  %8233 = vmatprep.subr.bf16.mxu0 %v8888_v11 }
 0x232   : > { %v9944_v13 = vadd.f32 %v2734_v3, %v2661_v12  ;;  %v9946_v54 = vpop.f32.mrf.mxu0 }
 0x233   : > { %v9948_v9 = vpop.f32.mrf.mxu1 }
 0x234   : > { %v2667_v31 = vpop.f32.mrf.mxu0  ;;  %8234 = vmatpush3.bf16.msra.mxu0 %v8888_v11  ;;  %v2737_v11 = vadd.f32 %v9948_v9, %v9946_v54 }
 0x235   : > { %v2740_v33 = vpop.f32.mrf.mxu1 }
 0x236   : > { %v9950_v8 = vadd.f32 %v2740_v33, %v2667_v31  ;;  %v2669_v7 = vpop.f32.mrf.mxu0  ;;  %v9976_v31 = vld [vmem:[#allocation10 + $0x2] sm:$0x3]  ;;  %v9980_v33 = vrot.slane %v9970_v10, %v9771_v1 }
 0x237   : > { %v2742_v57 = vpop.f32.mrf.mxu1 }
 0x238   : > { %v9952_v48 = vadd.f32 %v2742_v57, %v2669_v7  ;;  %v2671_v26 = vpop.f32.mrf.mxu0  ;;  %v8889_v7 = vld [vmem:[#allocation12 + $0xe8] sm:$0xff]  }
 0x239   : > { %v2744_v35 = vpop.f32.mrf.mxu1  ;;  %8207 = vmatprep.subr.bf16.mxu1 %v8889_v7 }
 0x23a   : > { %v9954_v17 = vadd.f32 %v2744_v35, %v2671_v26  ;;  %v9956_v29 = vpop.f32.mrf.mxu0  ;;  %v8890_v35 = vld [vmem:[#allocation12 + $0x118] sm:$0xff]   ;;  %8208 = vmatpush3.bf16.msra.mxu1 %v8889_v7 }
 0x23b   : > { %v9958_v32 = vpop.f32.mrf.mxu1  ;;  %8235 = vmatprep.subr.bf16.mxu0 %v8890_v35  ;;  %8209 = vmatprep.subr.bf16.mxu1 %v8891_v52 }
 0x23c   : > { %v2677_v22 = vpop.f32.mrf.mxu0  ;;  %8236 = vmatpush3.bf16.msra.mxu0 %v8890_v35 }
 0x23d   : > { %v2750_v23 = vpop.f32.mrf.mxu1  ;;  %8237 = vmatprep.subr.bf16.mxu0 %v8892_v59 }
 0x23e   : > { %v9960_v36 = vadd.f32 %v2750_v23, %v2677_v22  ;;  %v2679_v46 = vpop.f32.mrf.mxu0  ;;  %8210 = vmatpush3.bf16.msra.mxu1 %v8891_v52  ;;  %v8895_v52 = vld [vmem:[#allocation12 + $0xd0] sm:$0xff]  }
 0x23f   : > { %v2752_v40 = vpop.f32.mrf.mxu1 }
 0x240   : > { %v9962_v42 = vadd.f32 %v2752_v40, %v2679_v46  ;;  %v2681_v45 = vpop.f32.mrf.mxu0  ;;  %8238 = vmatpush3.bf16.msra.mxu0 %v8892_v59 }
 0x241   : > { %v2754_v14 = vpop.f32.mrf.mxu1 }
 0x242   : > { %v9964_v60 = vadd.f32 %v2754_v14, %v2681_v45  ;;  %v9966_v38 = vpop.f32.mrf.mxu0 }
 0x243   : > { %v9968_v24 = vpop.f32.mrf.mxu1 }
 0x264   : > { %v2793_v28 = vpop.f32.mrf.mxu0 }
 0x265   : > { %v2866_v39 = vpop.f32.mrf.mxu1  ;;  %v2794_v53 = vadd.f32 %v2793_v28, %v9919_v63  ;;  %v2727_v63 = vadd.f32 %v9931_v50, %v9929_v51 }
 0x266   : > { %v2795_v62 = vpop.f32.mrf.mxu0 }
 0x267   : > { %v2868_v2 = vpop.f32.mrf.mxu1  ;;  %v2796_v12 = vadd.f32 %v2795_v62, %v9925_v21  ;;  %v9974_v3 = vadd.f32 %v2866_v39, %v2794_v53  ;;  %v9987_v21 = vrot.slane %v9976_v31, %v9771_v1 }
 0x268   : > { %v2797_v57 = vpop.f32.mrf.mxu0 }
 0x269   : > { %v2870_v26 = vpop.f32.mrf.mxu1  ;;  %v2798_v22 = vadd.f32 %v2797_v57, %v9927_v44  ;;  %v2869_v23 = vadd.f32 %v2868_v2, %v2796_v12  ;;  %v8893_v57 = vld [vmem:[#allocation12 + $0xd8] sm:$0xff]  }
 0x26a   : > { %v2799_v46 = vpop.f32.mrf.mxu0  ;;  %8211 = vmatprep.subr.bf16.mxu1 %v8893_v57 }
 0x26b   : > { %v2872_v40 = vpop.f32.mrf.mxu1  ;;  %v2918_v45 = vmul.f32 %v9980_v33, %v2869_v23  ;;  %v2800_v14 = vadd.f32 %v2799_v46, %v2727_v63  ;;  %v9990_v56 = vadd.f32 %v2870_v26, %v2798_v22  ;;  %v8894_v63 = vld [vmem:[#allocation12 + $0x108] sm:$0xff]   ;;  %8212 = vmatpush3.bf16.msra.mxu1 %v8893_v57 }
 0x26c   : > { %v2803_v51 = vpop.f32.mrf.mxu0  ;;  %8239 = vmatprep.subr.bf16.mxu0 %v8894_v63  ;;  %8213 = vmatprep.subr.bf16.mxu1 %v8895_v52 }
 0x26d   : > { %v2876_v50 = vpop.f32.mrf.mxu1  ;;  %v2873_v44 = vadd.f32 %v2872_v40, %v2800_v14  ;;  %v2946_v15 = vadd.f32 %v9987_v21, %v2918_v45  ;;  %v2804_v37 = vadd.f32 %v2803_v51, %v9938_v61  ;;  %8240 = vmatpush3.bf16.msra.mxu0 %v8894_v63 }
 0x26e   : > { %v2805_v28 = vpop.f32.mrf.mxu0 }
 0x26f   : > { %v2878_v39 = vpop.f32.mrf.mxu1  ;;  %v2920_v53 = vmul.f32 %v9980_v33, %v2873_v44  ;;  %v2806_v62 = vadd.f32 %v2805_v28, %v9942_v49  ;;  %v9998_v2 = vadd.f32 %v2876_v50, %v2804_v37  ;;  %v2962_v22 = vmax.f32 %v2946_v15, 0.0  ;;  %v8896_v44 = vld [vmem:[#allocation12 + $0x100] sm:$0xff]   ;;  %8214 = vmatpush3.bf16.msra.mxu1 %v8895_v52 }
 0x270   : > { %v2807_v12 = vpop.f32.mrf.mxu0  ;;  %v2747_v28 = vadd.f32 %v9958_v32, %v9956_v29  ;;  %8241 = vmatprep.subr.bf16.mxu0 %v8896_v44 }
 0x271   : > { %v2880_v7 = vpop.f32.mrf.mxu1  ;;  %v2948_v26 = vadd.f32 %v9987_v21, %v2920_v53  ;;  %v2808_v61 = vadd.f32 %v2807_v12, %v9944_v13  ;;  %v2879_v35 = vadd.f32 %v2878_v39, %v2806_v62  ;;  %8242 = vmatpush3.bf16.msra.mxu0 %v8896_v44 }
 0x272   : > { %v2809_v23 = vpop.f32.mrf.mxu0 }
 0x273   : > { %v2882_v54 = vpop.f32.mrf.mxu1  ;;  %v2964_v9 = vmax.f32 %v2948_v26, 0.0  ;;  %v2922_v49 = vmul.f32 %v9980_v33, %v2879_v35  ;;  %v2810_v46 = vadd.f32 %v2809_v23, %v2737_v11  ;;  %v10003_v40 = vadd.f32 %v2880_v7, %v2808_v61 }
 0x274   : > { %v2813_v45 = vpop.f32.mrf.mxu0 }
 0x275   : > { %v2886_v14 = vpop.f32.mrf.mxu1  ;;  %v10005_v51 = vpack.c.bf16 %v2964_v9, %v2962_v22  ;;  %v2950_v13 = vadd.f32 %v9987_v21, %v2922_v49  ;;  %v2814_v50 = vadd.f32 %v2813_v45, %v9950_v8  ;;  %v2883_v59 = vadd.f32 %v2882_v54, %v2810_v46  ;;  %v8897_v8 = vld [vmem:[#allocation12 + $0xc8] sm:$0xff]   ;;  %v8898_v9 = vld [vmem:[#allocation12 + $0xc0] sm:$0xff]  }
 0x276   : > { %v2815_v15 = vpop.f32.mrf.mxu0  ;;  %8215 = vmatprep.subr.bf16.mxu1 %v8897_v8 }
 0x277   : > { %v2888_v37 = vpop.f32.mrf.mxu1  ;;  %v2816_v39 = vadd.f32 %v2815_v15, %v9952_v48  ;;  %v10012_v11 = vadd.f32 %v2886_v14, %v2814_v50  ;;  %v2924_v53 = vmul.f32 %v9980_v33, %v2883_v59  ;;  %v2966_v26 = vmax.f32 %v2950_v13, 0.0  ;;  %8216 = vmatpush3.bf16.msra.mxu1 %v8897_v8 }
 0x278   : > { %v2817_v62 = vpop.f32.mrf.mxu0  ;;  %8217 = vmatprep.subr.bf16.mxu1 %v8898_v9  ;;  %v2757_v13 = vadd.f32 %v9968_v24, %v9966_v38 }
 0x279   : > { %v2890_v12 = vpop.f32.mrf.mxu1  ;;  %v2818_v7 = vadd.f32 %v2817_v62, %v9954_v17  ;;  %v2889_v57 = vadd.f32 %v2888_v37, %v2816_v39  ;;  %v2952_v61 = vadd.f32 %v9987_v21, %v2924_v53 }
 0x27a   : > { %v2819_v35 = vpop.f32.mrf.mxu0 }
 0x27b   : > { %v2892_v29 = vpop.f32.mrf.mxu1  ;;  %v2926_v48 = vmul.f32 %v9980_v33, %v2889_v57  ;;  %v2820_v32 = vadd.f32 %v2819_v35, %v2747_v28  ;;  %v10018_v63 = vadd.f32 %v2890_v12, %v2818_v7  ;;  %v2968_v22 = vmax.f32 %v2952_v61, 0.0  ;;  %8218 = vmatpush3.bf16.msra.mxu1 %v8898_v9  ;;  %v10030_v28 = vld [vmem:[#allocation12 + $0x178] sm:$0xff]  }
 0x27c   : > { %v2823_v23 = vpop.f32.mrf.mxu0  ;;  %8251 = vmatprep.subr.bf16.mxu1 %v10030_v28 }
 0x27d   : > { %v2896_v54 = vpop.f32.mrf.mxu1  ;;  %v2954_v49 = vadd.f32 %v9987_v21, %v2926_v48  ;;  %v2824_v17 = vadd.f32 %v2823_v23, %v9960_v36  ;;  %v10022_v46 = vpack.c.bf16 %v2968_v22, %v2966_v26  ;;  %v2893_v45 = vadd.f32 %v2892_v29, %v2820_v32 }
 0x27e   : > { %v2825_v14 = vpop.f32.mrf.mxu0 }
 0x27f   : > { %v2898_v52 = vpop.f32.mrf.mxu1  ;;  %v2826_v50 = vadd.f32 %v2825_v14, %v9962_v42  ;;  %v10027_v44 = vadd.f32 %v2896_v54, %v2824_v17  ;;  %v2928_v59 = vmul.f32 %v9980_v33, %v2893_v45  ;;  %v2970_v53 = vmax.f32 %v2954_v49, 0.0 }
 0x280   : > { %v2827_v15 = vpop.f32.mrf.mxu0 }
 0x281   : > { %v2900_v37 = vpop.f32.mrf.mxu1  ;;  %v2828_v36 = vadd.f32 %v2827_v15, %v9964_v60  ;;  %v2899_v39 = vadd.f32 %v2898_v52, %v2826_v50  ;;  %v2956_v62 = vadd.f32 %v9987_v21, %v2928_v59 }
 0x282   : > { %v2829_v12 = vpop.f32.mrf.mxu0 }
 0x283   : > { %v2902_v8 = vpop.f32.mrf.mxu1  ;;  %v2930_v42 = vmul.f32 %v9980_v33, %v2899_v39  ;;  %v2830_v38 = vadd.f32 %v2829_v12, %v2757_v13  ;;  %v10036_v24 = vadd.f32 %v2900_v37, %v2828_v36  ;;  %v2972_v7 = vmax.f32 %v2956_v62, 0.0  ;;  %v7655_v36 = vld [vmem:[#allocation13] ss:$0 sm:$0xff] }
 0x285   : > { %v2958_v57 = vadd.f32 %v9987_v21, %v2930_v42  ;;  %v2903_v26 = vadd.f32 %v2902_v8, %v2830_v38  ;;  %v10039_v61 = vpack.c.bf16 %v2972_v7, %v2970_v53  ;;  %v10045_v53 = vld [vmem:[#allocation15] ss:$0 sm:$0xff] }
 0x287   : > { %v2932_v60 = vmul.f32 %v9980_v33, %v2903_v26  ;;  %v2974_v35 = vmax.f32 %v2958_v57, 0.0 }
 0x289   : > { %v2960_v29 = vadd.f32 %v9987_v21, %v2932_v60 }
 0x28b   : > { %v2976_v48 = vmax.f32 %v2960_v29, 0.0  ;;  %v1818_v29 = vmax.f32 %v9816_v19, 0.0 }
 0x28d   : > { %v10043_v32 = vpack.c.bf16 %v2976_v48, %v2974_v35 }
 0x2bd   : > { %v8173_v49 = vpop.f32.mrf.mxu1 }
 0x2bf   : > { %v3281_v45 = vpop.f32.mrf.mxu1 }
 0x2c1   : > { %v8174_v52 = vpop.f32.mrf.mxu1 }
 0x2c3   : > { %v3284_v50 = vpop.f32.mrf.mxu1 }
 0x2c6   : > { %v8149_v22 = vpop.f32.mrf.mxu0 }
 0x2c7   : > { %v3290_v15 = vadd.f32 %v8173_v49, %v8149_v22 }
 0x2c8   : > { %v3168_v23 = vpop.f32.mrf.mxu0 }
 0x2c9   : > { %v3282_v21 = vadd.f32 %v3281_v45, %v3168_v23 }
 0x2ca   : > { %v8150_v54 = vpop.f32.mrf.mxu0 }
 0x2cb   : > { %v3293_v12 = vadd.f32 %v8174_v52, %v8150_v54  ;;  %v1814_v54 = vmax.f32 %v9796_v20, 0.0 }
 0x2cc   : > { %v3171_v9 = vpop.f32.mrf.mxu0 }
 0x2cd   : > { %v8177_v33 = vpop.f32.mrf.mxu1  ;;  %v3285_v57 = vadd.f32 %v3284_v50, %v3171_v9 }
 0x2cf   : > { %v3297_v8 = vpop.f32.mrf.mxu1 }
 0x2d1   : > { %v8178_v22 = vpop.f32.mrf.mxu1 }
 0x2d5   : > { %v8153_v17 = vpop.f32.mrf.mxu0 }
 0x2d6   : > { %v3306_v52 = vadd.f32 %v8177_v33, %v8153_v17 }
 0x2d7   : > { %v3184_v14 = vpop.f32.mrf.mxu0 }
 0x2d9   : > { %v8154_v13 = vpop.f32.mrf.mxu0 }
 0x2da   : > { %v3309_v20 = vadd.f32 %v8178_v22, %v8154_v13  ;;  %v1826_v22 = vmax.f32 %v9872_v41, 0.0  ;;  %v1824_v41 = vmax.f32 %v9861_v25, 0.0  ;;  %v8900_v25 = vld [vmem:[#allocation12 + $0x170] sm:$0xff]  }
 0x2db   : > { %v3187_v59 = vpop.f32.mrf.mxu0 }
 0x2e6   : > { %v8197_v37 = vpop.f32.mrf.mxu0 }
 0x2e7   : > { %v3444_v39 = vadd.f32 %v8197_v37, %v3290_v15  ;;  %v3298_v37 = vadd.f32 %v3297_v8, %v3184_v14 }
 0x2e8   : > { %v3411_v62 = vpop.f32.mrf.mxu0 }
 0x2e9   : > { %v3459_v42 = vmul.f32 %v7655_v36, %v3444_v39  ;;  %v3442_v38 = vadd.f32 %v3411_v62, %v3282_v21 }
 0x2ea   : > { %v8198_v7 = vpop.f32.mrf.mxu0 }
 0x2eb   : > { %v3474_v26 = vadd.f32 %v10045_v53, %v3459_v42  ;;  %v3457_v60 = vmul.f32 %v7655_v36, %v3442_v38  ;;  %v3445_v35 = vadd.f32 %v8198_v7, %v3293_v12  ;;  %v1820_v12 = vmax.f32 %v9832_v43, 0.0  ;;  %v3300_v38 = vpop.f32.mrf.mxu1 }
 0x2ec   : > { %v3414_v48 = vpop.f32.mrf.mxu0  ;;  %v3301_v17 = vadd.f32 %v3300_v38, %v3187_v59  ;;  %v1816_v43 = vmax.f32 %v9807_v5, 0.0  ;;  %v1828_v38 = vmax.f32 %v9882_v18, 0.0 }
 0x2ed   : > { %v3482_v49 = vmax.f32 %v3474_v26, 0.0  ;;  %v3472_v23 = vadd.f32 %v10045_v53, %v3457_v60  ;;  %v3460_v45 = vmul.f32 %v7655_v36, %v3445_v35  ;;  %v3443_v15 = vadd.f32 %v3414_v48, %v3285_v57 }
 0x2ee   : > { %v8201_v21 = vpop.f32.mrf.mxu0 }
 0x2ef   : > { %v3506_v39 = vadd.f32 %v3482_v49, %v1818_v29  ;;  %v3480_v9 = vmax.f32 %v3472_v23, 0.0  ;;  %v3475_v50 = vadd.f32 %v10045_v53, %v3460_v45  ;;  %v3458_v62 = vmul.f32 %v7655_v36, %v3443_v15 }
 0x2f0   : > { %v3448_v19 = vadd.f32 %v8201_v21, %v3306_v52  ;;  %v3427_v42 = vpop.f32.mrf.mxu0 }
 0x2f1   : > { %3514 = vst [vmem:[#allocation2 + $0x11] sm:$0xff] %v3506_v39  ;;  %v3483_v7 = vmax.f32 %v3475_v50, 0.0  ;;  %v3473_v26 = vadd.f32 %v10045_v53, %v3458_v62  ;;  %v3446_v57 = vadd.f32 %v3427_v42, %v3298_v37  ;;  %v3504_v60 = vadd.f32 %v3480_v9, %v1814_v54 }
 0x2f2   : > { %v3463_v14 = vmul.f32 %v7655_v36, %v3448_v19  ;;  %v8202_v33 = vpop.f32.mrf.mxu0  ;;  %v1822_v50 = vmax.f32 %v9847_v4, 0.0 }
 0x2f3   : > { %v3507_v8 = vadd.f32 %v3483_v7, %v1820_v12  ;;  %v10054_v35 = vpack.c.bf16 %v3483_v7, %v3482_v49  ;;  %v3481_v29 = vmax.f32 %v3473_v26, 0.0  ;;  %v3461_v48 = vmul.f32 %v7655_v36, %v3446_v57  ;;  %3512 = vst [vmem:[#allocation2 + $0x1] sm:$0xff] %v3504_v60 }
 0x2f4   : > { %v3478_v23 = vadd.f32 %v10045_v53, %v3463_v14  ;;  %v3449_v45 = vadd.f32 %v8202_v33, %v3309_v20  ;;  %v3430_v15 = vpop.f32.mrf.mxu0 }
 0x2f5   : > { %3515 = vst [vmem:[#allocation2 + $0x19] sm:$0xff] %v3507_v8  ;;  %v3521_v52 = vpack.c.bf16 %v3507_v8, %v3506_v39  ;;  %v10058_v37 = vpack.c.bf16 %v3481_v29, %v3480_v9  ;;  %v3476_v13 = vadd.f32 %v10045_v53, %v3461_v48  ;;  %v3447_v59 = vadd.f32 %v3430_v15, %v3301_v17 }
 0x2f6   : > { %v3486_v49 = vmax.f32 %v3478_v23, 0.0  ;;  %v3464_v54 = vmul.f32 %v7655_v36, %v3449_v45  ;;  %v3505_v21 = vadd.f32 %v3481_v29, %v1816_v43  ;;  %v8901_v43 = vld [vmem:[#allocation12 + $0x168] sm:$0xff]  }
 0x2f7   : > { %v3484_v62 = vmax.f32 %v3476_v13, 0.0  ;;  %v3462_v5 = vmul.f32 %v7655_v36, %v3447_v59 }
 0x2f8   : > { %v3479_v12 = vadd.f32 %v10045_v53, %v3464_v54  ;;  %3513 = vst [vmem:[#allocation2 + $0x9] sm:$0xff] %v3505_v21  ;;  %v3520_v19 = vpack.c.bf16 %v3505_v21, %v3504_v60  ;;  %v3510_v42 = vadd.f32 %v3486_v49, %v1826_v22  ;;  %v8904_v21 = vld [vmem:[#allocation12 + $0x150] sm:$0xff]  }
 0x2f9   : > { %v3477_v39 = vadd.f32 %v10045_v53, %v3462_v5  ;;  %v3508_v9 = vadd.f32 %v3484_v62, %v1822_v50  ;;  %v8905_v50 = vld [vmem:[#allocation12 + $0x148] sm:$0xff]  }
 0x2fa   : > { %v3487_v7 = vmax.f32 %v3479_v12, 0.0  ;;  %8243 = vmatprep.mubr.bf16.mxu0 %v3520_v19  ;;  %3518 = vst [vmem:[#allocation2 + $0x31] sm:$0xff] %v3510_v42  ;;  %v3524_v20 = vld [vmem:[#allocation2] sm:$0xff] }
 0x2fb   : > { %v3485_v26 = vmax.f32 %v3477_v39, 0.0  ;;  %8244 = vmatmul.mubr.bf16.vlgmr.msra.gmra.mxu0 %v3521_v52  ;;  %3516 = vst [vmem:[#allocation2 + $0x21] sm:$0xff] %v3508_v9 }
 0x2fc   : > { %v10067_v4 = vpack.c.bf16 %v3487_v7, %v3486_v49  ;;  %v3511_v36 = vadd.f32 %v3487_v7, %v1828_v38  ;;  %v3527_v33 = vld [vmem:[#allocation2 + $0x18] sm:$0xff]  ;;  %v8902_v49 = vld [vmem:[#allocation12 + $0x160] sm:$0xff]  }
 0x2fd   : > { %v10069_v57 = vpack.c.bf16 %v3485_v26, %v3484_v62  ;;  %v3509_v60 = vadd.f32 %v3485_v26, %v1824_v41  ;;  %v8906_v62 = vld [vmem:[#allocation12 + $0x140] sm:$0xff]   ;;  %v8907_v26 = vld [vmem:[#allocation12 + $0x1f8] sm:$0xff]  }
 0x2fe   : > { %3519 = vst [vmem:[#allocation2 + $0x39] sm:$0xff] %v3511_v36  ;;  %v3523_v53 = vpack.c.bf16 %v3511_v36, %v3510_v42  ;;  %v3546_v42 = vld [vmem:[#allocation2 + $0x12] sm:$0xff]  ;;  %v8908_v36 = vld [vmem:[#allocation12 + $0x1f0] sm:$0xff]  }
 0x2ff   : > { %v3525_v17 = vld [vmem:[#allocation2 + $0x8] sm:$0xff]  ;;  %3517 = vst [vmem:[#allocation2 + $0x29] sm:$0xff] %v3509_v60  ;;  %v3522_v18 = vpack.c.bf16 %v3509_v60, %v3508_v9  ;;  %v3526_v14 = vld [vmem:[#allocation2 + $0x10] sm:$0xff] }
 0x300   : > { %v7666_v8 = vpack.c.bf16 %v3525_v17, %v3524_v20  ;;  %v7669_v29 = vpack.c.bf16 %v3527_v33, %v3526_v14  ;;  %v3544_v59 = vld [vmem:[#allocation2 + $0x2] sm:$0xff]  ;;  %v3545_v22 = vld [vmem:[#allocation2 + $0xa] sm:$0xff] }
 0x301   : > { %8247 = vmatprep.mubr.bf16.mxu0 %v3522_v18  ;;  %v7694_v54 = vpack.c.bf16 %v3545_v22, %v3544_v59  ;;  %v8909_v60 = vld [vmem:[#allocation12 + $0x1b8] sm:$0xff]   ;;  %v8911_v20 = vld [vmem:[#allocation12 + $0x1b0] sm:$0xff]   ;;  %v8912_v17 = vld [vmem:[#allocation12 + $0x1e0] sm:$0xff]  }
 0x302   : > { %8219 = vmatprep.mubr.msk.bf16.mxu1 %vm9841_vm2, %v7666_v8  ;;  %v3528_v48 = vld [vmem:[#allocation2 + $0x20] sm:$0xff]  ;;  %8275 = vmatprep.subr.bf16.mxu0 %v8909_v60  ;;  %v8913_v18 = vld [vmem:[#allocation12 + $0x1a8] sm:$0xff]   ;;  %v8914_v14 = vld [vmem:[#allocation12 + $0x1d8] sm:$0xff]  }
 0x303   : > { %8220 = vmatmul.mubr.msk.bf16.vlgmr.msra.gmra.mxu1 %vm9867_vm4, %v7669_v29  ;;  %8248 = vmatmul.mubr.bf16.gmra.mxu0 %v3523_v53  ;;  %v3547_v5 = vld [vmem:[#allocation2 + $0x1a] sm:$0xff]  ;;  %v8915_v33 = vld [vmem:[#allocation12 + $0x1a0] sm:$0xff]   ;;  %v8917_v29 = vld [vmem:[#allocation12 + $0x198] sm:$0xff]  }
 0x304   : > { %8252 = vmatpush3.bf16.msra.mxu1 %v10030_v28  ;;  %v8903_v28 = vld [vmem:[#allocation12 + $0x158] sm:$0xff]   ;;  %v7697_v39 = vpack.c.bf16 %v3547_v5, %v3546_v42  ;;  %8276 = vmatpush3.bf16.msra.mxu0 %v8909_v60  ;;  %v8910_v53 = vld [vmem:[#allocation12 + $0x1e8] sm:$0xff]   ;;  %v8916_v8 = vld [vmem:[#allocation12 + $0x1d0] sm:$0xff]   ;;  %v2910_v42 = vrot.slane %v9970_v10, %v9762_v55 }
 0x305   : > { %8253 = vmatprep.subr.bf16.mxu1 %v8900_v25  ;;  %v3531_v15 = vld [vmem:[#allocation2 + $0x38] sm:$0xff]  ;;  %8277 = vmatprep.subr.bf16.mxu0 %v8911_v20  ;;  %v8922_v59 = vld [vmem:[#allocation12 + $0x180] sm:$0xff]   ;;  %v10096_v22 = vld [vmem:[#allocation12 + $0x238] sm:$0xff]  }
 0x306   : > { %v3529_v23 = vld [vmem:[#allocation2 + $0x28] sm:$0xff]  ;;  %v3530_v45 = vld [vmem:[#allocation2 + $0x30] sm:$0xff]  ;;  %v3551_v7 = vld [vmem:[#allocation2 + $0x3a] sm:$0xff] }
 0x307   : > { %v7672_v52 = vpack.c.bf16 %v3529_v23, %v3528_v48  ;;  %v7675_v13 = vpack.c.bf16 %v3531_v15, %v3530_v45  ;;  %v3548_v12 = vld [vmem:[#allocation2 + $0x22] sm:$0xff]  ;;  %v3549_v19 = vld [vmem:[#allocation2 + $0x2a] sm:$0xff]  ;;  %v3550_v38 = vld [vmem:[#allocation2 + $0x32] sm:$0xff] }
 0x308   : > { %8254 = vmatpush3.bf16.msra.mxu1 %v8900_v25  ;;  %v7700_v9 = vpack.c.bf16 %v3549_v19, %v3548_v12  ;;  %v7703_v41 = vpack.c.bf16 %v3551_v7, %v3550_v38  ;;  %8278 = vmatpush3.bf16.msra.mxu0 %v8911_v20  ;;  %v8918_v25 = vld [vmem:[#allocation12 + $0x1c8] sm:$0xff]   ;;  %v8919_v48 = vld [vmem:[#allocation12 + $0x190] sm:$0xff]   ;;  %v2917_v38 = vmul.f32 %v2910_v42, %v9974_v3 }
 0x309   : > { %8223 = vmatprep.mubr.msk.bf16.mxu1 %vm9886_vm6, %v7672_v52  ;;  %8255 = vmatprep.subr.bf16.mxu1 %v8901_v43  ;;  %v10088_v23 = vld [vmem:[#allocation16 + $0x1c0] sm:$0xff]  ;;  %v10104_v7 = vrot.slane %v9976_v31, %v9762_v55  ;;  %v2923_v20 = vmul.f32 %v2910_v42, %v10003_v40 }
 0x30a   : > { %8279 = vmatprep.subr.bf16.mxu0 %v8913_v18  ;;  %v10090_v45 = vld [vmem:[#allocation16 + $0x1e0] sm:$0xff] }
 0x30b   : > { %8224 = vmatmul.mubr.msk.bf16.gmra.mxu1 %vm9893_vm9, %v7675_v13  ;;  %v8921_v15 = vld [vmem:[#allocation12 + $0x188] sm:$0xff]   ;;  %v7772_v52 = vcombine.high %v10088_v23, %v10090_v45  ;;  %v7771_v13 = vcombine.low %v10088_v23, %v10090_v45  ;;  %v2951_v40 = vadd.f32 %v10104_v7, %v2923_v20 }
 0x30c   : > { %8256 = vmatpush3.bf16.msra.mxu1 %v8901_v43  ;;  %8267 = vmatprep.mubr.msk.bf16.mxu1 %vm9898_vm10, %v7694_v54  ;;  %v8920_v43 = vld [vmem:[#allocation12 + $0x1c0] sm:$0xff]  }
 0x30d   : > { %8257 = vmatprep.subr.bf16.mxu1 %v8902_v49  ;;  %8280 = vmatpush3.bf16.msra.mxu0 %v8913_v18  ;;  %v2967_v20 = vmax.f32 %v2951_v40, 0.0  ;;  %v2931_v40 = vmul.f32 %v2910_v42, %v10036_v24 }
 0x30e   : > { %8281 = vmatprep.subr.bf16.mxu0 %v8915_v33 }
 0x310   : > { %8258 = vmatpush3.bf16.msra.mxu1 %v8902_v49 }
 0x311   : > { %8259 = vmatprep.subr.bf16.mxu1 %v8903_v28  ;;  %8282 = vmatpush3.bf16.msra.mxu0 %v8915_v33  ;;  %v10112_v33 = vld [vmem:[#allocation15 + $0x1] ss:$0 sm:$0xff] }
 0x312   : > { %8283 = vmatprep.subr.bf16.mxu0 %v8917_v29 }
 0x314   : > { %8260 = vmatpush3.bf16.msra.mxu1 %v8903_v28 }
 0x315   : > { %8261 = vmatprep.subr.bf16.mxu1 %v8904_v21  ;;  %8284 = vmatpush3.bf16.msra.mxu0 %v8917_v29 }
 0x316   : > { %8285 = vmatprep.subr.bf16.mxu0 %v8919_v48 }
 0x318   : > { %8262 = vmatpush3.bf16.msra.mxu1 %v8904_v21 }
 0x319   : > { %8263 = vmatprep.subr.bf16.mxu1 %v8905_v50  ;;  %8286 = vmatpush3.bf16.msra.mxu0 %v8919_v48  ;;  %v2919_v48 = vmul.f32 %v2910_v42, %v9990_v56 }
 0x31a   : > { %8287 = vmatprep.subr.bf16.mxu0 %v8921_v15 }
 0x31c   : > { %8264 = vmatpush3.bf16.msra.mxu1 %v8905_v50 }
 0x31d   : > { %8265 = vmatprep.subr.bf16.mxu1 %v8906_v62  ;;  %8288 = vmatpush3.bf16.msra.mxu0 %v8921_v15 }
 0x31e   : > { %8289 = vmatprep.subr.bf16.mxu0 %v8922_v59 }
 0x320   : > { %8266 = vmatpush3.bf16.msra.mxu1 %v8906_v62 }
 0x321   : > { %8299 = vmatprep.subr.bf16.mxu1 %v8907_v26  ;;  %8290 = vmatpush3.bf16.msra.mxu0 %v8922_v59 }
 0x322   : > { %8323 = vmatprep.subr.bf16.mxu0 %v10096_v22 }
 0x323   : > { %8268 = vmatmul.mubr.msk.bf16.vlgmr.msra.gmra.mxu1 %vm9910_vm13, %v7697_v39 }
 0x324   : > { %8271 = vmatprep.mubr.msk.bf16.mxu1 %vm9915_vm14, %v7700_v9  ;;  %8300 = vmatpush3.bf16.msra.mxu1 %v8907_v26 }
 0x325   : > { %8301 = vmatprep.subr.bf16.mxu1 %v8908_v36 }
 0x328   : > { %8302 = vmatpush3.bf16.msra.mxu1 %v8908_v36 }
 0x329   : > { %8303 = vmatprep.subr.bf16.mxu1 %v8910_v53 }
 0x32b   : > { %8272 = vmatmul.mubr.msk.bf16.gmra.mxu1 %vm9934_vm0, %v7703_v41  ;;  %v2921_v41 = vmul.f32 %v2910_v42, %v9998_v2 }
 0x32c   : > { %8304 = vmatpush3.bf16.msra.mxu1 %v8910_v53 }
 0x32d   : > { %8305 = vmatprep.subr.bf16.mxu1 %v8912_v17  ;;  %v2949_v3 = vadd.f32 %v10104_v7, %v2921_v41 }
 0x330   : > { %8306 = vmatpush3.bf16.msra.mxu1 %v8912_v17  ;;  %v10108_v17 = vld [vmem:[#allocation13 + $0x1] ss:$0 sm:$0xff] }
 0x331   : > { %8307 = vmatprep.subr.bf16.mxu1 %v8914_v14 }
 0x334   : > { %8308 = vmatpush3.bf16.msra.mxu1 %v8914_v14  ;;  %v2945_v14 = vadd.f32 %v10104_v7, %v2917_v38 }
 0x335   : > { %8309 = vmatprep.subr.bf16.mxu1 %v8916_v8 }
 0x338   : > { %8310 = vmatpush3.bf16.msra.mxu1 %v8916_v8 }
 0x339   : > { %8311 = vmatprep.subr.bf16.mxu1 %v8918_v25 }
 0x33c   : > { %8312 = vmatpush3.bf16.msra.mxu1 %v8918_v25 }
 0x33d   : > { %8313 = vmatprep.subr.bf16.mxu1 %v8920_v43 }
 0x340   : > { %8314 = vmatpush3.bf16.msra.mxu1 %v8920_v43 }
 0x341   : > { %4956 = vmatprep.subr.bf16.mxu1 %v7772_v52 }
 0x3bb   : > { %v8245_v50 = vpop.f32.mrf.mxu0 }
 0x3bd   : > { %v3793_v5 = vpop.f32.mrf.mxu0 }
 0x3bf   : > { %v8246_v19 = vpop.f32.mrf.mxu0 }
 0x3c1   : > { %v3796_v9 = vpop.f32.mrf.mxu0 }
 0x3c3   : > { %v8221_v49 = vpop.f32.mrf.mxu1  ;;  %v8249_v60 = vpop.f32.mrf.mxu0 }
 0x3c4   : > { %v3802_v36 = vadd.f32 %v8245_v50, %v8221_v49  ;;  %v2965_v50 = vmax.f32 %v2949_v3, 0.0 }
 0x3c5   : > { %v3680_v54 = vpop.f32.mrf.mxu1  ;;  %v3809_v8 = vpop.f32.mrf.mxu0 }
 0x3c6   : > { %v3794_v18 = vadd.f32 %v3793_v5, %v3680_v54  ;;  %v2961_v54 = vmax.f32 %v2945_v14, 0.0  ;;  %v2925_v5 = vmul.f32 %v2910_v42, %v10012_v11 }
 0x3c7   : > { %v8222_v28 = vpop.f32.mrf.mxu1  ;;  %v8250_v38 = vpop.f32.mrf.mxu0 }
 0x3c8   : > { %v3805_v29 = vadd.f32 %v8246_v19, %v8222_v28  ;;  %v2929_v28 = vmul.f32 %v2910_v42, %v10027_v44 }
 0x3c9   : > { %v3683_v21 = vpop.f32.mrf.mxu1 }
 0x3ca   : > { %v3797_v15 = vadd.f32 %v3796_v9, %v3683_v21  ;;  %v2947_v9 = vadd.f32 %v10104_v7, %v2919_v48  ;;  %v3812_v48 = vpop.f32.mrf.mxu0 }
 0x3cb   : > { %v8225_v62 = vpop.f32.mrf.mxu1 }
 0x3cd   : > { %v3696_v12 = vpop.f32.mrf.mxu1 }
 0x3cf   : > { %v8226_v39 = vpop.f32.mrf.mxu1 }
 0x3d1   : > { %v3699_v26 = vpop.f32.mrf.mxu1 }
 0x3e3   : > { %v8269_v53 = vpop.f32.mrf.mxu1 }
 0x3e4   : > { %v3956_v10 = vadd.f32 %v8269_v53, %v3802_v36  ;;  %v3818_v53 = vadd.f32 %v8249_v60, %v8225_v62 }
 0x3e5   : > { %v3923_v31 = vpop.f32.mrf.mxu1 }
 0x3e6   : > { %v3972_v2 = vmul.f32 %v10108_v17, %v3956_v10  ;;  %v3954_v25 = vadd.f32 %v3923_v31, %v3794_v18  ;;  %v3810_v18 = vadd.f32 %v3809_v8, %v3696_v12  ;;  %v2953_v31 = vadd.f32 %v10104_v7, %v2925_v5 }
 0x3e7   : > { %v8270_v43 = vpop.f32.mrf.mxu1 }
 0x3e8   : > { %v3988_v52 = vadd.f32 %v10112_v33, %v3972_v2  ;;  %v3970_v59 = vmul.f32 %v10108_v17, %v3954_v25  ;;  %v3957_v49 = vadd.f32 %v8270_v43, %v3805_v29  ;;  %v2927_v29 = vmul.f32 %v2910_v42, %v10018_v63 }
 0x3e9   : > { %v3926_v19 = vpop.f32.mrf.mxu1  ;;  %v2957_v2 = vadd.f32 %v10104_v7, %v2929_v28 }
 0x3ea   : > { %v3996_v41 = vmax.f32 %v3988_v52, 0.0  ;;  %v10122_v56 = vadd.f32 %v10112_v33, %v3970_v59  ;;  %v3973_v36 = vmul.f32 %v10108_v17, %v3957_v49  ;;  %v3955_v21 = vadd.f32 %v3926_v19, %v3797_v15 }
 0x3eb   : > { %v8273_v10 = vpop.f32.mrf.mxu1  ;;  %v3821_v15 = vadd.f32 %v8250_v38, %v8226_v39  ;;  %v3813_v52 = vadd.f32 %v3812_v48, %v3699_v26  ;;  %v2963_v19 = vmax.f32 %v2947_v9, 0.0  ;;  %v2959_v26 = vadd.f32 %v10104_v7, %v2931_v40  ;;  %v4585_v9 = vld [vmem:[#allocation16 + $0x1a0] sm:$0xff] }
 0x3ec   : > { %v4020_v14 = vadd.f32 %v3996_v41, %v2965_v50  ;;  %v3994_v11 = vmax.f32 %v10122_v56, 0.0  ;;  %v3989_v44 = vadd.f32 %v10112_v33, %v3973_v36  ;;  %v3971_v3 = vmul.f32 %v10108_v17, %v3955_v21 }
 0x3ed   : > { %v3960_v25 = vadd.f32 %v8273_v10, %v3818_v53  ;;  %v3939_v43 = vpop.f32.mrf.mxu1  ;;  %v2973_v53 = vmax.f32 %v2957_v2, 0.0  ;;  %v2969_v10 = vmax.f32 %v2953_v31, 0.0  ;;  %v2975_v40 = vmax.f32 %v2959_v26, 0.0 }
 0x3ee   : > { %4028 = vst [vmem:[#allocation2 + $0x11] sm:$0xff] %v4020_v14  ;;  %v3997_v62 = vmax.f32 %v3989_v44, 0.0  ;;  %v10133_v12 = vadd.f32 %v10112_v33, %v3971_v3  ;;  %v3958_v60 = vadd.f32 %v3939_v43, %v3810_v18  ;;  %v4018_v8 = vadd.f32 %v3994_v11, %v2961_v54  ;;  %v4584_v18 = vld [vmem:[#allocation16 + $0x180] sm:$0xff] }
 0x3ef   : > { %v3976_v63 = vmul.f32 %v10108_v17, %v3960_v25  ;;  %v8274_v59 = vpop.f32.mrf.mxu1  ;;  %v2955_v44 = vadd.f32 %v10104_v7, %v2927_v29  ;;  %v7769_v29 = vcombine.low %v4584_v18, %v4585_v9 }
 0x3f0   : > { %v4021_v49 = vadd.f32 %v3997_v62, %v2967_v20  ;;  %v10139_v50 = vpack.c.bf16 %v3997_v62, %v3996_v41  ;;  %v3995_v5 = vmax.f32 %v10133_v12, 0.0  ;;  %v3974_v28 = vmul.f32 %v10108_v17, %v3958_v60  ;;  %4026 = vst [vmem:[#allocation2 + $0x1] sm:$0xff] %v4018_v8 }
 0x3f1   : > { %v3992_v36 = vadd.f32 %v10112_v33, %v3976_v63  ;;  %v3961_v21 = vadd.f32 %v8274_v59, %v3821_v15  ;;  %v3942_v54 = vpop.f32.mrf.mxu1  ;;  %v7770_v62 = vcombine.high %v4584_v18, %v4585_v9  ;;  %v4583_v63 = vld [vmem:[#allocation16 + $0x160] sm:$0xff]  ;;  %v2971_v31 = vmax.f32 %v2955_v44, 0.0 }
 0x3f2   : > { %v4035_v24 = vpack.c.bf16 %v4021_v49, %v4020_v14  ;;  %4029 = vst [vmem:[#allocation2 + $0x19] sm:$0xff] %v4021_v49  ;;  %v3990_v42 = vadd.f32 %v10112_v33, %v3974_v28  ;;  %v3959_v39 = vadd.f32 %v3942_v54, %v3813_v52  ;;  %v4019_v20 = vadd.f32 %v3995_v5, %v2963_v19  ;;  %v4582_v52 = vld [vmem:[#allocation16 + $0x140] sm:$0xff] }
 0x3f3   : > { %v4000_v38 = vmax.f32 %v3992_v36, 0.0  ;;  %v3977_v41 = vmul.f32 %v10108_v17, %v3961_v21  ;;  %v7768_v49 = vcombine.high %v4582_v52, %v4583_v63  ;;  %v4580_v36 = vld [vmem:[#allocation16 + $0x100] sm:$0xff]  ;;  %v7767_v45 = vcombine.low %v4582_v52, %v4583_v63 }
 0x3f4   : > { %v3998_v3 = vmax.f32 %v3990_v42, 0.0  ;;  %v3975_v14 = vmul.f32 %v10108_v17, %v3959_v39  ;;  %v4034_v25 = vpack.c.bf16 %v4019_v20, %v4018_v8  ;;  %4027 = vst [vmem:[#allocation2 + $0x9] sm:$0xff] %v4019_v20  ;;  %v4581_v21 = vld [vmem:[#allocation16 + $0x120] sm:$0xff]  ;;  %v8924_v39 = vld [vmem:[#allocation12 + $0x230] sm:$0xff]  }
 0x3f5   : > { %v3993_v2 = vadd.f32 %v10112_v33, %v3977_v41  ;;  %v4024_v43 = vadd.f32 %v4000_v38, %v2973_v53  ;;  %v7766_v26 = vcombine.high %v4580_v36, %v4581_v21  ;;  %v4578_v41 = vld [vmem:[#allocation16 + $0xc0] sm:$0xff]  ;;  %v7765_v18 = vcombine.low %v4580_v36, %v4581_v21  ;;  %v8930_v21 = vld [vmem:[#allocation12 + $0x200] sm:$0xff]  }
 0x3f6   : > { %v3991_v48 = vadd.f32 %v10112_v33, %v3975_v14  ;;  %v4022_v60 = vadd.f32 %v3998_v3, %v2969_v10  ;;  %8315 = vmatprep.mubr.bf16.mxu1 %v4034_v25  ;;  %v4579_v20 = vld [vmem:[#allocation16 + $0xe0] sm:$0xff]  ;;  %v8926_v25 = vld [vmem:[#allocation12 + $0x220] sm:$0xff]  }
 0x3f7   : > { %v4001_v15 = vmax.f32 %v3993_v2, 0.0  ;;  %4032 = vst [vmem:[#allocation2 + $0x31] sm:$0xff] %v4024_v43  ;;  %8316 = vmatmul.mubr.bf16.vlgmr.msra.gmra.mxu1 %v4035_v24  ;;  %v4038_v28 = vld [vmem:[#allocation2] sm:$0xff]  ;;  %v8925_v9 = vld [vmem:[#allocation12 + $0x228] sm:$0xff]   ;;  %v7764_v12 = vcombine.high %v4578_v41, %v4579_v20  ;;  %v7763_v14 = vcombine.low %v4578_v41, %v4579_v20 }
 0x3f8   : > { %v3999_v7 = vmax.f32 %v3991_v48, 0.0  ;;  %4030 = vst [vmem:[#allocation2 + $0x21] sm:$0xff] %v4022_v60  ;;  %4957 = vmatpush1.bf16.msra.mxu1 %v7771_v13  ;;  %v4576_v44 = vld [vmem:[#allocation16 + $0x80] sm:$0xff] }
 0x3f9   : > { %v10153_v17 = vpack.c.bf16 %v4001_v15, %v4000_v38  ;;  %v4025_v33 = vadd.f32 %v4001_v15, %v2975_v40  ;;  %4958 = vmatprep.subr.bf16.mxu1 %v7770_v62  ;;  %v4041_v42 = vld [vmem:[#allocation2 + $0x18] sm:$0xff]  ;;  %v10166_v38 = vpack.c.bf16 %v3995_v5, %v3994_v11  ;;  %v8927_v15 = vld [vmem:[#allocation12 + $0x218] sm:$0xff]  }
 0x3fa   : > { %v10158_v8 = vpack.c.bf16 %v3999_v7, %v3998_v3  ;;  %v4023_v59 = vadd.f32 %v3999_v7, %v2971_v31  ;;  %v4577_v3 = vld [vmem:[#allocation16 + $0xa0] sm:$0xff] }
 0x3fb   : > { %v4037_v19 = vpack.c.bf16 %v4025_v33, %v4024_v43  ;;  %4033 = vst [vmem:[#allocation2 + $0x39] sm:$0xff] %v4025_v33  ;;  %v4039_v54 = vld [vmem:[#allocation2 + $0x8] sm:$0xff]  ;;  %v4040_v24 = vld [vmem:[#allocation2 + $0x10] sm:$0xff]  ;;  %v7762_v43 = vcombine.high %v4576_v44, %v4577_v3  ;;  %v4574_v48 = vld [vmem:[#allocation16 + $0x40] sm:$0xff]  ;;  %v7761_v40 = vcombine.low %v4576_v44, %v4577_v3 }
 0x3fc   : > { %v4036_v53 = vpack.c.bf16 %v4023_v59, %v4022_v60  ;;  %4031 = vst [vmem:[#allocation2 + $0x29] sm:$0xff] %v4023_v59  ;;  %4959 = vmatpush1.bf16.msra.mxu1 %v7769_v29  ;;  %v7716_v23 = vpack.c.bf16 %v4039_v54, %v4038_v28  ;;  %v7719_v13 = vpack.c.bf16 %v4041_v42, %v4040_v24  ;;  %v4059_v2 = vld [vmem:[#allocation2 + $0xa] sm:$0xff]  ;;  %v4575_v62 = vld [vmem:[#allocation16 + $0x60] sm:$0xff] }
 0x3fd   : > { %4960 = vmatprep.subr.bf16.mxu1 %v7768_v49  ;;  %v7760_v30 = vcombine.high %v4574_v48, %v4575_v62  ;;  %v4572_v52 = vld [vmem:[#allocation16] sm:$0xff]  ;;  %v7759_v31 = vcombine.low %v4574_v48, %v4575_v62 }
 0x3fe   : > { %8319 = vmatprep.mubr.bf16.mxu1 %v4036_v53  ;;  %8291 = vmatprep.mubr.msk.bf16.mxu0 %vm9841_vm2, %v7716_v23  ;;  %v4573_v63 = vld [vmem:[#allocation16 + $0x20] sm:$0xff] }
 0x3ff   : > { %8292 = vmatmul.mubr.msk.bf16.vlgmr.msra.gmra.mxu0 %vm9867_vm4, %v7719_v13  ;;  %8320 = vmatmul.mubr.bf16.gmra.mxu1 %v4037_v19  ;;  %v4042_v0 = vld [vmem:[#allocation2 + $0x20] sm:$0xff]  ;;  %v7758_v7 = vcombine.high %v4572_v52, %v4573_v63  ;;  %v4602_v29 = vld [vmem:[#allocation16 + $0x3c0] sm:$0xff]  ;;  %v7757_v59 = vcombine.low %v4572_v52, %v4573_v63 }
 0x400   : > { %8324 = vmatpush3.bf16.msra.mxu0 %v10096_v22  ;;  %4961 = vmatpush1.bf16.msra.mxu1 %v7767_v45  ;;  %v4058_v22 = vld [vmem:[#allocation2 + $0x2] sm:$0xff]  ;;  %v4603_v33 = vld [vmem:[#allocation16 + $0x3e0] sm:$0xff] }
 0x401   : > { %4988 = vmatprep.mubr.bf16.mxu1 %v10166_v38  ;;  %8325 = vmatprep.subr.bf16.mxu0 %v8924_v39  ;;  %v7744_v60 = vpack.c.bf16 %v4059_v2, %v4058_v22  ;;  %v7788_v49 = vcombine.high %v4602_v29, %v4603_v33  ;;  %v4600_v28 = vld [vmem:[#allocation16 + $0x380] sm:$0xff]  ;;  %v7787_v36 = vcombine.low %v4602_v29, %v4603_v33 }
 0x402   : > { %4962 = vmatprep.subr.bf16.mxu1 %v7766_v26  ;;  %v4045_v5 = vld [vmem:[#allocation2 + $0x38] sm:$0xff] }
 0x403   : > { %v4043_v56 = vld [vmem:[#allocation2 + $0x28] sm:$0xff]  ;;  %v4044_v11 = vld [vmem:[#allocation2 + $0x30] sm:$0xff]  ;;  %v4601_v19 = vld [vmem:[#allocation16 + $0x3a0] sm:$0xff] }
 0x404   : > { %v7722_v10 = vpack.c.bf16 %v4043_v56, %v4042_v0  ;;  %v7725_v34 = vpack.c.bf16 %v4045_v5, %v4044_v11  ;;  %8326 = vmatpush3.bf16.msra.mxu0 %v8924_v39  ;;  %4963 = vmatpush1.bf16.msra.mxu1 %v7765_v18  ;;  %v7786_v54 = vcombine.high %v4600_v28, %v4601_v19  ;;  %v4598_v53 = vld [vmem:[#allocation16 + $0x340] sm:$0xff]  ;;  %v4062_v26 = vld [vmem:[#allocation2 + $0x22] sm:$0xff]  ;;  %v4063_v41 = vld [vmem:[#allocation2 + $0x2a] sm:$0xff] }
 0x405   : > { %8327 = vmatprep.subr.bf16.mxu0 %v8925_v9  ;;  %4964 = vmatprep.subr.bf16.mxu1 %v7764_v12  ;;  %v4599_v24 = vld [vmem:[#allocation16 + $0x360] sm:$0xff]  ;;  %v7785_v42 = vcombine.low %v4600_v28, %v4601_v19  ;;  %v7750_v56 = vpack.c.bf16 %v4063_v41, %v4062_v26  ;;  %v5234_v28 = vld [vmem:[#allocation16 + $0x188] sm:$0xff] }
 0x406   : > { %8295 = vmatprep.mubr.msk.bf16.mxu0 %vm9886_vm6, %v7722_v10  ;;  %v7784_v23 = vcombine.high %v4598_v53, %v4599_v24  ;;  %v4061_v45 = vld [vmem:[#allocation2 + $0x1a] sm:$0xff]  ;;  %v4060_v20 = vld [vmem:[#allocation2 + $0x12] sm:$0xff]  ;;  %v7783_v18 = vcombine.low %v4598_v53, %v4599_v24 }
 0x407   : > { %8296 = vmatmul.mubr.msk.bf16.gmra.mxu0 %vm9893_vm9, %v7725_v34  ;;  %v4596_v13 = vld [vmem:[#allocation16 + $0x300] sm:$0xff]  ;;  %v7747_v0 = vpack.c.bf16 %v4061_v45, %v4060_v20  ;;  %v5235_v19 = vld [vmem:[#allocation16 + $0x1a8] sm:$0xff] }
 0x408   : > { %8328 = vmatpush3.bf16.msra.mxu0 %v8925_v9  ;;  %4965 = vmatpush1.bf16.msra.mxu1 %v7763_v14  ;;  %v4597_v39 = vld [vmem:[#allocation16 + $0x320] sm:$0xff]  ;;  %v7834_v53 = vcombine.high %v5234_v28, %v5235_v19  ;;  %v5233_v45 = vld [vmem:[#allocation16 + $0x168] sm:$0xff] }
 0x409   : > { %8339 = vmatprep.mubr.msk.bf16.mxu0 %vm9898_vm10, %v7744_v60  ;;  %8329 = vmatprep.subr.bf16.mxu0 %v8926_v25  ;;  %v7782_v9 = vcombine.high %v4596_v13, %v4597_v39  ;;  %v4594_v12 = vld [vmem:[#allocation16 + $0x2c0] sm:$0xff]  ;;  %v7781_v5 = vcombine.low %v4596_v13, %v4597_v39  ;;  %v7833_v13 = vcombine.low %v5234_v28, %v5235_v19 }
 0x40a   : > { %4966 = vmatprep.subr.bf16.mxu1 %v7762_v43  ;;  %v4595_v11 = vld [vmem:[#allocation16 + $0x2e0] sm:$0xff] }
 0x40b   : > { %v7780_v10 = vcombine.high %v4594_v12, %v4595_v11  ;;  %v4592_v34 = vld [vmem:[#allocation16 + $0x280] sm:$0xff]  ;;  %v7779_v22 = vcombine.low %v4594_v12, %v4595_v11 }
 0x40c   : > { %8330 = vmatpush3.bf16.msra.mxu0 %v8926_v25  ;;  %4967 = vmatpush1.bf16.msra.mxu1 %v7761_v40  ;;  %v4064_v44 = vld [vmem:[#allocation2 + $0x32] sm:$0xff]  ;;  %v4065_v3 = vld [vmem:[#allocation2 + $0x3a] sm:$0xff] }
 0x40d   : > { %8331 = vmatprep.subr.bf16.mxu0 %v8927_v15  ;;  %4968 = vmatprep.subr.bf16.mxu1 %v7760_v30  ;;  %v4593_v14 = vld [vmem:[#allocation16 + $0x2a0] sm:$0xff]  ;;  %v7753_v2 = vpack.c.bf16 %v4065_v3, %v4064_v44  ;;  %v5228_v44 = vld [vmem:[#allocation16 + $0xc8] sm:$0xff] }
 0x40e   : > { %v7778_v25 = vcombine.high %v4592_v34, %v4593_v14  ;;  %v4590_v43 = vld [vmem:[#allocation16 + $0x240] sm:$0xff]  ;;  %v7777_v27 = vcombine.low %v4592_v34, %v4593_v14  ;;  %v5229_v3 = vld [vmem:[#allocation16 + $0xe8] sm:$0xff] }
 0x40f   : > { %v4591_v48 = vld [vmem:[#allocation16 + $0x260] sm:$0xff] }
 0x410   : > { %8332 = vmatpush3.bf16.msra.mxu0 %v8927_v15  ;;  %4969 = vmatpush1.bf16.msra.mxu1 %v7759_v31  ;;  %v7776_v58 = vcombine.high %v4590_v43, %v4591_v48  ;;  %v4588_v62 = vld [vmem:[#allocation16 + $0x200] sm:$0xff]  ;;  %v7775_v40 = vcombine.low %v4590_v43, %v4591_v48  ;;  %v5226_v48 = vld [vmem:[#allocation16 + $0x88] sm:$0xff] }
 0x411   : > { %8333 = vmatprep.subr.bf16.mxu0 %v8928_v6  ;;  %4970 = vmatprep.subr.bf16.mxu1 %v7758_v7  ;;  %v4589_v60 = vld [vmem:[#allocation16 + $0x220] sm:$0xff]  ;;  %v5237_v7 = vld [vmem:[#allocation16 + $0x1e8] sm:$0xff] }
 0x412   : > { %v4618_v15 = vld [vmem:[#allocation16 + $0x5c0] sm:$0xff]  ;;  %v7774_v52 = vcombine.high %v4588_v62, %v4589_v60  ;;  %v7773_v16 = vcombine.low %v4588_v62, %v4589_v60  ;;  %v7827_v62 = vcombine.low %v5228_v44, %v5229_v3 }
 0x413   : > { %v4619_v30 = vld [vmem:[#allocation16 + $0x5e0] sm:$0xff] }
 0x414   : > { %8334 = vmatpush3.bf16.msra.mxu0 %v8928_v6  ;;  %4971 = vmatpush1.bf16.msra.mxu1 %v7757_v59  ;;  %v7803_v63 = vcombine.low %v4618_v15, %v4619_v30  ;;  %v7804_v31 = vcombine.high %v4618_v15, %v4619_v30  ;;  %v5236_v6 = vld [vmem:[#allocation16 + $0x1c8] sm:$0xff]  ;;  %v4616_v29 = vld [vmem:[#allocation16 + $0x580] sm:$0xff] }
 0x415   : > { %8335 = vmatprep.subr.bf16.mxu0 %v8929_v47  ;;  %4972 = vmatprep.subr.bf16.mxu1 %v7788_v49  ;;  %v4617_v33 = vld [vmem:[#allocation16 + $0x5a0] sm:$0xff]  ;;  %v7836_v59 = vcombine.high %v5236_v6, %v5237_v7 }
 0x416   : > { %v7802_v49 = vcombine.high %v4616_v29, %v4617_v33  ;;  %v4612_v39 = vld [vmem:[#allocation16 + $0x500] sm:$0xff] }
 0x417   : > { %v4613_v26 = vld [vmem:[#allocation16 + $0x520] sm:$0xff] }
 0x418   : > { %8336 = vmatpush3.bf16.msra.mxu0 %v8929_v47  ;;  %4973 = vmatpush2.bf16.msra.mxu1 %v7787_v36  ;;  %v7801_v47 = vcombine.low %v4616_v29, %v4617_v33  ;;  %v7835_v36 = vcombine.low %v5236_v6, %v5237_v7  ;;  %v7797_v20 = vcombine.low %v4612_v39, %v4613_v26  ;;  %v4610_v12 = vld [vmem:[#allocation16 + $0x4c0] sm:$0xff] }
 0x419   : > { %8337 = vmatprep.subr.bf16.mxu0 %v8930_v21  ;;  %4974 = vmatprep.subr.bf16.mxu1 %v7786_v54  ;;  %v4615_v54 = vld [vmem:[#allocation16 + $0x560] sm:$0xff] }
 0x41a   : > { %v4611_v11 = vld [vmem:[#allocation16 + $0x4e0] sm:$0xff] }
 0x41b   : > { %v7796_v34 = vcombine.high %v4610_v12, %v4611_v11  ;;  %v4606_v60 = vld [vmem:[#allocation16 + $0x440] sm:$0xff] }
 0x41c   : > { %8338 = vmatpush3.bf16.msra.mxu0 %v8930_v21  ;;  %4975 = vmatpush2.bf16.msra.mxu1 %v7785_v42  ;;  %v4614_v21 = vld [vmem:[#allocation16 + $0x540] sm:$0xff] }
 0x41d   : > { %4976 = vmatprep.subr.bf16.mxu1 %v7784_v23  ;;  %5029 = vmatprep.subr.bf16.mxu0 %v7804_v31  ;;  %v7799_v24 = vcombine.low %v4614_v21, %v4615_v54  ;;  %v7800_v42 = vcombine.high %v4614_v21, %v4615_v54  ;;  %v5232_v23 = vld [vmem:[#allocation16 + $0x148] sm:$0xff]  ;;  %v4604_v7 = vld [vmem:[#allocation16 + $0x400] sm:$0xff] }
 0x41e   : > { %v7832_v41 = vcombine.high %v5232_v23, %v5233_v45  ;;  %v4634_v19 = vld [vmem:[#allocation16 + $0x7c0] sm:$0xff] }
 0x41f   : > { %8340 = vmatmul.mubr.msk.bf16.vlgmr.msra.gmra.mxu0 %vm9910_vm13, %v7747_v0  ;;  %v5230_v0 = vld [vmem:[#allocation16 + $0x108] sm:$0xff] }
 0x420   : > { %8343 = vmatprep.mubr.msk.bf16.mxu0 %vm9915_vm14, %v7750_v56  ;;  %4977 = vmatpush2.bf16.msra.mxu1 %v7783_v18  ;;  %v7798_v18 = vcombine.high %v4612_v39, %v4613_v26  ;;  %v7831_v56 = vcombine.low %v5232_v23, %v5233_v45  ;;  %v4632_v45 = vld [vmem:[#allocation16 + $0x780] sm:$0xff] }
 0x421   : > { %4978 = vmatprep.subr.bf16.mxu1 %v7782_v9  ;;  %5030 = vmatpush1.bf16.msra.mxu0 %v7803_v63  ;;  %v5231_v9 = vld [vmem:[#allocation16 + $0x128] sm:$0xff] }
 0x422   : > { %5031 = vmatprep.subr.bf16.mxu0 %v7802_v49  ;;  %v7829_v14 = vcombine.low %v5230_v0, %v5231_v9  ;;  %v5225_v63 = vld [vmem:[#allocation16 + $0x68] sm:$0xff] }
 0x424   : > { %4979 = vmatpush2.bf16.msra.mxu1 %v7781_v5  ;;  %v7830_v5 = vcombine.high %v5230_v0, %v5231_v9  ;;  %v4630_v9 = vld [vmem:[#allocation16 + $0x740] sm:$0xff] }
 0x425   : > { %4980 = vmatprep.subr.bf16.mxu1 %v7780_v10  ;;  %5032 = vmatpush1.bf16.msra.mxu0 %v7801_v47  ;;  %v7795_v10 = vcombine.low %v4610_v12, %v4611_v11  ;;  %v5223_v47 = vld [vmem:[#allocation16 + $0x28] sm:$0xff] }
 0x426   : > { %5033 = vmatprep.subr.bf16.mxu0 %v7800_v42 }
 0x427   : > { %8344 = vmatmul.mubr.msk.bf16.gmra.mxu0 %vm9934_vm0, %v7753_v2  ;;  %v4609_v2 = vld [vmem:[#allocation16 + $0x4a0] sm:$0xff] }
 0x428   : > { %4981 = vmatpush2.bf16.msra.mxu1 %v7779_v22  ;;  %5061 = vmatprep.mubr.bf16.mxu0 %v10005_v51  ;;  %v4608_v22 = vld [vmem:[#allocation16 + $0x480] sm:$0xff] }
 0x429   : > { %4982 = vmatprep.subr.bf16.mxu1 %v7778_v25  ;;  %5034 = vmatpush1.bf16.msra.mxu0 %v7799_v24  ;;  %v7828_v25 = vcombine.high %v5228_v44, %v5229_v3  ;;  %v7794_v43 = vcombine.high %v4608_v22, %v4609_v2  ;;  %v5253_v24 = vld [vmem:[#allocation16 + $0x3e8] sm:$0xff]  ;;  %v4628_v3 = vld [vmem:[#allocation16 + $0x700] sm:$0xff] }
 0x42a   : > { %5035 = vmatprep.subr.bf16.mxu0 %v7798_v18  ;;  %v5251_v18 = vld [vmem:[#allocation16 + $0x3a8] sm:$0xff] }
 0x42c   : > { %4983 = vmatpush2.bf16.msra.mxu1 %v7777_v27  ;;  %v5227_v27 = vld [vmem:[#allocation16 + $0xa8] sm:$0xff] }
 0x42d   : > { %4984 = vmatprep.subr.bf16.mxu1 %v7776_v58  ;;  %5036 = vmatpush1.bf16.msra.mxu0 %v7797_v20  ;;  %v7793_v58 = vcombine.low %v4608_v22, %v4609_v2  ;;  %v7826_v15 = vcombine.high %v5226_v48, %v5227_v27  ;;  %v7825_v6 = vcombine.low %v5226_v48, %v5227_v27  ;;  %v5250_v20 = vld [vmem:[#allocation16 + $0x388] sm:$0xff] }
 0x42e   : > { %5037 = vmatprep.subr.bf16.mxu0 %v7796_v34  ;;  %v7850_v12 = vcombine.high %v5250_v20, %v5251_v18  ;;  %v5249_v34 = vld [vmem:[#allocation16 + $0x368] sm:$0xff]  ;;  %v7849_v44 = vcombine.low %v5250_v20, %v5251_v18 }
 0x42f   : > { %v5247_v48 = vld [vmem:[#allocation16 + $0x328] sm:$0xff] }
 0x430   : > { %4985 = vmatpush2.bf16.msra.mxu1 %v7775_v40  ;;  %v4607_v40 = vld [vmem:[#allocation16 + $0x460] sm:$0xff] }
 0x431   : > { %4986 = vmatprep.subr.bf16.mxu1 %v7774_v52  ;;  %5038 = vmatpush1.bf16.msra.mxu0 %v7795_v10  ;;  %v7792_v30 = vcombine.high %v4606_v60, %v4607_v40  ;;  %v5224_v52 = vld [vmem:[#allocation16 + $0x48] sm:$0xff]  ;;  %v7791_v31 = vcombine.low %v4606_v60, %v4607_v40 }
 0x432   : > { %5039 = vmatprep.subr.bf16.mxu0 %v7794_v43  ;;  %v7824_v29 = vcombine.high %v5224_v52, %v5225_v63  ;;  %v7823_v28 = vcombine.low %v5224_v52, %v5225_v63  ;;  %v5248_v10 = vld [vmem:[#allocation16 + $0x348] sm:$0xff] }
 0x433   : > { %v7848_v22 = vcombine.high %v5248_v10, %v5249_v34  ;;  %v5246_v43 = vld [vmem:[#allocation16 + $0x308] sm:$0xff]  ;;  %v7847_v27 = vcombine.low %v5248_v10, %v5249_v34 }
 0x434   : > { %4987 = vmatpush2.bf16.msra.mxu1 %v7773_v16  ;;  %v4605_v16 = vld [vmem:[#allocation16 + $0x420] sm:$0xff]  ;;  %v7846_v60 = vcombine.high %v5246_v43, %v5247_v48  ;;  %v7845_v63 = vcombine.low %v5246_v43, %v5247_v48 }
 0x435   : > { %5606 = vmatprep.subr.bf16.mxu1 %v7836_v59  ;;  %5040 = vmatpush1.bf16.msra.mxu0 %v7793_v58  ;;  %v7790_v33 = vcombine.high %v4604_v7, %v4605_v16  ;;  %v5222_v59 = vld [vmem:[#allocation16 + $0x8] sm:$0xff]  ;;  %v7789_v49 = vcombine.low %v4604_v7, %v4605_v16  ;;  %v4626_v58 = vld [vmem:[#allocation16 + $0x6c0] sm:$0xff] }
 0x436   : > { %5041 = vmatprep.subr.bf16.mxu0 %v7792_v30  ;;  %v7822_v21 = vcombine.high %v5222_v59, %v5223_v47  ;;  %v7821_v23 = vcombine.low %v5222_v59, %v5223_v47  ;;  %v5245_v30 = vld [vmem:[#allocation16 + $0x2e8] sm:$0xff] }
 0x437   : > { %4989 = vmatmul.mubr.bf16.vlgmr.msra.gmra.mxu1 %v10058_v37 }
 0x438   : > { %4998 = vmatprep.mubr.bf16.mxu1 %v10139_v50  ;;  %5607 = vmatpush1.bf16.msra.mxu1 %v7835_v36  ;;  %v4635_v36 = vld [vmem:[#allocation16 + $0x7e0] sm:$0xff] }
 0x439   : > { %5608 = vmatprep.subr.bf16.mxu1 %v7834_v53  ;;  %5042 = vmatpush1.bf16.msra.mxu0 %v7791_v31  ;;  %v7820_v54 = vcombine.high %v4634_v19, %v4635_v36  ;;  %v5252_v53 = vld [vmem:[#allocation16 + $0x3c8] sm:$0xff]  ;;  %v7819_v42 = vcombine.low %v4634_v19, %v4635_v36  ;;  %v4624_v31 = vld [vmem:[#allocation16 + $0x680] sm:$0xff] }
 0x43a   : > { %5043 = vmatprep.subr.bf16.mxu0 %v7790_v33  ;;  %v7852_v39 = vcombine.high %v5252_v53, %v5253_v24  ;;  %v7851_v0 = vcombine.low %v5252_v53, %v5253_v24  ;;  %v5243_v33 = vld [vmem:[#allocation16 + $0x2a8] sm:$0xff] }
 0x43c   : > { %5609 = vmatpush1.bf16.msra.mxu1 %v7833_v13  ;;  %v4633_v13 = vld [vmem:[#allocation16 + $0x7a0] sm:$0xff] }
 0x43d   : > { %5610 = vmatprep.subr.bf16.mxu1 %v7832_v41  ;;  %5044 = vmatpush1.bf16.msra.mxu0 %v7789_v49  ;;  %v7817_v26 = vcombine.low %v4632_v45, %v4633_v13  ;;  %v7818_v41 = vcombine.high %v4632_v45, %v4633_v13  ;;  %v4622_v49 = vld [vmem:[#allocation16 + $0x640] sm:$0xff]  ;;  %v5238_v13 = vld [vmem:[#allocation16 + $0x208] sm:$0xff] }
 0x43e   : > { %5045 = vmatprep.subr.bf16.mxu0 %v7820_v54  ;;  %v5241_v54 = vld [vmem:[#allocation16 + $0x268] sm:$0xff]  ;;  %v4621_v45 = vld [vmem:[#allocation16 + $0x620] sm:$0xff] }
 0x43f   : > { %4999 = vmatmul.mubr.bf16.gmra.mxu1 %v10054_v35 }
 0x440   : > { %5008 = vmatprep.mubr.bf16.mxu1 %v10158_v8  ;;  %5611 = vmatpush1.bf16.msra.mxu1 %v7831_v56  ;;  %v4631_v56 = vld [vmem:[#allocation16 + $0x760] sm:$0xff] }
 0x441   : > { %5612 = vmatprep.subr.bf16.mxu1 %v7830_v5  ;;  %5046 = vmatpush2.bf16.msra.mxu0 %v7819_v42  ;;  %v7815_v11 = vcombine.low %v4630_v9, %v4631_v56  ;;  %v7816_v5 = vcombine.high %v4630_v9, %v4631_v56  ;;  %v10195_v9 = vld [vmem:[#allocation16 + $0x5e8] sm:$0xff]  ;;  %v5886_v56 = vld [vmem:[#allocation16 + $0x1d0] sm:$0xff] }
 0x442   : > { %5047 = vmatprep.subr.bf16.mxu0 %v7818_v41 }
 0x444   : > { %5613 = vmatpush1.bf16.msra.mxu1 %v7829_v14  ;;  %v4629_v14 = vld [vmem:[#allocation16 + $0x720] sm:$0xff] }
 0x445   : > { %5614 = vmatprep.subr.bf16.mxu1 %v7828_v25  ;;  %5048 = vmatpush2.bf16.msra.mxu0 %v7817_v26  ;;  %v7813_v2 = vcombine.low %v4628_v3, %v4629_v14  ;;  %v7814_v25 = vcombine.high %v4628_v3, %v4629_v14  ;;  %v5885_v3 = vld [vmem:[#allocation16 + $0x1b0] sm:$0xff] }
 0x446   : > { %5049 = vmatprep.subr.bf16.mxu0 %v7816_v5 }
 0x447   : > { %5009 = vmatmul.mubr.bf16.gmra.mxu1 %v10069_v57 }
 0x448   : > { %5018 = vmatprep.mubr.bf16.mxu1 %v10153_v17  ;;  %5615 = vmatpush1.bf16.msra.mxu1 %v7827_v62  ;;  %v4627_v62 = vld [vmem:[#allocation16 + $0x6e0] sm:$0xff] }
 0x449   : > { %5616 = vmatprep.subr.bf16.mxu1 %v7826_v15  ;;  %5050 = vmatpush2.bf16.msra.mxu0 %v7815_v11  ;;  %v7812_v40 = vcombine.high %v4626_v58, %v4627_v62  ;;  %v5244_v15 = vld [vmem:[#allocation16 + $0x2c8] sm:$0xff]  ;;  %v7811_v52 = vcombine.low %v4626_v58, %v4627_v62  ;;  %v5881_v58 = vld [vmem:[#allocation16 + $0x130] sm:$0xff] }
 0x44a   : > { %5051 = vmatprep.subr.bf16.mxu0 %v7814_v25  ;;  %v7844_v7 = vcombine.high %v5244_v15, %v5245_v30  ;;  %v7843_v47 = vcombine.low %v5244_v15, %v5245_v30  ;;  %v5883_v25 = vld [vmem:[#allocation16 + $0x170] sm:$0xff] }
 0x44b   : > { %v5879_v15 = vld [vmem:[#allocation16 + $0xf0] sm:$0xff] }
 0x44c   : > { %5617 = vmatpush1.bf16.msra.mxu1 %v7825_v6  ;;  %v4625_v6 = vld [vmem:[#allocation16 + $0x6a0] sm:$0xff] }
 0x44d   : > { %5618 = vmatprep.subr.bf16.mxu1 %v7824_v29  ;;  %5052 = vmatpush2.bf16.msra.mxu0 %v7813_v2  ;;  %v7810_v16 = vcombine.high %v4624_v31, %v4625_v6  ;;  %v5242_v29 = vld [vmem:[#allocation16 + $0x288] sm:$0xff]  ;;  %v7809_v59 = vcombine.low %v4624_v31, %v4625_v6  ;;  %v5882_v2 = vld [vmem:[#allocation16 + $0x150] sm:$0xff] }
 0x44e   : > { %5053 = vmatprep.subr.bf16.mxu0 %v7812_v40  ;;  %v7842_v19 = vcombine.high %v5242_v29, %v5243_v33  ;;  %v7841_v24 = vcombine.low %v5242_v29, %v5243_v33  ;;  %v7896_v48 = vcombine.high %v5882_v2, %v5883_v25  ;;  %v7895_v62 = vcombine.low %v5882_v2, %v5883_v25  ;;  %v5878_v40 = vld [vmem:[#allocation16 + $0xd0] sm:$0xff] }
 0x44f   : > { %5019 = vmatmul.mubr.bf16.gmra.mxu1 %v10067_v4  ;;  %v5877_v31 = vld [vmem:[#allocation16 + $0xb0] sm:$0xff]  ;;  %v7891_v6 = vcombine.low %v5878_v40, %v5879_v15 }
 0x450   : > { %5619 = vmatpush1.bf16.msra.mxu1 %v7823_v28  ;;  %5638 = vmatprep.mubr.bf16.mxu1 %v10166_v38  ;;  %v4623_v28 = vld [vmem:[#allocation16 + $0x660] sm:$0xff]  ;;  %v5875_v29 = vld [vmem:[#allocation16 + $0x70] sm:$0xff] }
 0x451   : > { %5620 = vmatprep.subr.bf16.mxu1 %v7822_v21  ;;  %5054 = vmatpush2.bf16.msra.mxu0 %v7811_v52  ;;  %v7808_v36 = vcombine.high %v4622_v49, %v4623_v28  ;;  %v5240_v21 = vld [vmem:[#allocation16 + $0x248] sm:$0xff]  ;;  %v7807_v53 = vcombine.low %v4622_v49, %v4623_v28  ;;  %v7892_v52 = vcombine.high %v5878_v40, %v5879_v15  ;;  %v5873_v49 = vld [vmem:[#allocation16 + $0x30] sm:$0xff]  ;;  %v6536_v15 = vld [vmem:[#allocation16 + $0x1d8] sm:$0xff] }
 0x452   : > { %5055 = vmatprep.subr.bf16.mxu0 %v7810_v16  ;;  %v7840_v42 = vcombine.high %v5240_v21, %v5241_v54  ;;  %v7839_v20 = vcombine.low %v5240_v21, %v5241_v54  ;;  %v5874_v16 = vld [vmem:[#allocation16 + $0x50] sm:$0xff] }
 0x453   : > { %v7887_v28 = vcombine.low %v5874_v16, %v5875_v29  ;;  %v5903_v21 = vld [vmem:[#allocation16 + $0x3f0] sm:$0xff] }
 0x454   : > { %5621 = vmatpush1.bf16.msra.mxu1 %v7821_v23  ;;  %v4620_v23 = vld [vmem:[#allocation16 + $0x600] sm:$0xff]  ;;  %v5890_v25 = vld [vmem:[#allocation16 + $0x250] sm:$0xff] }
 0x455   : > { %5622 = vmatprep.subr.bf16.mxu1 %v7852_v39  ;;  %5056 = vmatpush2.bf16.msra.mxu0 %v7809_v59  ;;  %v5239_v39 = vld [vmem:[#allocation16 + $0x228] sm:$0xff]  ;;  %v7806_v26 = vcombine.high %v4620_v23, %v4621_v45  ;;  %v7805_v41 = vcombine.low %v4620_v23, %v4621_v45  ;;  %v7888_v59 = vcombine.high %v5874_v16, %v5875_v29  ;;  %v6532_v29 = vld [vmem:[#allocation16 + $0x158] sm:$0xff] }
 0x456   : > { %5057 = vmatprep.subr.bf16.mxu0 %v7808_v36  ;;  %v7838_v18 = vcombine.high %v5238_v13, %v5239_v39  ;;  %v7837_v10 = vcombine.low %v5238_v13, %v5239_v39  ;;  %v5902_v36 = vld [vmem:[#allocation16 + $0x3d0] sm:$0xff] }
 0x457   : > { %v7915_v23 = vcombine.low %v5902_v36, %v5903_v21  ;;  %v5898_v13 = vld [vmem:[#allocation16 + $0x350] sm:$0xff] }
 0x458   : > { %5623 = vmatpush2.bf16.msra.mxu1 %v7851_v0  ;;  %v10193_v0 = vld [vmem:[#allocation16 + $0x5c8] sm:$0xff]  ;;  %v5899_v39 = vld [vmem:[#allocation16 + $0x370] sm:$0xff] }
 0x459   : > { %5624 = vmatprep.subr.bf16.mxu1 %v7850_v12  ;;  %5058 = vmatpush2.bf16.msra.mxu0 %v7807_v53  ;;  %v5887_v12 = vld [vmem:[#allocation16 + $0x1f0] sm:$0xff]  ;;  %v7868_v11 = vcombine.high %v10193_v0, %v10195_v9  ;;  %v7867_v5 = vcombine.low %v10193_v0, %v10195_v9  ;;  %v7916_v53 = vcombine.high %v5902_v36, %v5903_v21  ;;  %v6528_v21 = vld [vmem:[#allocation16 + $0xd8] sm:$0xff] }
 0x45a   : > { %5059 = vmatprep.subr.bf16.mxu0 %v7806_v26  ;;  %v7900_v34 = vcombine.high %v5886_v56, %v5887_v12  ;;  %v7899_v14 = vcombine.low %v5886_v56, %v5887_v12  ;;  %v7911_v56 = vcombine.low %v5898_v13, %v5899_v39 }
 0x45c   : > { %5625 = vmatpush2.bf16.msra.mxu1 %v7849_v44  ;;  %v5884_v44 = vld [vmem:[#allocation16 + $0x190] sm:$0xff] }
 0x45d   : > { %5626 = vmatprep.subr.bf16.mxu1 %v7848_v22  ;;  %5060 = vmatpush2.bf16.msra.mxu0 %v7805_v41  ;;  %v7898_v22 = vcombine.high %v5884_v44, %v5885_v3  ;;  %v7897_v43 = vcombine.low %v5884_v44, %v5885_v3  ;;  %v7912_v41 = vcombine.high %v5898_v13, %v5899_v39  ;;  %v5892_v3 = vld [vmem:[#allocation16 + $0x290] sm:$0xff] }
 0x45e   : > { %5679 = vmatprep.subr.bf16.mxu0 %v7868_v11  ;;  %v5894_v11 = vld [vmem:[#allocation16 + $0x2d0] sm:$0xff] }
 0x460   : > { %5627 = vmatpush2.bf16.msra.mxu1 %v7847_v27  ;;  %v5880_v27 = vld [vmem:[#allocation16 + $0x110] sm:$0xff] }
 0x461   : > { %5628 = vmatprep.subr.bf16.mxu1 %v7846_v60  ;;  %v7894_v60 = vcombine.high %v5880_v27, %v5881_v58  ;;  %v7893_v30 = vcombine.low %v5880_v27, %v5881_v58  ;;  %v5888_v58 = vld [vmem:[#allocation16 + $0x210] sm:$0xff] }
 0x464   : > { %5629 = vmatpush2.bf16.msra.mxu1 %v7845_v63  ;;  %v5876_v63 = vld [vmem:[#allocation16 + $0x90] sm:$0xff] }
 0x465   : > { %5630 = vmatprep.subr.bf16.mxu1 %v7844_v7  ;;  %v7890_v7 = vcombine.high %v5876_v63, %v5877_v31  ;;  %v7889_v33 = vcombine.low %v5876_v63, %v5877_v31  ;;  %v6534_v31 = vld [vmem:[#allocation16 + $0x198] sm:$0xff] }
 0x468   : > { %5631 = vmatpush2.bf16.msra.mxu1 %v7843_v47  ;;  %v5872_v47 = vld [vmem:[#allocation16 + $0x10] sm:$0xff] }
 0x469   : > { %5632 = vmatprep.subr.bf16.mxu1 %v7842_v19  ;;  %v7886_v19 = vcombine.high %v5872_v47, %v5873_v49  ;;  %v7885_v54 = vcombine.low %v5872_v47, %v5873_v49  ;;  %v6530_v49 = vld [vmem:[#allocation16 + $0x118] sm:$0xff] }
 0x46c   : > { %5633 = vmatpush2.bf16.msra.mxu1 %v7841_v24  ;;  %v5900_v24 = vld [vmem:[#allocation16 + $0x390] sm:$0xff] }
 0x46d   : > { %5634 = vmatprep.subr.bf16.mxu1 %v7840_v42  ;;  %v5901_v42 = vld [vmem:[#allocation16 + $0x3b0] sm:$0xff] }
 0x46e   : > { %v7914_v45 = vcombine.high %v5900_v24, %v5901_v42  ;;  %v7913_v26 = vcombine.low %v5900_v24, %v5901_v42 }
 0x470   : > { %5635 = vmatpush2.bf16.msra.mxu1 %v7839_v20  ;;  %v5896_v20 = vld [vmem:[#allocation16 + $0x310] sm:$0xff] }
 0x471   : > { %5636 = vmatprep.subr.bf16.mxu1 %v7838_v18  ;;  %v5897_v18 = vld [vmem:[#allocation16 + $0x330] sm:$0xff] }
 0x472   : > { %v7910_v12 = vcombine.high %v5896_v20, %v5897_v18 }
 0x474   : > { %5637 = vmatpush2.bf16.msra.mxu1 %v7837_v10  ;;  %v5895_v10 = vld [vmem:[#allocation16 + $0x2f0] sm:$0xff] }
 0x475   : > { %6256 = vmatprep.subr.bf16.mxu1 %v7900_v34  ;;  %v7909_v34 = vcombine.low %v5896_v20, %v5897_v18  ;;  %v7908_v44 = vcombine.high %v5894_v11, %v5895_v10  ;;  %v6525_v20 = vld [vmem:[#allocation16 + $0x78] sm:$0xff] }
 0x477   : > { %5639 = vmatmul.mubr.bf16.vlgmr.msra.gmra.mxu1 %v10058_v37 }
 0x478   : > { %5648 = vmatprep.mubr.bf16.mxu1 %v10139_v50  ;;  %6257 = vmatpush1.bf16.msra.mxu1 %v7899_v14  ;;  %v5893_v14 = vld [vmem:[#allocation16 + $0x2b0] sm:$0xff] }
 0x479   : > { %6258 = vmatprep.subr.bf16.mxu1 %v7898_v22  ;;  %v7907_v22 = vcombine.low %v5894_v11, %v5895_v10  ;;  %v7906_v2 = vcombine.high %v5892_v3, %v5893_v14  ;;  %v6522_v11 = vld [vmem:[#allocation16 + $0x18] sm:$0xff] }
 0x47a   : > { %v6523_v10 = vld [vmem:[#allocation16 + $0x38] sm:$0xff] }
 0x47c   : > { %6259 = vmatpush1.bf16.msra.mxu1 %v7897_v43  ;;  %v5891_v43 = vld [vmem:[#allocation16 + $0x270] sm:$0xff] }
 0x47d   : > { %6260 = vmatprep.subr.bf16.mxu1 %v7896_v48  ;;  %v7905_v48 = vcombine.low %v5892_v3, %v5893_v14  ;;  %v7904_v27 = vcombine.high %v5890_v25, %v5891_v43  ;;  %v7950_v3 = vcombine.high %v6522_v11, %v6523_v10  ;;  %v6552_v14 = vld [vmem:[#allocation16 + $0x3d8] sm:$0xff] }
 0x47f   : > { %5649 = vmatmul.mubr.bf16.gmra.mxu1 %v10054_v35 }
 0x480   : > { %5658 = vmatprep.mubr.bf16.mxu1 %v10158_v8  ;;  %6261 = vmatpush1.bf16.msra.mxu1 %v7895_v62  ;;  %v5889_v62 = vld [vmem:[#allocation16 + $0x230] sm:$0xff] }
 0x481   : > { %6262 = vmatprep.subr.bf16.mxu1 %v7894_v60  ;;  %v7903_v60 = vcombine.low %v5890_v25, %v5891_v43  ;;  %v7902_v40 = vcombine.high %v5888_v58, %v5889_v62  ;;  %v7949_v25 = vcombine.low %v6522_v11, %v6523_v10 }
 0x484   : > { %6263 = vmatpush1.bf16.msra.mxu1 %v7893_v30  ;;  %v6537_v30 = vld [vmem:[#allocation16 + $0x1f8] sm:$0xff] }
 0x485   : > { %6264 = vmatprep.subr.bf16.mxu1 %v7892_v52  ;;  %v7901_v52 = vcombine.low %v5888_v58, %v5889_v62  ;;  %v7964_v63 = vcombine.high %v6536_v15, %v6537_v30  ;;  %v6551_v58 = vld [vmem:[#allocation16 + $0x3b8] sm:$0xff] }
 0x487   : > { %5659 = vmatmul.mubr.bf16.gmra.mxu1 %v10069_v57 }
 0x488   : > { %5668 = vmatprep.mubr.bf16.mxu1 %v10153_v17  ;;  %6265 = vmatpush1.bf16.msra.mxu1 %v7891_v6  ;;  %v6535_v6 = vld [vmem:[#allocation16 + $0x1b8] sm:$0xff] }
 0x489   : > { %6266 = vmatprep.subr.bf16.mxu1 %v7890_v7  ;;  %v7963_v7 = vcombine.low %v6536_v15, %v6537_v30  ;;  %v7962_v16 = vcombine.high %v6534_v31, %v6535_v6  ;;  %v6548_v30 = vld [vmem:[#allocation16 + $0x358] sm:$0xff] }
 0x48c   : > { %6267 = vmatpush1.bf16.msra.mxu1 %v7889_v33  ;;  %v6533_v33 = vld [vmem:[#allocation16 + $0x178] sm:$0xff] }
 0x48d   : > { %6268 = vmatprep.subr.bf16.mxu1 %v7888_v59  ;;  %v7961_v59 = vcombine.low %v6534_v31, %v6535_v6  ;;  %v7960_v47 = vcombine.high %v6532_v29, %v6533_v33 }
 0x48f   : > { %5669 = vmatmul.mubr.bf16.gmra.mxu1 %v10067_v4 }
 0x490   : > { %6269 = vmatpush1.bf16.msra.mxu1 %v7887_v28  ;;  %6288 = vmatprep.mubr.bf16.mxu1 %v10166_v38  ;;  %v6531_v28 = vld [vmem:[#allocation16 + $0x138] sm:$0xff] }
 0x491   : > { %6270 = vmatprep.subr.bf16.mxu1 %v7886_v19  ;;  %v7959_v19 = vcombine.low %v6532_v29, %v6533_v33  ;;  %v7958_v36 = vcombine.high %v6530_v49, %v6531_v28 }
 0x494   : > { %6271 = vmatpush1.bf16.msra.mxu1 %v7885_v54  ;;  %v6529_v54 = vld [vmem:[#allocation16 + $0xf8] sm:$0xff] }
 0x495   : > { %6272 = vmatprep.subr.bf16.mxu1 %v7916_v53  ;;  %v7957_v53 = vcombine.low %v6530_v49, %v6531_v28  ;;  %v7956_v42 = vcombine.high %v6528_v21, %v6529_v54  ;;  %v7955_v13 = vcombine.low %v6528_v21, %v6529_v54  ;;  %v6544_v49 = vld [vmem:[#allocation16 + $0x2d8] sm:$0xff] }
 0x496   : > { %v6545_v28 = vld [vmem:[#allocation16 + $0x2f8] sm:$0xff] }
 0x497   : > { %v7971_v10 = vcombine.low %v6544_v49, %v6545_v28 }
 0x498   : > { %6273 = vmatpush2.bf16.msra.mxu1 %v7915_v23  ;;  %v6526_v23 = vld [vmem:[#allocation16 + $0x98] sm:$0xff] }
 0x499   : > { %6274 = vmatprep.subr.bf16.mxu1 %v7914_v45  ;;  %v6527_v45 = vld [vmem:[#allocation16 + $0xb8] sm:$0xff] }
 0x49a   : > { %v7953_v18 = vcombine.low %v6526_v23, %v6527_v45 }
 0x49c   : > { %6275 = vmatpush2.bf16.msra.mxu1 %v7913_v26  ;;  %v7954_v26 = vcombine.high %v6526_v23, %v6527_v45  ;;  %v6542_v45 = vld [vmem:[#allocation16 + $0x298] sm:$0xff] }
 0x49d   : > { %6276 = vmatprep.subr.bf16.mxu1 %v7912_v41  ;;  %v6524_v41 = vld [vmem:[#allocation16 + $0x58] sm:$0xff] }
 0x4a0   : > { %6277 = vmatpush2.bf16.msra.mxu1 %v7911_v56 }
 0x4a1   : > { %6278 = vmatprep.subr.bf16.mxu1 %v7910_v12  ;;  %v7952_v12 = vcombine.high %v6524_v41, %v6525_v20 }
 0x4a4   : > { %6279 = vmatpush2.bf16.msra.mxu1 %v7909_v34  ;;  %v7951_v34 = vcombine.low %v6524_v41, %v6525_v20  ;;  %v10227_v41 = vld [vmem:[#allocation13 + $0x2] ss:$0 sm:$0xff] }
 0x4a5   : > { %6280 = vmatprep.subr.bf16.mxu1 %v7908_v44 }
 0x4a8   : > { %6281 = vmatpush2.bf16.msra.mxu1 %v7907_v22  ;;  %v6553_v22 = vld [vmem:[#allocation16 + $0x3f8] sm:$0xff] }
 0x4a9   : > { %6282 = vmatprep.subr.bf16.mxu1 %v7906_v2 }
 0x4ac   : > { %6283 = vmatpush2.bf16.msra.mxu1 %v7905_v48  ;;  %v7980_v48 = vcombine.high %v6552_v14, %v6553_v22 }
 0x4ad   : > { %6284 = vmatprep.subr.bf16.mxu1 %v7904_v27  ;;  %v6550_v27 = vld [vmem:[#allocation16 + $0x398] sm:$0xff] }
 0x4ae   : > { %v7978_v15 = vcombine.high %v6550_v27, %v6551_v58  ;;  %v7977_v31 = vcombine.low %v6550_v27, %v6551_v58  ;;  %v10231_v58 = vld [vmem:[#allocation15 + $0x2] ss:$0 sm:$0xff] }
 0x4b0   : > { %6285 = vmatpush2.bf16.msra.mxu1 %v7903_v60  ;;  %v7979_v60 = vcombine.low %v6552_v14, %v6553_v22 }
 0x4b1   : > { %6286 = vmatprep.subr.bf16.mxu1 %v7902_v40 }
 0x4b4   : > { %6287 = vmatpush2.bf16.msra.mxu1 %v7901_v52  ;;  %v6549_v52 = vld [vmem:[#allocation16 + $0x378] sm:$0xff] }
 0x4b5   : > { %6906 = vmatprep.subr.bf16.mxu1 %v7964_v63  ;;  %v7976_v6 = vcombine.high %v6548_v30, %v6549_v52  ;;  %v7975_v33 = vcombine.low %v6548_v30, %v6549_v52 }
 0x4b7   : > { %6289 = vmatmul.mubr.bf16.vlgmr.msra.gmra.mxu1 %v10058_v37  ;;  %v8317_v2 = vpop.f32.mrf.mxu1 }
 0x4b8   : > { %6298 = vmatprep.mubr.bf16.mxu1 %v10139_v50  ;;  %6907 = vmatpush1.bf16.msra.mxu1 %v7963_v7  ;;  %v6546_v7 = vld [vmem:[#allocation16 + $0x318] sm:$0xff] }
 0x4b9   : > { %6908 = vmatprep.subr.bf16.mxu1 %v7962_v16  ;;  %v4307_v62 = vpop.f32.mrf.mxu1  ;;  %v6547_v16 = vld [vmem:[#allocation16 + $0x338] sm:$0xff] }
 0x4ba   : > { %v7973_v54 = vcombine.low %v6546_v7, %v6547_v16 }
 0x4bb   : > { %v8318_v63 = vpop.f32.mrf.mxu1 }
 0x4bc   : > { %6909 = vmatpush1.bf16.msra.mxu1 %v7961_v59 }
 0x4bd   : > { %6910 = vmatprep.subr.bf16.mxu1 %v7960_v47  ;;  %v4310_v29 = vpop.f32.mrf.mxu1  ;;  %v7974_v47 = vcombine.high %v6546_v7, %v6547_v16  ;;  %v6539_v7 = vld [vmem:[#allocation16 + $0x238] sm:$0xff] }
 0x4bf   : > { %6299 = vmatmul.mubr.bf16.gmra.mxu1 %v10054_v35  ;;  %v10213_v24 = vpop.f32.mrf.mxu0 }
 0x4c0   : > { %6308 = vmatprep.mubr.bf16.mxu1 %v10158_v8  ;;  %6911 = vmatpush1.bf16.msra.mxu1 %v7959_v19  ;;  %v10225_v19 = vpop.f32.mrf.mxu1 }
 0x4c1   : > { %6912 = vmatprep.subr.bf16.mxu1 %v7958_v36  ;;  %v4194_v39 = vpop.f32.mrf.mxu0 }
 0x4c2   : > { %v4308_v21 = vadd.f32 %v4307_v62, %v4194_v39 }
 0x4c3   : > { %v8294_v56 = vpop.f32.mrf.mxu0 }
 0x4c4   : > { %6913 = vmatpush1.bf16.msra.mxu1 %v7957_v53 }
 0x4c5   : > { %6914 = vmatprep.subr.bf16.mxu1 %v7956_v42  ;;  %v4197_v44 = vpop.f32.mrf.mxu0  ;;  %v7972_v42 = vcombine.high %v6544_v49, %v6545_v28 }
 0x4c7   : > { %6309 = vmatmul.mubr.bf16.gmra.mxu1 %v10069_v57  ;;  %v10219_v43 = vpop.f32.mrf.mxu0 }
 0x4c8   : > { %6318 = vmatprep.mubr.bf16.mxu1 %v10153_v17  ;;  %6915 = vmatpush1.bf16.msra.mxu1 %v7955_v13  ;;  %v6543_v13 = vld [vmem:[#allocation16 + $0x2b8] sm:$0xff] }
 0x4c9   : > { %6916 = vmatprep.subr.bf16.mxu1 %v7954_v26  ;;  %v10221_v40 = vpop.f32.mrf.mxu0  ;;  %v4323_v26 = vpop.f32.mrf.mxu1  ;;  %v7970_v39 = vcombine.high %v6542_v45, %v6543_v13 }
 0x4cb   : > { %v8322_v27 = vpop.f32.mrf.mxu1 }
 0x4cc   : > { %6917 = vmatpush1.bf16.msra.mxu1 %v7953_v18  ;;  %v4319_v18 = vadd.f32 %v8318_v63, %v8294_v56 }
 0x4cd   : > { %6918 = vmatprep.subr.bf16.mxu1 %v7952_v12  ;;  %v4311_v12 = vadd.f32 %v4310_v29, %v4197_v44  ;;  %v4326_v16 = vpop.f32.mrf.mxu1 }
 0x4cf   : > { %6319 = vmatmul.mubr.bf16.gmra.mxu1 %v10067_v4 }
 0x4d0   : > { %6919 = vmatpush1.bf16.msra.mxu1 %v7951_v34  ;;  %6938 = vmatprep.mubr.bf16.mxu1 %v10166_v38  ;;  %v10223_v38 = vpop.f32.mrf.mxu0 }
 0x4d1   : > { %6920 = vmatprep.subr.bf16.mxu1 %v7950_v3  ;;  %v4316_v3 = vadd.f32 %v8317_v2, %v10213_v24  ;;  %v5266_v24 = vld [vmem:[#allocation16 + $0x588] sm:$0xff] }
 0x4d2   : > { %v4213_v59 = vpop.f32.mrf.mxu0 }
 0x4d4   : > { %6921 = vmatpush1.bf16.msra.mxu1 %v7949_v25  ;;  %v6540_v25 = vld [vmem:[#allocation16 + $0x258] sm:$0xff] }
 0x4d5   : > { %6922 = vmatprep.subr.bf16.mxu1 %v7980_v48  ;;  %v6541_v48 = vld [vmem:[#allocation16 + $0x278] sm:$0xff] }
 0x4d6   : > { %v7968_v52 = vcombine.high %v6540_v25, %v6541_v48 }
 0x4d8   : > { %6923 = vmatpush2.bf16.msra.mxu1 %v7979_v60 }
 0x4d9   : > { %6924 = vmatprep.subr.bf16.mxu1 %v7978_v15  ;;  %v7969_v15 = vcombine.low %v6542_v45, %v6543_v13 }
 0x4dc   : > { %6925 = vmatpush2.bf16.msra.mxu1 %v7977_v31  ;;  %v5267_v31 = vld [vmem:[#allocation16 + $0x5a8] sm:$0xff] }
 0x4dd   : > { %6926 = vmatprep.subr.bf16.mxu1 %v7976_v6  ;;  %v6538_v6 = vld [vmem:[#allocation16 + $0x218] sm:$0xff] }
 0x4df   : > { %v8341_v36 = vpop.f32.mrf.mxu0 }
 0x4e0   : > { %6927 = vmatpush2.bf16.msra.mxu1 %v7975_v33  ;;  %v4470_v56 = vadd.f32 %v8341_v36, %v4316_v3  ;;  %v7967_v33 = vcombine.low %v6540_v25, %v6541_v48  ;;  %v5263_v3 = vld [vmem:[#allocation16 + $0x528] sm:$0xff] }
 0x4e1   : > { %v4437_v53 = vpop.f32.mrf.mxu0  ;;  %6928 = vmatprep.subr.bf16.mxu1 %v7974_v47  ;;  %v4327_v47 = vadd.f32 %v4326_v16, %v4213_v59  ;;  %v5257_v16 = vld [vmem:[#allocation16 + $0x468] sm:$0xff] }
 0x4e2   : > { %v4468_v23 = vadd.f32 %v4437_v53, %v4308_v21  ;;  %v4486_v49 = vmul.f32 %v10227_v41, %v4470_v56  ;;  %v7966_v53 = vcombine.high %v6538_v6, %v6539_v7 }
 0x4e3   : > { %v8342_v20 = vpop.f32.mrf.mxu0 }
 0x4e4   : > { %v4484_v11 = vmul.f32 %v10227_v41, %v4468_v23  ;;  %6929 = vmatpush2.bf16.msra.mxu1 %v7973_v54  ;;  %v4471_v14 = vadd.f32 %v8342_v20, %v4319_v18  ;;  %v7866_v54 = vcombine.high %v5266_v24, %v5267_v31  ;;  %v5264_v20 = vld [vmem:[#allocation16 + $0x548] sm:$0xff]  ;;  %v4502_v59 = vadd.f32 %v10231_v58, %v4486_v49 }
 0x4e5   : > { %v4440_v34 = vpop.f32.mrf.mxu0  ;;  %6930 = vmatprep.subr.bf16.mxu1 %v7972_v42  ;;  %v4324_v42 = vadd.f32 %v4323_v26, %v10221_v40  ;;  %v5265_v18 = vld [vmem:[#allocation16 + $0x568] sm:$0xff]  ;;  %v7865_v40 = vcombine.low %v5266_v24, %v5267_v31 }
 0x4e6   : > { %v4469_v22 = vadd.f32 %v4440_v34, %v4311_v12  ;;  %v4500_v44 = vadd.f32 %v10231_v58, %v4484_v11  ;;  %v4487_v2 = vmul.f32 %v10227_v41, %v4471_v14  ;;  %v7965_v11 = vcombine.low %v6538_v6, %v6539_v7  ;;  %v5259_v24 = vld [vmem:[#allocation16 + $0x4a8] sm:$0xff] }
 0x4e7   : > { %v10233_v62 = vpop.f32.mrf.mxu0  ;;  %v7864_v34 = vcombine.high %v5264_v20, %v5265_v18  ;;  %v4335_v14 = vadd.f32 %v8322_v27, %v10223_v38  ;;  %v7863_v0 = vcombine.low %v5264_v20, %v5265_v18  ;;  %v5261_v38 = vld [vmem:[#allocation16 + $0x4e8] sm:$0xff] }
 0x4e8   : > { %v4485_v60 = vmul.f32 %v10227_v41, %v4469_v22  ;;  %6931 = vmatpush2.bf16.msra.mxu1 %v7971_v10  ;;  %v4508_v28 = vmax.f32 %v4500_v44, 0.0  ;;  %v4503_v23 = vadd.f32 %v10231_v58, %v4487_v2  ;;  %v4510_v22 = vmax.f32 %v4502_v59, 0.0  ;;  %v5256_v7 = vld [vmem:[#allocation16 + $0x448] sm:$0xff] }
 0x4e9   : > { %v4453_v30 = vpop.f32.mrf.mxu0  ;;  %6932 = vmatprep.subr.bf16.mxu1 %v7970_v39  ;;  %v5262_v39 = vld [vmem:[#allocation16 + $0x508] sm:$0xff] }
 0x4ea   : > { %v4501_v63 = vadd.f32 %v10231_v58, %v4485_v60  ;;  %v4472_v12 = vadd.f32 %v4453_v30, %v4324_v42  ;;  %v4511_v26 = vmax.f32 %v4503_v23, 0.0  ;;  %v7862_v9 = vcombine.high %v5262_v39, %v5263_v3  ;;  %v5260_v60 = vld [vmem:[#allocation16 + $0x4c8] sm:$0xff] }
 0x4eb   : > { %v8346_v29 = vpop.f32.mrf.mxu0  ;;  %v5254_v49 = vld [vmem:[#allocation16 + $0x408] sm:$0xff] }
 0x4ec   : > { %v4509_v36 = vmax.f32 %v4501_v63, 0.0  ;;  %6933 = vmatpush2.bf16.msra.mxu1 %v7969_v15  ;;  %v4488_v25 = vmul.f32 %v10227_v41, %v4472_v12  ;;  %v10255_v48 = vpack.c.bf16 %v4511_v26, %v4510_v22  ;;  %v4475_v56 = vadd.f32 %v8346_v29, %v4335_v14  ;;  %v5282_v23 = vld [vmem:[#allocation16 + $0x788] sm:$0xff] }
 0x4ed   : > { %v4456_v21 = vpop.f32.mrf.mxu0  ;;  %6934 = vmatprep.subr.bf16.mxu1 %v7968_v52  ;;  %v7860_v52 = vcombine.high %v5260_v60, %v5261_v38  ;;  %v7859_v63 = vcombine.low %v5260_v60, %v5261_v38  ;;  %v5281_v59 = vld [vmem:[#allocation16 + $0x768] sm:$0xff] }
 0x4ee   : > { %v10242_v45 = vpack.c.bf16 %v4509_v36, %v4508_v28  ;;  %v4473_v13 = vadd.f32 %v4456_v21, %v4327_v47  ;;  %v4504_v15 = vadd.f32 %v10231_v58, %v4488_v25  ;;  %v7856_v47 = vcombine.high %v5256_v7, %v5257_v16  ;;  %v5255_v28 = vld [vmem:[#allocation16 + $0x428] sm:$0xff] }
 0x4ef   : > { %v5274_v22 = vld [vmem:[#allocation16 + $0x688] sm:$0xff] }
 0x4f0   : > { %5062 = vmatmul.mubr.bf16.vlgmr.msra.gmra.mxu0 %v10242_v45  ;;  %6935 = vmatpush2.bf16.msra.mxu1 %v7967_v33  ;;  %v4489_v10 = vmul.f32 %v10227_v41, %v4473_v13  ;;  %v5283_v13 = vld [vmem:[#allocation16 + $0x7a8] sm:$0xff] }
 0x4f1   : > { %5680 = vmatpush1.bf16.msra.mxu0 %v7867_v5  ;;  %5071 = vmatprep.mubr.bf16.mxu0 %v10022_v46  ;;  %v4332_v5 = vadd.f32 %v10225_v19, %v10219_v43  ;;  %v7861_v43 = vcombine.low %v5262_v39, %v5263_v3  ;;  %v4491_v19 = vmul.f32 %v10227_v41, %v4475_v56  ;;  %v5277_v39 = vld [vmem:[#allocation16 + $0x6e8] sm:$0xff] }
 0x4f2   : > { %5681 = vmatprep.subr.bf16.mxu0 %v7866_v54  ;;  %6936 = vmatprep.subr.bf16.mxu1 %v7966_v53  ;;  %v4505_v44 = vadd.f32 %v10231_v58, %v4489_v10  ;;  %v5284_v54 = vld [vmem:[#allocation16 + $0x7c8] sm:$0xff]  ;;  %v7853_v53 = vcombine.low %v5254_v49, %v5255_v28  ;;  %v7882_v18 = vcombine.high %v5282_v23, %v5283_v13 }
 0x4f3   : > { %v4474_v27 = vadd.f32 %v10233_v62, %v4332_v5  ;;  %v4512_v62 = vmax.f32 %v4504_v15, 0.0  ;;  %v4507_v31 = vadd.f32 %v10231_v58, %v4491_v19  ;;  %v7881_v12 = vcombine.low %v5282_v23, %v5283_v13  ;;  %v5273_v5 = vld [vmem:[#allocation16 + $0x668] sm:$0xff]  ;;  %v5919_v19 = vld [vmem:[#allocation16 + $0x5f0] sm:$0xff] }
 0x4f4   : > { %6937 = vmatpush2.bf16.msra.mxu1 %v7965_v11  ;;  %v4513_v30 = vmax.f32 %v4505_v44, 0.0  ;;  %v5278_v11 = vld [vmem:[#allocation16 + $0x708] sm:$0xff] }
 0x4f5   : > { %5682 = vmatpush1.bf16.msra.mxu0 %v7865_v40  ;;  %v4490_v2 = vmul.f32 %v10227_v41, %v4474_v27  ;;  %v4515_v33 = vmax.f32 %v4507_v31, 0.0  ;;  %v5279_v40 = vld [vmem:[#allocation16 + $0x728] sm:$0xff]  ;;  %v5915_v31 = vld [vmem:[#allocation16 + $0x570] sm:$0xff] }
 0x4f6   : > { %5683 = vmatprep.subr.bf16.mxu0 %v7864_v34  ;;  %v10267_v6 = vpack.c.bf16 %v4513_v30, %v4512_v62  ;;  %v7878_v10 = vcombine.high %v5278_v11, %v5279_v40  ;;  %v5276_v34 = vld [vmem:[#allocation16 + $0x6c8] sm:$0xff]  ;;  %v7877_v3 = vcombine.low %v5278_v11, %v5279_v40 }
 0x4f7   : > { %6939 = vmatmul.mubr.bf16.vlgmr.msra.gmra.mxu1 %v10058_v37  ;;  %v5258_v37 = vld [vmem:[#allocation16 + $0x488] sm:$0xff]  ;;  %v4506_v29 = vadd.f32 %v10231_v58, %v4490_v2  ;;  %v7854_v58 = vcombine.high %v5254_v49, %v5255_v28  ;;  %v7876_v14 = vcombine.high %v5276_v34, %v5277_v39  ;;  %v7875_v25 = vcombine.low %v5276_v34, %v5277_v39  ;;  %v5911_v49 = vld [vmem:[#allocation16 + $0x4f0] sm:$0xff] }
 0x4f8   : > { %5072 = vmatmul.mubr.bf16.gmra.mxu0 %v10255_v48  ;;  %6948 = vmatprep.mubr.bf16.mxu1 %v10139_v50  ;;  %v7858_v50 = vcombine.high %v5258_v37, %v5259_v24  ;;  %v7857_v41 = vcombine.low %v5258_v37, %v5259_v24  ;;  %v5270_v60 = vld [vmem:[#allocation16 + $0x608] sm:$0xff]  ;;  %v5916_v37 = vld [vmem:[#allocation16 + $0x590] sm:$0xff] }
 0x4f9   : > { %5684 = vmatpush1.bf16.msra.mxu0 %v7863_v0  ;;  %5081 = vmatprep.mubr.bf16.mxu0 %v10039_v61  ;;  %v4514_v36 = vmax.f32 %v4506_v29, 0.0  ;;  %v5271_v38 = vld [vmem:[#allocation16 + $0x628] sm:$0xff]  ;;  %v5917_v24 = vld [vmem:[#allocation16 + $0x5b0] sm:$0xff] }
 0x4fa   : > { %5685 = vmatprep.subr.bf16.mxu0 %v7862_v9  ;;  %v5272_v9 = vld [vmem:[#allocation16 + $0x648] sm:$0xff]  ;;  %v7870_v15 = vcombine.high %v5270_v60, %v5271_v38  ;;  %v7869_v30 = vcombine.low %v5270_v60, %v5271_v38  ;;  %v7930_v62 = vcombine.high %v5916_v37, %v5917_v24  ;;  %v5913_v29 = vld [vmem:[#allocation16 + $0x530] sm:$0xff] }
 0x4fb   : > { %v10274_v21 = vpack.c.bf16 %v4515_v33, %v4514_v36  ;;  %v7872_v44 = vcombine.high %v5272_v9, %v5273_v5  ;;  %v7871_v27 = vcombine.low %v5272_v9, %v5273_v5 }
 0x4fd   : > { %5686 = vmatpush1.bf16.msra.mxu0 %v7861_v43  ;;  %v5918_v43 = vld [vmem:[#allocation16 + $0x5d0] sm:$0xff] }
 0x4fe   : > { %5687 = vmatprep.subr.bf16.mxu0 %v7860_v52  ;;  %v7932_v52 = vcombine.high %v5918_v43, %v5919_v19  ;;  %v7931_v2 = vcombine.low %v5918_v43, %v5919_v19 }
 0x4ff   : > { %6949 = vmatmul.mubr.bf16.gmra.mxu1 %v10054_v35  ;;  %v7855_v35 = vcombine.low %v5256_v7, %v5257_v16  ;;  %v5912_v16 = vld [vmem:[#allocation16 + $0x510] sm:$0xff] }
 0x500   : > { %5082 = vmatmul.mubr.bf16.gmra.mxu0 %v10267_v6  ;;  %6958 = vmatprep.mubr.bf16.mxu1 %v10158_v8  ;;  %v5285_v8 = vld [vmem:[#allocation16 + $0x7e8] sm:$0xff]  ;;  %v7926_v33 = vcombine.high %v5912_v16, %v5913_v29  ;;  %v7925_v28 = vcombine.low %v5912_v16, %v5913_v29 }
 0x501   : > { %5688 = vmatpush1.bf16.msra.mxu0 %v7859_v63  ;;  %5091 = vmatprep.mubr.bf16.mxu0 %v10043_v32  ;;  %v7884_v42 = vcombine.high %v5284_v54, %v5285_v8  ;;  %v7883_v20 = vcombine.low %v5284_v54, %v5285_v8  ;;  %v5914_v63 = vld [vmem:[#allocation16 + $0x550] sm:$0xff] }
 0x502   : > { %5689 = vmatprep.subr.bf16.mxu0 %v7858_v50  ;;  %v7929_v50 = vcombine.low %v5916_v37, %v5917_v24  ;;  %v7928_v7 = vcombine.high %v5914_v63, %v5915_v31 }
 0x505   : > { %5690 = vmatpush1.bf16.msra.mxu0 %v7857_v41  ;;  %v7927_v41 = vcombine.low %v5914_v63, %v5915_v31 }
 0x506   : > { %5691 = vmatprep.subr.bf16.mxu0 %v7856_v47  ;;  %v5910_v47 = vld [vmem:[#allocation16 + $0x4d0] sm:$0xff] }
 0x507   : > { %6959 = vmatmul.mubr.bf16.gmra.mxu1 %v10069_v57  ;;  %v5280_v57 = vld [vmem:[#allocation16 + $0x748] sm:$0xff]  ;;  %v7924_v36 = vcombine.high %v5910_v47, %v5911_v49  ;;  %v7923_v54 = vcombine.low %v5910_v47, %v5911_v49 }
 0x508   : > { %5092 = vmatmul.mubr.bf16.gmra.mxu0 %v10274_v21  ;;  %6968 = vmatprep.mubr.bf16.mxu1 %v10153_v17  ;;  %v7880_v17 = vcombine.high %v5280_v57, %v5281_v59  ;;  %v7879_v26 = vcombine.low %v5280_v57, %v5281_v59 }
 0x509   : > { %5692 = vmatpush1.bf16.msra.mxu0 %v7855_v35  ;;  %5711 = vmatprep.mubr.bf16.mxu0 %v10005_v51  ;;  %v5908_v35 = vld [vmem:[#allocation16 + $0x490] sm:$0xff] }
 0x50a   : > { %5693 = vmatprep.subr.bf16.mxu0 %v7854_v58  ;;  %v5909_v58 = vld [vmem:[#allocation16 + $0x4b0] sm:$0xff] }
 0x50b   : > { %v7922_v8 = vcombine.high %v5908_v35, %v5909_v58  ;;  %v7921_v23 = vcombine.low %v5908_v35, %v5909_v58 }
 0x50d   : > { %5694 = vmatpush1.bf16.msra.mxu0 %v7853_v53  ;;  %v5906_v53 = vld [vmem:[#allocation16 + $0x450] sm:$0xff] }
 0x50e   : > { %5695 = vmatprep.subr.bf16.mxu0 %v7884_v42  ;;  %v5907_v42 = vld [vmem:[#allocation16 + $0x470] sm:$0xff] }
 0x50f   : > { %6969 = vmatmul.mubr.bf16.gmra.mxu1 %v10067_v4  ;;  %v5275_v4 = vld [vmem:[#allocation16 + $0x6a8] sm:$0xff]  ;;  %v7920_v13 = vcombine.high %v5906_v53, %v5907_v42  ;;  %v7919_v57 = vcombine.low %v5906_v53, %v5907_v42 }
 0x510   : > { %v7874_v0 = vcombine.high %v5274_v22, %v5275_v4  ;;  %v7873_v56 = vcombine.low %v5274_v22, %v5275_v4 }
 0x511   : > { %5696 = vmatpush2.bf16.msra.mxu0 %v7883_v20  ;;  %v5904_v20 = vld [vmem:[#allocation16 + $0x410] sm:$0xff] }
 0x512   : > { %5697 = vmatprep.subr.bf16.mxu0 %v7882_v18  ;;  %v5905_v18 = vld [vmem:[#allocation16 + $0x430] sm:$0xff] }
 0x513   : > { %v7918_v59 = vcombine.high %v5904_v20, %v5905_v18  ;;  %v7917_v11 = vcombine.low %v5904_v20, %v5905_v18 }
 0x515   : > { %5698 = vmatpush2.bf16.msra.mxu0 %v7881_v12  ;;  %v5934_v12 = vld [vmem:[#allocation16 + $0x7d0] sm:$0xff] }
 0x516   : > { %5699 = vmatprep.subr.bf16.mxu0 %v7880_v17  ;;  %v5935_v17 = vld [vmem:[#allocation16 + $0x7f0] sm:$0xff] }
 0x517   : > { %v7948_v40 = vcombine.high %v5934_v12, %v5935_v17  ;;  %v7947_v34 = vcombine.low %v5934_v12, %v5935_v17 }
 0x519   : > { %5700 = vmatpush2.bf16.msra.mxu0 %v7879_v26  ;;  %v5932_v26 = vld [vmem:[#allocation16 + $0x790] sm:$0xff] }
 0x51a   : > { %5701 = vmatprep.subr.bf16.mxu0 %v7878_v10  ;;  %v5933_v10 = vld [vmem:[#allocation16 + $0x7b0] sm:$0xff] }
 0x51b   : > { %v7946_v39 = vcombine.high %v5932_v26, %v5933_v10  ;;  %v7945_v22 = vcombine.low %v5932_v26, %v5933_v10 }
 0x51d   : > { %5702 = vmatpush2.bf16.msra.mxu0 %v7877_v3  ;;  %v5930_v3 = vld [vmem:[#allocation16 + $0x750] sm:$0xff] }
 0x51e   : > { %5703 = vmatprep.subr.bf16.mxu0 %v7876_v14  ;;  %v5931_v14 = vld [vmem:[#allocation16 + $0x770] sm:$0xff] }
 0x51f   : > { %v7944_v4 = vcombine.high %v5930_v3, %v5931_v14  ;;  %v7943_v9 = vcombine.low %v5930_v3, %v5931_v14 }
 0x521   : > { %5704 = vmatpush2.bf16.msra.mxu0 %v7875_v25  ;;  %v5928_v25 = vld [vmem:[#allocation16 + $0x710] sm:$0xff] }
 0x522   : > { %5705 = vmatprep.subr.bf16.mxu0 %v7874_v0  ;;  %v5929_v0 = vld [vmem:[#allocation16 + $0x730] sm:$0xff] }
 0x523   : > { %v7942_v5 = vcombine.high %v5928_v25, %v5929_v0  ;;  %v7941_v60 = vcombine.low %v5928_v25, %v5929_v0 }
 0x525   : > { %5706 = vmatpush2.bf16.msra.mxu0 %v7873_v56  ;;  %v5926_v56 = vld [vmem:[#allocation16 + $0x6d0] sm:$0xff] }
 0x526   : > { %5707 = vmatprep.subr.bf16.mxu0 %v7872_v44  ;;  %v5927_v44 = vld [vmem:[#allocation16 + $0x6f0] sm:$0xff] }
 0x527   : > { %v7940_v38 = vcombine.high %v5926_v56, %v5927_v44  ;;  %v7939_v43 = vcombine.low %v5926_v56, %v5927_v44 }
 0x529   : > { %5708 = vmatpush2.bf16.msra.mxu0 %v7871_v27  ;;  %v5924_v27 = vld [vmem:[#allocation16 + $0x690] sm:$0xff] }
 0x52a   : > { %5709 = vmatprep.subr.bf16.mxu0 %v7870_v15  ;;  %v5925_v15 = vld [vmem:[#allocation16 + $0x6b0] sm:$0xff] }
 0x52b   : > { %v7938_v19 = vcombine.high %v5924_v27, %v5925_v15  ;;  %v7937_v37 = vcombine.low %v5924_v27, %v5925_v15  ;;  %v4990_v15 = vpop.f32.mrf.mxu1 }
 0x52d   : > { %5710 = vmatpush2.bf16.msra.mxu0 %v7869_v30  ;;  %v5922_v30 = vld [vmem:[#allocation16 + $0x650] sm:$0xff] }
 0x52e   : > { %6329 = vmatprep.subr.bf16.mxu0 %v7932_v52  ;;  %v5923_v52 = vld [vmem:[#allocation16 + $0x670] sm:$0xff] }
 0x52f   : > { %v7936_v24 = vcombine.high %v5922_v30, %v5923_v52  ;;  %v7935_v63 = vcombine.low %v5922_v30, %v5923_v52  ;;  %v6579_v30 = vld [vmem:[#allocation16 + $0x738] sm:$0xff]  ;;  %v4992_v52 = vpop.f32.mrf.mxu1 }
 0x530   : > { %5712 = vmatmul.mubr.bf16.vlgmr.msra.gmra.mxu0 %v10242_v45 }
 0x531   : > { %5721 = vmatprep.mubr.bf16.mxu0 %v10022_v46  ;;  %6330 = vmatpush1.bf16.msra.mxu0 %v7931_v2  ;;  %v5920_v2 = vld [vmem:[#allocation16 + $0x610] sm:$0xff] }
 0x532   : > { %6331 = vmatprep.subr.bf16.mxu0 %v7930_v62  ;;  %v5921_v62 = vld [vmem:[#allocation16 + $0x630] sm:$0xff] }
 0x533   : > { %v7934_v31 = vcombine.high %v5920_v2, %v5921_v62  ;;  %v7933_v16 = vcombine.low %v5920_v2, %v5921_v62  ;;  %v6577_v2 = vld [vmem:[#allocation16 + $0x6f8] sm:$0xff] }
 0x535   : > { %6332 = vmatpush1.bf16.msra.mxu0 %v7929_v50  ;;  %v6568_v50 = vld [vmem:[#allocation16 + $0x5d8] sm:$0xff] }
 0x536   : > { %6333 = vmatprep.subr.bf16.mxu0 %v7928_v7  ;;  %v6569_v7 = vld [vmem:[#allocation16 + $0x5f8] sm:$0xff] }
 0x537   : > { %v7996_v29 = vcombine.high %v6568_v50, %v6569_v7  ;;  %v7995_v47 = vcombine.low %v6568_v50, %v6569_v7  ;;  %v6574_v50 = vld [vmem:[#allocation16 + $0x698] sm:$0xff] }
 0x538   : > { %5722 = vmatmul.mubr.bf16.gmra.mxu0 %v10255_v48  ;;  %v6575_v7 = vld [vmem:[#allocation16 + $0x6b8] sm:$0xff] }
 0x539   : > { %5731 = vmatprep.mubr.bf16.mxu0 %v10039_v61  ;;  %6334 = vmatpush1.bf16.msra.mxu0 %v7927_v41  ;;  %v6566_v41 = vld [vmem:[#allocation16 + $0x598] sm:$0xff] }
 0x53a   : > { %6335 = vmatprep.subr.bf16.mxu0 %v7926_v33  ;;  %v6567_v33 = vld [vmem:[#allocation16 + $0x5b8] sm:$0xff] }
 0x53b   : > { %v7994_v49 = vcombine.high %v6566_v41, %v6567_v33  ;;  %v7993_v35 = vcombine.low %v6566_v41, %v6567_v33  ;;  %v8002_v41 = vcombine.high %v6574_v50, %v6575_v7  ;;  %v6572_v33 = vld [vmem:[#allocation16 + $0x658] sm:$0xff] }
 0x53d   : > { %6336 = vmatpush1.bf16.msra.mxu0 %v7925_v28  ;;  %v6564_v28 = vld [vmem:[#allocation16 + $0x558] sm:$0xff] }
 0x53e   : > { %6337 = vmatprep.subr.bf16.mxu0 %v7924_v36  ;;  %v6565_v36 = vld [vmem:[#allocation16 + $0x578] sm:$0xff] }
 0x53f   : > { %v7992_v58 = vcombine.high %v6564_v28, %v6565_v36  ;;  %v7991_v53 = vcombine.low %v6564_v28, %v6565_v36 }
 0x540   : > { %5732 = vmatmul.mubr.bf16.gmra.mxu0 %v10267_v6 }
 0x541   : > { %5741 = vmatprep.mubr.bf16.mxu0 %v10043_v32  ;;  %6338 = vmatpush1.bf16.msra.mxu0 %v7923_v54  ;;  %v6562_v54 = vld [vmem:[#allocation16 + $0x518] sm:$0xff] }
 0x542   : > { %6339 = vmatprep.subr.bf16.mxu0 %v7922_v8  ;;  %v6563_v8 = vld [vmem:[#allocation16 + $0x538] sm:$0xff] }
 0x543   : > { %v7990_v42 = vcombine.high %v6562_v54, %v6563_v8  ;;  %v7989_v20 = vcombine.low %v6562_v54, %v6563_v8 }
 0x545   : > { %6340 = vmatpush1.bf16.msra.mxu0 %v7921_v23  ;;  %v6560_v23 = vld [vmem:[#allocation16 + $0x4d8] sm:$0xff] }
 0x546   : > { %6341 = vmatprep.subr.bf16.mxu0 %v7920_v13  ;;  %v6561_v13 = vld [vmem:[#allocation16 + $0x4f8] sm:$0xff] }
 0x547   : > { %v7988_v18 = vcombine.high %v6560_v23, %v6561_v13  ;;  %v7987_v12 = vcombine.low %v6560_v23, %v6561_v13  ;;  %v5102_v13 = vld [vmem:[%s10694_s8] sm:$0x3] }
 0x548   : > { %5742 = vmatmul.mubr.bf16.gmra.mxu0 %v10274_v21 }
 0x549   : > { %6342 = vmatpush1.bf16.msra.mxu0 %v7919_v57  ;;  %6361 = vmatprep.mubr.bf16.mxu0 %v10005_v51  ;;  %v6558_v57 = vld [vmem:[#allocation16 + $0x498] sm:$0xff] }
 0x54a   : > { %6343 = vmatprep.subr.bf16.mxu0 %v7918_v59  ;;  %v6559_v59 = vld [vmem:[#allocation16 + $0x4b8] sm:$0xff] }
 0x54b   : > { %v7986_v17 = vcombine.high %v6558_v57, %v6559_v59  ;;  %v7985_v26 = vcombine.low %v6558_v57, %v6559_v59  ;;  %v10304_v57 = vrot.slane %v5102_v13, %v9762_v55 }
 0x54d   : > { %6344 = vmatpush1.bf16.msra.mxu0 %v7917_v11  ;;  %v6556_v11 = vld [vmem:[#allocation16 + $0x458] sm:$0xff] }
 0x54e   : > { %6345 = vmatprep.subr.bf16.mxu0 %v7948_v40  ;;  %v6557_v40 = vld [vmem:[#allocation16 + $0x478] sm:$0xff] }
 0x54f   : > { %v7984_v10 = vcombine.high %v6556_v11, %v6557_v40  ;;  %v7983_v3 = vcombine.low %v6556_v11, %v6557_v40  ;;  %v10312_v11 = vrot.slane %v5102_v13, %v9771_v1 }
 0x551   : > { %6346 = vmatpush2.bf16.msra.mxu0 %v7947_v34  ;;  %v6554_v34 = vld [vmem:[#allocation16 + $0x418] sm:$0xff] }
 0x552   : > { %6347 = vmatprep.subr.bf16.mxu0 %v7946_v39  ;;  %v6555_v39 = vld [vmem:[#allocation16 + $0x438] sm:$0xff] }
 0x553   : > { %v7982_v14 = vcombine.high %v6554_v34, %v6555_v39  ;;  %v7981_v25 = vcombine.low %v6554_v34, %v6555_v39 }
 0x555   : > { %6348 = vmatpush2.bf16.msra.mxu0 %v7945_v22  ;;  %v6584_v22 = vld [vmem:[#allocation16 + $0x7d8] sm:$0xff] }
 0x556   : > { %6349 = vmatprep.subr.bf16.mxu0 %v7944_v4  ;;  %v6585_v4 = vld [vmem:[#allocation16 + $0x7f8] sm:$0xff] }
 0x557   : > { %v8012_v0 = vcombine.high %v6584_v22, %v6585_v4  ;;  %v8011_v56 = vcombine.low %v6584_v22, %v6585_v4 }
 0x559   : > { %6350 = vmatpush2.bf16.msra.mxu0 %v7943_v9  ;;  %v6582_v9 = vld [vmem:[#allocation16 + $0x798] sm:$0xff] }
 0x55a   : > { %6351 = vmatprep.subr.bf16.mxu0 %v7942_v5  ;;  %v6583_v5 = vld [vmem:[#allocation16 + $0x7b8] sm:$0xff] }
 0x55b   : > { %v8010_v44 = vcombine.high %v6582_v9, %v6583_v5  ;;  %v8009_v27 = vcombine.low %v6582_v9, %v6583_v5 }
 0x55d   : > { %6352 = vmatpush2.bf16.msra.mxu0 %v7941_v60  ;;  %v6580_v60 = vld [vmem:[#allocation16 + $0x758] sm:$0xff] }
 0x55e   : > { %6353 = vmatprep.subr.bf16.mxu0 %v7940_v38  ;;  %v6581_v38 = vld [vmem:[#allocation16 + $0x778] sm:$0xff] }
 0x561   : > { %6354 = vmatpush2.bf16.msra.mxu0 %v7939_v43  ;;  %v8008_v43 = vcombine.high %v6580_v60, %v6581_v38 }
 0x562   : > { %6355 = vmatprep.subr.bf16.mxu0 %v7938_v19  ;;  %v6578_v19 = vld [vmem:[#allocation16 + $0x718] sm:$0xff] }
 0x563   : > { %v8005_v62 = vcombine.low %v6578_v19, %v6579_v30 }
 0x565   : > { %6356 = vmatpush2.bf16.msra.mxu0 %v7937_v37  ;;  %v8006_v37 = vcombine.high %v6578_v19, %v6579_v30 }
 0x566   : > { %6357 = vmatprep.subr.bf16.mxu0 %v7936_v24  ;;  %v6576_v24 = vld [vmem:[#allocation16 + $0x6d8] sm:$0xff] }
 0x569   : > { %6358 = vmatpush2.bf16.msra.mxu0 %v7935_v63  ;;  %v4994_v63 = vpop.f32.mrf.mxu1 }
 0x56a   : > { %6359 = vmatprep.subr.bf16.mxu0 %v7934_v31  ;;  %v8004_v31 = vcombine.high %v6576_v24, %v6577_v2 }
 0x56d   : > { %6360 = vmatpush2.bf16.msra.mxu0 %v7933_v16  ;;  %v8003_v16 = vcombine.low %v6576_v24, %v6577_v2 }
 0x56e   : > { %6979 = vmatprep.subr.bf16.mxu0 %v7996_v29  ;;  %v4996_v29 = vpop.f32.mrf.mxu1 }
 0x570   : > { %6362 = vmatmul.mubr.bf16.vlgmr.msra.gmra.mxu0 %v10242_v45  ;;  %v5000_v28 = vpop.f32.mrf.mxu1 }
 0x571   : > { %6371 = vmatprep.mubr.bf16.mxu0 %v10022_v46  ;;  %6980 = vmatpush1.bf16.msra.mxu0 %v7995_v47  ;;  %v6573_v47 = vld [vmem:[#allocation16 + $0x678] sm:$0xff] }
 0x572   : > { %6981 = vmatprep.subr.bf16.mxu0 %v7994_v49  ;;  %v8001_v49 = vcombine.low %v6574_v50, %v6575_v7  ;;  %v8000_v36 = vcombine.high %v6572_v33, %v6573_v47  ;;  %v7999_v54 = vcombine.low %v6572_v33, %v6573_v47  ;;  %v5002_v8 = vpop.f32.mrf.mxu1  ;;  %v5162_v7 = vld [vmem:[%s9490_s21 + $0x80] sm:$0xff]  ;;  %v5163_v47 = vld [vmem:[%s9490_s21 + $0x88] sm:$0xff] }
 0x574   : > { %v5004_v23 = vpop.f32.mrf.mxu1 }
 0x575   : > { %6982 = vmatpush1.bf16.msra.mxu0 %v7993_v35  ;;  %v6570_v35 = vld [vmem:[#allocation16 + $0x618] sm:$0xff] }
 0x576   : > { %6983 = vmatprep.subr.bf16.mxu0 %v7992_v58  ;;  %v6571_v58 = vld [vmem:[#allocation16 + $0x638] sm:$0xff] }
 0x578   : > { %6372 = vmatmul.mubr.bf16.gmra.mxu0 %v10255_v48 }
 0x579   : > { %6381 = vmatprep.mubr.bf16.mxu0 %v10039_v61  ;;  %6984 = vmatpush1.bf16.msra.mxu0 %v7991_v53  ;;  %v7998_v53 = vcombine.high %v6570_v35, %v6571_v58 }
 0x57a   : > { %6985 = vmatprep.subr.bf16.mxu0 %v7990_v42  ;;  %v7997_v42 = vcombine.low %v6570_v35, %v6571_v58 }
 0x57d   : > { %6986 = vmatpush1.bf16.msra.mxu0 %v7989_v20  ;;  %v5006_v20 = vpop.f32.mrf.mxu1 }
 0x57e   : > { %6987 = vmatprep.subr.bf16.mxu0 %v7988_v18  ;;  %v5130_v18 = vld [vmem:[%s10695_s9] sm:$0x3] }
 0x57f   : > { %v5010_v40 = vpop.f32.mrf.mxu1  ;;  %v10316_v39 = vrot.slane %v5130_v18, %v9771_v1 }
 0x580   : > { %6382 = vmatmul.mubr.bf16.gmra.mxu0 %v10267_v6 }
 0x581   : > { %6391 = vmatprep.mubr.bf16.mxu0 %v10043_v32  ;;  %6988 = vmatpush1.bf16.msra.mxu0 %v7987_v12 }
 0x582   : > { %6989 = vmatprep.subr.bf16.mxu0 %v7986_v17  ;;  %v10308_v17 = vrot.slane %v5130_v18, %v9762_v55 }
 0x585   : > { %6990 = vmatpush1.bf16.msra.mxu0 %v7985_v26 }
 0x586   : > { %6991 = vmatprep.subr.bf16.mxu0 %v7984_v10 }
 0x588   : > { %6392 = vmatmul.mubr.bf16.gmra.mxu0 %v10274_v21 }
 0x589   : > { %6992 = vmatpush1.bf16.msra.mxu0 %v7983_v3  ;;  %7011 = vmatprep.mubr.bf16.mxu0 %v10005_v51  ;;  %v8007_v51 = vcombine.low %v6580_v60, %v6581_v38  ;;  %v5160_v60 = vld [vmem:[%s9490_s21 + $0x40] sm:$0xff] }
 0x58a   : > { %6993 = vmatprep.subr.bf16.mxu0 %v7982_v14 }
 0x58d   : > { %6994 = vmatpush1.bf16.msra.mxu0 %v7981_v25  ;;  %v5159_v25 = vld [vmem:[%s9490_s21 + $0x8] sm:$0xff] }
 0x58e   : > { %6995 = vmatprep.subr.bf16.mxu0 %v8012_v0 }
 0x591   : > { %6996 = vmatpush2.bf16.msra.mxu0 %v8011_v56 }
 0x592   : > { %6997 = vmatprep.subr.bf16.mxu0 %v8010_v44 }
 0x595   : > { %6998 = vmatpush2.bf16.msra.mxu0 %v8009_v27 }
 0x596   : > { %6999 = vmatprep.subr.bf16.mxu0 %v8008_v43 }
 0x599   : > { %7000 = vmatpush2.bf16.msra.mxu0 %v8007_v51  ;;  %v5161_v51 = vld [vmem:[%s9490_s21 + $0x48] sm:$0xff] }
 0x59a   : > { %7001 = vmatprep.subr.bf16.mxu0 %v8006_v37 }
 0x59d   : > { %7002 = vmatpush2.bf16.msra.mxu0 %v8005_v62 }
 0x59e   : > { %7003 = vmatprep.subr.bf16.mxu0 %v8004_v31 }
 0x5a1   : > { %7004 = vmatpush2.bf16.msra.mxu0 %v8003_v16 }
 0x5a2   : > { %7005 = vmatprep.subr.bf16.mxu0 %v8002_v41 }
 0x5a5   : > { %7006 = vmatpush2.bf16.msra.mxu0 %v8001_v49 }
 0x5a6   : > { %7007 = vmatprep.subr.bf16.mxu0 %v8000_v36 }
 0x5a9   : > { %7008 = vmatpush2.bf16.msra.mxu0 %v7999_v54 }
 0x5aa   : > { %7009 = vmatprep.subr.bf16.mxu0 %v7998_v53 }
 0x5ad   : > { %7010 = vmatpush2.bf16.msra.mxu0 %v7997_v42 }
 0x5b0   : > { %7012 = vmatmul.mubr.bf16.vlgmr.msra.gmra.mxu0 %v10242_v45  ;;  %v5063_v59 = vpop.f32.mrf.mxu0  ;;  %v5158_v45 = vld [vmem:[%s9490_s21] sm:$0xff] }
 0x5b1   : > { %v5064_v12 = vadd.f32 %v5063_v59, %v4990_v15  ;;  %7021 = vmatprep.mubr.bf16.mxu0 %v10022_v46  ;;  %v5012_v46 = vpop.f32.mrf.mxu1 }
 0x5b2   : > { %v5065_v26 = vpop.f32.mrf.mxu0 }
 0x5b3   : > { %v5114_v10 = vmul.f32 %v10304_v57, %v5064_v12  ;;  %v5066_v34 = vadd.f32 %v5065_v26, %v4992_v52  ;;  %v5014_v30 = vpop.f32.mrf.mxu1 }
 0x5b4   : > { %v5067_v3 = vpop.f32.mrf.mxu0 }
 0x5b5   : > { %v5142_v14 = vadd.f32 %v10308_v17, %v5114_v10  ;;  %v5115_v22 = vmul.f32 %v10312_v11, %v5066_v34  ;;  %v5068_v4 = vadd.f32 %v5067_v3, %v4994_v63  ;;  %v5016_v41 = vpop.f32.mrf.mxu1  ;;  %v5166_v3 = vld [vmem:[%s9490_s21 + $0x100] sm:$0xff] }
 0x5b6   : > { %v5069_v0 = vpop.f32.mrf.mxu0 }
 0x5b7   : > { %v5174_v9 = vadd.f32 %v5158_v45, %v5142_v14  ;;  %v5143_v5 = vadd.f32 %v10316_v39, %v5115_v22  ;;  %v5116_v56 = vmul.f32 %v10304_v57, %v5068_v4  ;;  %v5070_v44 = vadd.f32 %v5069_v0, %v4996_v29  ;;  %v5020_v59 = vpop.f32.mrf.mxu1 }
 0x5b8   : > { %7022 = vmatmul.mubr.bf16.gmra.mxu0 %v10255_v48  ;;  %v5073_v38 = vpop.f32.mrf.mxu0 }
 0x5b9   : > { %v5190_v27 = vmax.f32 %v5174_v9, 0.0  ;;  %v5175_v15 = vadd.f32 %v5159_v25, %v5143_v5  ;;  %v5144_v43 = vadd.f32 %v10308_v17, %v5116_v56  ;;  %v5117_v19 = vmul.f32 %v10312_v11, %v5070_v44  ;;  %7031 = vmatprep.mubr.bf16.mxu0 %v10039_v61  ;;  %v5022_v0 = vpop.f32.mrf.mxu1 }
 0x5ba   : > { %v5074_v52 = vadd.f32 %v5073_v38, %v5000_v28  ;;  %v5075_v37 = vpop.f32.mrf.mxu0 }
 0x5bb   : > { %5206 = vst [vmem:[%s10332_s25] sm:$0xff] %v5190_v27  ;;  %v5191_v48 = vmax.f32 %v5175_v15, 0.0  ;;  %v5176_v24 = vadd.f32 %v5160_v60, %v5144_v43  ;;  %v5145_v2 = vadd.f32 %v10316_v39, %v5117_v19  ;;  %v5076_v62 = vadd.f32 %v5075_v37, %v5002_v8  ;;  %v5164_v8 = vld [vmem:[%s9490_s21 + $0xc0] sm:$0xff]  ;;  %v5167_v60 = vld [vmem:[%s9490_s21 + $0x108] sm:$0xff]  ;;  %v5024_v37 = vpop.f32.mrf.mxu1 }
 0x5bc   : > { %v5118_v61 = vmul.f32 %v10304_v57, %v5074_v52  ;;  %v5077_v63 = vpop.f32.mrf.mxu0  ;;  %v5168_v15 = vld [vmem:[%s9490_s21 + $0x140] sm:$0xff] }
 0x5bd   : > { %5207 = vst [vmem:[%s10332_s25 + $0x8] sm:$0xff] %v5191_v48  ;;  %v5192_v31 = vmax.f32 %v5176_v24, 0.0  ;;  %v5177_v50 = vadd.f32 %v5161_v51, %v5145_v2  ;;  %v5119_v16 = vmul.f32 %v10312_v11, %v5076_v62  ;;  %v5078_v29 = vadd.f32 %v5077_v63, %v5004_v23  ;;  %v5169_v24 = vld [vmem:[%s9490_s21 + $0x148] sm:$0xff] }
 0x5be   : > { %v5146_v33 = vadd.f32 %v10308_v17, %v5118_v61  ;;  %v5079_v49 = vpop.f32.mrf.mxu0 }
 0x5bf   : > { %5208 = vst [vmem:[%s10332_s25 + $0x40] sm:$0xff] %v5192_v31  ;;  %v5193_v28 = vmax.f32 %v5177_v50, 0.0  ;;  %v5147_v36 = vadd.f32 %v10316_v39, %v5119_v16  ;;  %v5120_v35 = vmul.f32 %v10304_v57, %v5078_v29  ;;  %v5080_v58 = vadd.f32 %v5079_v49, %v5006_v20  ;;  %v5165_v20 = vld [vmem:[%s9490_s21 + $0xc8] sm:$0xff]  ;;  %v5170_v50 = vld [vmem:[%s9490_s21 + $0x180] sm:$0xff] }
 0x5c0   : > { %v5178_v54 = vadd.f32 %v5162_v7, %v5146_v33  ;;  %7032 = vmatmul.mubr.bf16.gmra.mxu0 %v10267_v6  ;;  %v5083_v53 = vpop.f32.mrf.mxu0  ;;  %v5171_v49 = vld [vmem:[%s9490_s21 + $0x188] sm:$0xff] }
 0x5c1   : > { %5209 = vst [vmem:[%s10332_s25 + $0x48] sm:$0xff] %v5193_v28  ;;  %v5179_v42 = vadd.f32 %v5163_v47, %v5147_v36  ;;  %v5148_v23 = vadd.f32 %v10308_v17, %v5120_v35  ;;  %v5121_v13 = vmul.f32 %v10312_v11, %v5080_v58  ;;  %v5084_v18 = vadd.f32 %v5083_v53, %v5010_v40  ;;  %v5026_v47 = vpop.f32.mrf.mxu1 }
 0x5c2   : > { %7041 = vmatprep.mubr.bf16.mxu0 %v10043_v32  ;;  %v5194_v12 = vmax.f32 %v5178_v54, 0.0  ;;  %v5085_v26 = vpop.f32.mrf.mxu0 }
 0x5c3   : > { %v5195_v10 = vmax.f32 %v5179_v42, 0.0  ;;  %v5180_v6 = vadd.f32 %v5164_v8, %v5148_v23  ;;  %v5149_v34 = vadd.f32 %v10316_v39, %v5121_v13  ;;  %v5122_v45 = vmul.f32 %v10304_v57, %v5084_v18  ;;  %v5172_v13 = vld [vmem:[%s9490_s21 + $0x1c0] sm:$0xff] }
 0x5c4   : > { %5210 = vst [vmem:[%s10332_s25 + $0x80] sm:$0xff] %v5194_v12  ;;  %v5086_v14 = vadd.f32 %v5085_v26, %v5012_v46  ;;  %v5087_v22 = vpop.f32.mrf.mxu0 }
 0x5c5   : > { %5211 = vst [vmem:[%s10332_s25 + $0x88] sm:$0xff] %v5195_v10  ;;  %v5196_v40 = vmax.f32 %v5180_v6, 0.0  ;;  %v5181_v32 = vadd.f32 %v5165_v20, %v5149_v34  ;;  %v5150_v4 = vadd.f32 %v10308_v17, %v5122_v45  ;;  %v5088_v25 = vadd.f32 %v5087_v22, %v5014_v30  ;;  %v5173_v20 = vld [vmem:[%s9490_s21 + $0x1c8] sm:$0xff] }
 0x5c6   : > { %v5123_v9 = vmul.f32 %v10312_v11, %v5086_v14  ;;  %v5089_v5 = vpop.f32.mrf.mxu0 }
 0x5c7   : > { %5212 = vst [vmem:[%s10332_s25 + $0xc0] sm:$0xff] %v5196_v40  ;;  %v5197_v56 = vmax.f32 %v5181_v32, 0.0  ;;  %v5182_v44 = vadd.f32 %v5166_v3, %v5150_v4  ;;  %v5124_v46 = vmul.f32 %v10304_v57, %v5088_v25  ;;  %v5090_v38 = vadd.f32 %v5089_v5, %v5016_v41 }
 0x5c8   : > { %v5151_v27 = vadd.f32 %v10316_v39, %v5123_v9  ;;  %7042 = vmatmul.mubr.bf16.gmra.mxu0 %v10274_v21  ;;  %v5093_v43 = vpop.f32.mrf.mxu0 }
 0x5c9   : > { %5213 = vst [vmem:[%s10332_s25 + $0xc8] sm:$0xff] %v5197_v56  ;;  %v5198_v19 = vmax.f32 %v5182_v44, 0.0  ;;  %v5152_v30 = vadd.f32 %v10308_v17, %v5124_v46  ;;  %v5125_v51 = vmul.f32 %v10312_v11, %v5090_v38  ;;  %v5094_v52 = vadd.f32 %v5093_v43, %v5020_v59  ;;  %v5640_v59 = vpop.f32.mrf.mxu1 }
 0x5ca   : > { %v5183_v48 = vadd.f32 %v5167_v60, %v5151_v27  ;;  %v5095_v2 = vpop.f32.mrf.mxu0 }
 0x5cb   : > { %5214 = vst [vmem:[%s10332_s25 + $0x100] sm:$0xff] %v5198_v19  ;;  %v5184_v62 = vadd.f32 %v5168_v15, %v5152_v30  ;;  %v5153_v21 = vadd.f32 %v10316_v39, %v5125_v51  ;;  %v5126_v61 = vmul.f32 %v10304_v57, %v5094_v52  ;;  %v5096_v63 = vadd.f32 %v5095_v2, %v5022_v0  ;;  %v5808_v15 = vld [vmem:[%s9490_s21 + $0x10] sm:$0xff] }
 0x5cc   : > { %v5199_v31 = vmax.f32 %v5183_v48, 0.0  ;;  %v5097_v7 = vpop.f32.mrf.mxu0 }
 0x5cd   : > { %v5200_v16 = vmax.f32 %v5184_v62, 0.0  ;;  %v5185_v29 = vadd.f32 %v5169_v24, %v5153_v21  ;;  %v5154_v41 = vadd.f32 %v10308_v17, %v5126_v61  ;;  %v5127_v33 = vmul.f32 %v10312_v11, %v5096_v63  ;;  %v5810_v61 = vld [vmem:[%s9490_s21 + $0x50] sm:$0xff] }
 0x5ce   : > { %5215 = vst [vmem:[%s10332_s25 + $0x108] sm:$0xff] %v5199_v31  ;;  %v5098_v28 = vadd.f32 %v5097_v7, %v5024_v37  ;;  %v5099_v36 = vpop.f32.mrf.mxu0  ;;  %v5809_v37 = vld [vmem:[%s9490_s21 + $0x18] sm:$0xff] }
 0x5cf   : > { %5216 = vst [vmem:[%s10332_s25 + $0x140] sm:$0xff] %v5200_v16  ;;  %v5201_v35 = vmax.f32 %v5185_v29, 0.0  ;;  %v5186_v58 = vadd.f32 %v5170_v50, %v5154_v41  ;;  %v5155_v54 = vadd.f32 %v10316_v39, %v5127_v33  ;;  %v5100_v8 = vadd.f32 %v5099_v36, %v5026_v47  ;;  %v5811_v41 = vld [vmem:[%s9490_s21 + $0x58] sm:$0xff] }
 0x5d0   : > { %v5128_v53 = vmul.f32 %v10304_v57, %v5098_v28  ;;  %v5642_v57 = vpop.f32.mrf.mxu1 }
 0x5d1   : > { %5217 = vst [vmem:[%s10332_s25 + $0x148] sm:$0xff] %v5201_v35  ;;  %v5202_v42 = vmax.f32 %v5186_v58, 0.0  ;;  %v5187_v23 = vadd.f32 %v5171_v49, %v5155_v54  ;;  %v5129_v18 = vmul.f32 %v10312_v11, %v5100_v8 }
 0x5d2   : > { %v5156_v12 = vadd.f32 %v10308_v17, %v5128_v53  ;;  %v5644_v14 = vpop.f32.mrf.mxu1  ;;  %v5752_v17 = vld [vmem:[%s10694_s8 + $0x2] sm:$0x3] }
 0x5d3   : > { %5218 = vst [vmem:[%s10332_s25 + $0x180] sm:$0xff] %v5202_v42  ;;  %v5203_v26 = vmax.f32 %v5187_v23, 0.0  ;;  %v5157_v10 = vadd.f32 %v10316_v39, %v5129_v18  ;;  %v5780_v39 = vld [vmem:[%s10695_s9 + $0x2] sm:$0x3]  ;;  %v10397_v25 = vrot.slane %v5752_v17, %v9762_v55  ;;  %v10403_v56 = vrot.slane %v5752_v17, %v9771_v1  ;;  %v5812_v42 = vld [vmem:[%s9490_s21 + $0x90] sm:$0xff] }
 0x5d4   : > { %v5188_v6 = vadd.f32 %v5172_v13, %v5156_v12  ;;  %v5646_v22 = vpop.f32.mrf.mxu1  ;;  %v10400_v5 = vrot.slane %v5780_v39, %v9762_v55  ;;  %v10407_v27 = vrot.slane %v5780_v39, %v9771_v1  ;;  %v5813_v12 = vld [vmem:[%s9490_s21 + $0x98] sm:$0xff] }
 0x5d5   : > { %5219 = vst [vmem:[%s10332_s25 + $0x188] sm:$0xff] %v5203_v26  ;;  %v5189_v34 = vadd.f32 %v5173_v20, %v5157_v10  ;;  %v5815_v39 = vld [vmem:[%s9490_s21 + $0xd8] sm:$0xff] }
 0x5d6   : > { %v5204_v45 = vmax.f32 %v5188_v6, 0.0  ;;  %v5650_v40 = vpop.f32.mrf.mxu1 }
 0x5d7   : > { %v5205_v3 = vmax.f32 %v5189_v34, 0.0 }
 0x5d8   : > { %5220 = vst [vmem:[%s10332_s25 + $0x1c0] sm:$0xff] %v5204_v45  ;;  %v5652_v11 = vpop.f32.mrf.mxu1  ;;  %v5814_v45 = vld [vmem:[%s9490_s21 + $0xd0] sm:$0xff] }
 0x5d9   : > { %5221 = vst [vmem:[%s10332_s25 + $0x1c8] sm:$0xff] %v5205_v3 }
 0x5da   : > { %v5654_v32 = vpop.f32.mrf.mxu1 }
 0x5dc   : > { %v5656_v4 = vpop.f32.mrf.mxu1 }
 0x5de   : > { %v5660_v44 = vpop.f32.mrf.mxu1 }
 0x5e0   : > { %v5662_v52 = vpop.f32.mrf.mxu1 }
 0x5e2   : > { %v5664_v29 = vpop.f32.mrf.mxu1 }
 0x5e4   : > { %v5666_v18 = vpop.f32.mrf.mxu1 }
 0x5f0   : > { %v5713_v0 = vpop.f32.mrf.mxu0 }
 0x5f1   : > { %v5714_v9 = vadd.f32 %v5713_v0, %v5640_v59 }
 0x5f2   : > { %v5715_v60 = vpop.f32.mrf.mxu0 }
 0x5f3   : > { %v5764_v46 = vmul.f32 %v10397_v25, %v5714_v9  ;;  %v5716_v38 = vadd.f32 %v5715_v60, %v5642_v57 }
 0x5f4   : > { %v5717_v43 = vpop.f32.mrf.mxu0 }
 0x5f5   : > { %v5792_v19 = vadd.f32 %v10400_v5, %v5764_v46  ;;  %v5765_v30 = vmul.f32 %v10403_v56, %v5716_v38  ;;  %v5718_v51 = vadd.f32 %v5717_v43, %v5644_v14  ;;  %v5816_v38 = vld [vmem:[%s9490_s21 + $0x110] sm:$0xff] }
 0x5f6   : > { %v5719_v48 = vpop.f32.mrf.mxu0 }
 0x5f7   : > { %v5824_v24 = vadd.f32 %v5808_v15, %v5792_v19  ;;  %v5793_v2 = vadd.f32 %v10407_v27, %v5765_v30  ;;  %v5766_v62 = vmul.f32 %v10397_v25, %v5718_v51  ;;  %v5720_v21 = vadd.f32 %v5719_v48, %v5646_v22 }
 0x5f8   : > { %v5723_v63 = vpop.f32.mrf.mxu0 }
 0x5f9   : > { %v5840_v31 = vmax.f32 %v5824_v24, 0.0  ;;  %v5825_v50 = vadd.f32 %v5809_v37, %v5793_v2  ;;  %v5794_v7 = vadd.f32 %v10400_v5, %v5766_v62  ;;  %v5767_v16 = vmul.f32 %v10403_v56, %v5720_v21  ;;  %v5817_v21 = vld [vmem:[%s9490_s21 + $0x118] sm:$0xff] }
 0x5fa   : > { %v5724_v33 = vadd.f32 %v5723_v63, %v5650_v40  ;;  %v5725_v47 = vpop.f32.mrf.mxu0 }
 0x5fb   : > { %5856 = vst [vmem:[%s10332_s25 + $0x10] sm:$0xff] %v5840_v31  ;;  %v5841_v49 = vmax.f32 %v5825_v50, 0.0  ;;  %v5826_v28 = vadd.f32 %v5810_v61, %v5794_v7  ;;  %v5795_v36 = vadd.f32 %v10407_v27, %v5767_v16  ;;  %v5726_v35 = vadd.f32 %v5725_v47, %v5652_v11  ;;  %v5818_v31 = vld [vmem:[%s9490_s21 + $0x150] sm:$0xff] }
 0x5fc   : > { %v5768_v58 = vmul.f32 %v10397_v25, %v5724_v33  ;;  %v5727_v54 = vpop.f32.mrf.mxu0 }
 0x5fd   : > { %5857 = vst [vmem:[%s10332_s25 + $0x18] sm:$0xff] %v5841_v49  ;;  %v5842_v8 = vmax.f32 %v5826_v28, 0.0  ;;  %v5827_v53 = vadd.f32 %v5811_v41, %v5795_v36  ;;  %v5769_v23 = vmul.f32 %v10403_v56, %v5726_v35  ;;  %v5728_v13 = vadd.f32 %v5727_v54, %v5654_v32  ;;  %v5670_v32 = vpop.f32.mrf.mxu1  ;;  %v5819_v49 = vld [vmem:[%s9490_s21 + $0x158] sm:$0xff] }
 0x5fe   : > { %v5796_v59 = vadd.f32 %v10400_v5, %v5768_v58  ;;  %v5729_v20 = vpop.f32.mrf.mxu0 }
 0x5ff   : > { %5858 = vst [vmem:[%s10332_s25 + $0x50] sm:$0xff] %v5842_v8  ;;  %v5843_v26 = vmax.f32 %v5827_v53, 0.0  ;;  %v5797_v10 = vadd.f32 %v10407_v27, %v5769_v23  ;;  %v5770_v6 = vmul.f32 %v10397_v25, %v5728_v13  ;;  %v5730_v34 = vadd.f32 %v5729_v20, %v5656_v4  ;;  %v5672_v37 = vpop.f32.mrf.mxu1  ;;  %v5820_v53 = vld [vmem:[%s9490_s21 + $0x190] sm:$0xff]  ;;  %v5821_v20 = vld [vmem:[%s9490_s21 + $0x198] sm:$0xff] }
 0x600   : > { %v5828_v57 = vadd.f32 %v5812_v42, %v5796_v59  ;;  %v5733_v3 = vpop.f32.mrf.mxu0 }
 0x601   : > { %5859 = vst [vmem:[%s10332_s25 + $0x58] sm:$0xff] %v5843_v26  ;;  %v5829_v14 = vadd.f32 %v5813_v12, %v5797_v10  ;;  %v5798_v22 = vadd.f32 %v10400_v5, %v5770_v6  ;;  %v5771_v40 = vmul.f32 %v10403_v56, %v5730_v34  ;;  %v5734_v11 = vadd.f32 %v5733_v3, %v5660_v44  ;;  %v5674_v33 = vpop.f32.mrf.mxu1 }
 0x602   : > { %v5844_v17 = vmax.f32 %v5828_v57, 0.0  ;;  %v5735_v0 = vpop.f32.mrf.mxu0 }
 0x603   : > { %v5845_v9 = vmax.f32 %v5829_v14, 0.0  ;;  %v5830_v4 = vadd.f32 %v5814_v45, %v5798_v22  ;;  %v5799_v60 = vadd.f32 %v10407_v27, %v5771_v40  ;;  %v5772_v46 = vmul.f32 %v10397_v25, %v5734_v11  ;;  %v5676_v12 = vpop.f32.mrf.mxu1  ;;  %v5822_v40 = vld [vmem:[%s9490_s21 + $0x1d0] sm:$0xff] }
 0x604   : > { %5860 = vst [vmem:[%s10332_s25 + $0x90] sm:$0xff] %v5844_v17  ;;  %v5736_v15 = vadd.f32 %v5735_v0, %v5662_v52  ;;  %v5737_v43 = vpop.f32.mrf.mxu0 }
 0x605   : > { %5861 = vst [vmem:[%s10332_s25 + $0x98] sm:$0xff] %v5845_v9  ;;  %v5846_v19 = vmax.f32 %v5830_v4, 0.0  ;;  %v5831_v44 = vadd.f32 %v5815_v39, %v5799_v60  ;;  %v5800_v30 = vadd.f32 %v10400_v5, %v5772_v46  ;;  %v5738_v51 = vadd.f32 %v5737_v43, %v5664_v29  ;;  %v5823_v39 = vld [vmem:[%s9490_s21 + $0x1d8] sm:$0xff] }
 0x606   : > { %v5773_v48 = vmul.f32 %v10403_v56, %v5736_v15  ;;  %v5739_v24 = vpop.f32.mrf.mxu0 }
 0x607   : > { %5862 = vst [vmem:[%s10332_s25 + $0xd0] sm:$0xff] %v5846_v19  ;;  %v5847_v2 = vmax.f32 %v5831_v44, 0.0  ;;  %v5832_v62 = vadd.f32 %v5816_v38, %v5800_v30  ;;  %v5774_v52 = vmul.f32 %v10397_v25, %v5738_v51  ;;  %v5740_v61 = vadd.f32 %v5739_v24, %v5666_v18 }
 0x608   : > { %v5801_v63 = vadd.f32 %v10407_v27, %v5773_v48  ;;  %v5743_v50 = vpop.f32.mrf.mxu0 }
 0x609   : > { %5863 = vst [vmem:[%s10332_s25 + $0xd8] sm:$0xff] %v5847_v2  ;;  %v5848_v7 = vmax.f32 %v5832_v62, 0.0  ;;  %v5802_v16 = vadd.f32 %v10400_v5, %v5774_v52  ;;  %v5775_v29 = vmul.f32 %v10403_v56, %v5740_v61  ;;  %v5744_v41 = vadd.f32 %v5743_v50, %v5670_v32  ;;  %v6290_v32 = vpop.f32.mrf.mxu1 }
 0x60a   : > { %v5833_v47 = vadd.f32 %v5817_v21, %v5801_v63  ;;  %v5745_v28 = vpop.f32.mrf.mxu0 }
 0x60b   : > { %5864 = vst [vmem:[%s10332_s25 + $0x110] sm:$0xff] %v5848_v7  ;;  %v5834_v36 = vadd.f32 %v5818_v31, %v5802_v16  ;;  %v5803_v35 = vadd.f32 %v10407_v27, %v5775_v29  ;;  %v5776_v58 = vmul.f32 %v10397_v25, %v5744_v41  ;;  %v5746_v54 = vadd.f32 %v5745_v28, %v5672_v37  ;;  %v6458_v31 = vld [vmem:[%s9490_s21 + $0x20] sm:$0xff] }
 0x60c   : > { %v5849_v8 = vmax.f32 %v5833_v47, 0.0  ;;  %v5747_v42 = vpop.f32.mrf.mxu0 }
 0x60d   : > { %v5850_v23 = vmax.f32 %v5834_v36, 0.0  ;;  %v5835_v13 = vadd.f32 %v5819_v49, %v5803_v35  ;;  %v5804_v18 = vadd.f32 %v10400_v5, %v5776_v58  ;;  %v5777_v59 = vmul.f32 %v10403_v56, %v5746_v54  ;;  %v6460_v58 = vld [vmem:[%s9490_s21 + $0x60] sm:$0xff] }
 0x60e   : > { %5865 = vst [vmem:[%s10332_s25 + $0x118] sm:$0xff] %v5849_v8  ;;  %v5748_v26 = vadd.f32 %v5747_v42, %v5674_v33  ;;  %v5749_v10 = vpop.f32.mrf.mxu0  ;;  %v6459_v33 = vld [vmem:[%s9490_s21 + $0x28] sm:$0xff] }
 0x60f   : > { %5866 = vst [vmem:[%s10332_s25 + $0x150] sm:$0xff] %v5850_v23  ;;  %v5851_v6 = vmax.f32 %v5835_v13, 0.0  ;;  %v5836_v34 = vadd.f32 %v5820_v53, %v5804_v18  ;;  %v5805_v57 = vadd.f32 %v10407_v27, %v5777_v59  ;;  %v5750_v45 = vadd.f32 %v5749_v10, %v5676_v12  ;;  %v6461_v18 = vld [vmem:[%s9490_s21 + $0x68] sm:$0xff] }
 0x610   : > { %v5778_v3 = vmul.f32 %v10397_v25, %v5748_v26  ;;  %v6292_v25 = vpop.f32.mrf.mxu1 }
 0x611   : > { %5867 = vst [vmem:[%s10332_s25 + $0x158] sm:$0xff] %v5851_v6  ;;  %v5852_v14 = vmax.f32 %v5836_v34, 0.0  ;;  %v5837_v22 = vadd.f32 %v5821_v20, %v5805_v57  ;;  %v5779_v11 = vmul.f32 %v10403_v56, %v5750_v45 }
 0x612   : > { %v5806_v17 = vadd.f32 %v10400_v5, %v5778_v3  ;;  %v6294_v15 = vpop.f32.mrf.mxu1  ;;  %v6402_v5 = vld [vmem:[%s10694_s8 + $0x4] sm:$0x3] }
 0x613   : > { %5868 = vst [vmem:[%s10332_s25 + $0x190] sm:$0xff] %v5852_v14  ;;  %v5853_v0 = vmax.f32 %v5837_v22, 0.0  ;;  %v5807_v9 = vadd.f32 %v10407_v27, %v5779_v11  ;;  %v6430_v27 = vld [vmem:[%s10695_s9 + $0x4] sm:$0x3]  ;;  %v10479_v51 = vrot.slane %v6402_v5, %v9762_v55  ;;  %v10485_v2 = vrot.slane %v6402_v5, %v9771_v1  ;;  %v6462_v14 = vld [vmem:[%s9490_s21 + $0xa0] sm:$0xff] }
 0x614   : > { %v5838_v4 = vadd.f32 %v5822_v40, %v5806_v17  ;;  %v6296_v43 = vpop.f32.mrf.mxu1  ;;  %v10482_v24 = vrot.slane %v6430_v27, %v9762_v55  ;;  %v10489_v63 = vrot.slane %v6430_v27, %v9771_v1  ;;  %v6463_v17 = vld [vmem:[%s9490_s21 + $0xa8] sm:$0xff] }
 0x615   : > { %5869 = vst [vmem:[%s10332_s25 + $0x198] sm:$0xff] %v5853_v0  ;;  %v5839_v60 = vadd.f32 %v5823_v39, %v5807_v9  ;;  %v6465_v27 = vld [vmem:[%s9490_s21 + $0xe8] sm:$0xff] }
 0x616   : > { %v5854_v46 = vmax.f32 %v5838_v4, 0.0  ;;  %v6300_v19 = vpop.f32.mrf.mxu1 }
 0x617   : > { %v5855_v38 = vmax.f32 %v5839_v60, 0.0 }
 0x618   : > { %5870 = vst [vmem:[%s10332_s25 + $0x1d0] sm:$0xff] %v5854_v46  ;;  %v6302_v56 = vpop.f32.mrf.mxu1  ;;  %v6464_v46 = vld [vmem:[%s9490_s21 + $0xe0] sm:$0xff] }
 0x619   : > { %5871 = vst [vmem:[%s10332_s25 + $0x1d8] sm:$0xff] %v5855_v38 }
 0x61a   : > { %v6304_v44 = vpop.f32.mrf.mxu1 }
 0x61c   : > { %v6306_v30 = vpop.f32.mrf.mxu1 }
 0x61e   : > { %v6310_v62 = vpop.f32.mrf.mxu1 }
 0x620   : > { %v6312_v41 = vpop.f32.mrf.mxu1 }
 0x622   : > { %v6314_v13 = vpop.f32.mrf.mxu1 }
 0x624   : > { %v6316_v11 = vpop.f32.mrf.mxu1 }
 0x630   : > { %v6363_v37 = vpop.f32.mrf.mxu0 }
 0x631   : > { %v6364_v48 = vadd.f32 %v6363_v37, %v6290_v32 }
 0x632   : > { %v6365_v21 = vpop.f32.mrf.mxu0 }
 0x633   : > { %v6414_v52 = vmul.f32 %v10479_v51, %v6364_v48  ;;  %v6366_v61 = vadd.f32 %v6365_v21, %v6292_v25 }
 0x634   : > { %v6367_v50 = vpop.f32.mrf.mxu0 }
 0x635   : > { %v6442_v7 = vadd.f32 %v10482_v24, %v6414_v52  ;;  %v6415_v16 = vmul.f32 %v10485_v2, %v6366_v61  ;;  %v6368_v29 = vadd.f32 %v6367_v50, %v6294_v15  ;;  %v6466_v61 = vld [vmem:[%s9490_s21 + $0x120] sm:$0xff] }
 0x636   : > { %v6369_v47 = vpop.f32.mrf.mxu0 }
 0x637   : > { %v6474_v49 = vadd.f32 %v6458_v31, %v6442_v7  ;;  %v6443_v28 = vadd.f32 %v10489_v63, %v6415_v16  ;;  %v6416_v36 = vmul.f32 %v10479_v51, %v6368_v29  ;;  %v6370_v35 = vadd.f32 %v6369_v47, %v6296_v43 }
 0x638   : > { %v6373_v54 = vpop.f32.mrf.mxu0 }
 0x639   : > { %v6490_v8 = vmax.f32 %v6474_v49, 0.0  ;;  %v6475_v53 = vadd.f32 %v6459_v33, %v6443_v28  ;;  %v6444_v42 = vadd.f32 %v10482_v24, %v6416_v36  ;;  %v6417_v23 = vmul.f32 %v10485_v2, %v6370_v35  ;;  %v6467_v35 = vld [vmem:[%s9490_s21 + $0x128] sm:$0xff] }
 0x63a   : > { %v6374_v59 = vadd.f32 %v6373_v54, %v6300_v19  ;;  %v6375_v12 = vpop.f32.mrf.mxu0 }
 0x63b   : > { %6506 = vst [vmem:[%s10332_s25 + $0x20] sm:$0xff] %v6490_v8  ;;  %v6491_v20 = vmax.f32 %v6475_v53, 0.0  ;;  %v6476_v26 = vadd.f32 %v6460_v58, %v6444_v42  ;;  %v6445_v10 = vadd.f32 %v10489_v63, %v6417_v23  ;;  %v6376_v6 = vadd.f32 %v6375_v12, %v6302_v56  ;;  %v6468_v8 = vld [vmem:[%s9490_s21 + $0x160] sm:$0xff] }
 0x63c   : > { %v6418_v34 = vmul.f32 %v10479_v51, %v6374_v59  ;;  %v6377_v57 = vpop.f32.mrf.mxu0 }
 0x63d   : > { %6507 = vst [vmem:[%s10332_s25 + $0x28] sm:$0xff] %v6491_v20  ;;  %v6492_v45 = vmax.f32 %v6476_v26, 0.0  ;;  %v6477_v3 = vadd.f32 %v6461_v18, %v6445_v10  ;;  %v6419_v22 = vmul.f32 %v10485_v2, %v6376_v6  ;;  %v6378_v40 = vadd.f32 %v6377_v57, %v6304_v44  ;;  %v6320_v44 = vpop.f32.mrf.mxu1  ;;  %v6469_v20 = vld [vmem:[%s9490_s21 + $0x168] sm:$0xff] }
 0x63e   : > { %v6446_v32 = vadd.f32 %v10482_v24, %v6418_v34  ;;  %v6379_v39 = vpop.f32.mrf.mxu0 }
 0x63f   : > { %6508 = vst [vmem:[%s10332_s25 + $0x60] sm:$0xff] %v6492_v45  ;;  %v6493_v0 = vmax.f32 %v6477_v3, 0.0  ;;  %v6447_v9 = vadd.f32 %v10489_v63, %v6419_v22  ;;  %v6420_v4 = vmul.f32 %v10479_v51, %v6378_v40  ;;  %v6380_v60 = vadd.f32 %v6379_v39, %v6306_v30  ;;  %v6322_v33 = vpop.f32.mrf.mxu1  ;;  %v6470_v3 = vld [vmem:[%s9490_s21 + $0x1a0] sm:$0xff]  ;;  %v6471_v39 = vld [vmem:[%s9490_s21 + $0x1a8] sm:$0xff] }
 0x640   : > { %v6478_v25 = vadd.f32 %v6462_v14, %v6446_v32  ;;  %v6383_v38 = vpop.f32.mrf.mxu0 }
 0x641   : > { %6509 = vst [vmem:[%s10332_s25 + $0x68] sm:$0xff] %v6493_v0  ;;  %v6479_v15 = vadd.f32 %v6463_v17, %v6447_v9  ;;  %v6448_v43 = vadd.f32 %v10482_v24, %v6420_v4  ;;  %v6421_v19 = vmul.f32 %v10485_v2, %v6380_v60  ;;  %v6384_v56 = vadd.f32 %v6383_v38, %v6310_v62  ;;  %v6324_v59 = vpop.f32.mrf.mxu1 }
 0x642   : > { %v6494_v5 = vmax.f32 %v6478_v25, 0.0  ;;  %v6385_v37 = vpop.f32.mrf.mxu0 }
 0x643   : > { %v6495_v48 = vmax.f32 %v6479_v15, 0.0  ;;  %v6480_v30 = vadd.f32 %v6464_v46, %v6448_v43  ;;  %v6449_v21 = vadd.f32 %v10489_v63, %v6421_v19  ;;  %v6422_v52 = vmul.f32 %v10479_v51, %v6384_v56  ;;  %v6326_v17 = vpop.f32.mrf.mxu1  ;;  %v6472_v19 = vld [vmem:[%s9490_s21 + $0x1e0] sm:$0xff] }
 0x644   : > { %6510 = vst [vmem:[%s10332_s25 + $0xa0] sm:$0xff] %v6494_v5  ;;  %v6386_v31 = vadd.f32 %v6385_v37, %v6312_v41  ;;  %v6387_v50 = vpop.f32.mrf.mxu0 }
 0x645   : > { %6511 = vst [vmem:[%s10332_s25 + $0xa8] sm:$0xff] %v6495_v48  ;;  %v6496_v7 = vmax.f32 %v6480_v30, 0.0  ;;  %v6481_v62 = vadd.f32 %v6465_v27, %v6449_v21  ;;  %v6450_v16 = vadd.f32 %v10482_v24, %v6422_v52  ;;  %v6388_v29 = vadd.f32 %v6387_v50, %v6314_v13  ;;  %v6473_v27 = vld [vmem:[%s9490_s21 + $0x1e8] sm:$0xff] }
 0x646   : > { %v6423_v47 = vmul.f32 %v10485_v2, %v6386_v31  ;;  %v6389_v49 = vpop.f32.mrf.mxu0 }
 0x647   : > { %6512 = vst [vmem:[%s10332_s25 + $0xe0] sm:$0xff] %v6496_v7  ;;  %v6497_v28 = vmax.f32 %v6481_v62, 0.0  ;;  %v6482_v36 = vadd.f32 %v6466_v61, %v6450_v16  ;;  %v6424_v41 = vmul.f32 %v10479_v51, %v6388_v29  ;;  %v6390_v58 = vadd.f32 %v6389_v49, %v6316_v11 }
 0x648   : > { %v6451_v54 = vadd.f32 %v10489_v63, %v6423_v47  ;;  %v6393_v53 = vpop.f32.mrf.mxu0 }
 0x649   : > { %6513 = vst [vmem:[%s10332_s25 + $0xe8] sm:$0xff] %v6497_v28  ;;  %v6498_v42 = vmax.f32 %v6482_v36, 0.0  ;;  %v6452_v23 = vadd.f32 %v10482_v24, %v6424_v41  ;;  %v6425_v13 = vmul.f32 %v10485_v2, %v6390_v58  ;;  %v6394_v18 = vadd.f32 %v6393_v53, %v6320_v44  ;;  %v6940_v44 = vpop.f32.mrf.mxu1 }
 0x64a   : > { %v6483_v12 = vadd.f32 %v6467_v35, %v6451_v54  ;;  %v6395_v26 = vpop.f32.mrf.mxu0 }
 0x64b   : > { %6514 = vst [vmem:[%s10332_s25 + $0x120] sm:$0xff] %v6498_v42  ;;  %v6484_v10 = vadd.f32 %v6468_v8, %v6452_v23  ;;  %v6453_v6 = vadd.f32 %v10489_v63, %v6425_v13  ;;  %v6426_v34 = vmul.f32 %v10479_v51, %v6394_v18  ;;  %v6396_v57 = vadd.f32 %v6395_v26, %v6322_v33  ;;  %v7108_v8 = vld [vmem:[%s9490_s21 + $0x30] sm:$0xff]  ;;  %v7109_v18 = vld [vmem:[%s9490_s21 + $0x38] sm:$0xff] }
 0x64c   : > { %v6499_v45 = vmax.f32 %v6483_v12, 0.0  ;;  %v6397_v14 = vpop.f32.mrf.mxu0 }
 0x64d   : > { %v6500_v22 = vmax.f32 %v6484_v10, 0.0  ;;  %v6485_v40 = vadd.f32 %v6469_v20, %v6453_v6  ;;  %v6454_v11 = vadd.f32 %v10482_v24, %v6426_v34  ;;  %v6427_v32 = vmul.f32 %v10485_v2, %v6396_v57 }
 0x64e   : > { %6515 = vst [vmem:[%s10332_s25 + $0x128] sm:$0xff] %v6499_v45  ;;  %v6398_v0 = vadd.f32 %v6397_v14, %v6324_v59  ;;  %v6399_v9 = vpop.f32.mrf.mxu0 }
 0x64f   : > { %6516 = vst [vmem:[%s10332_s25 + $0x160] sm:$0xff] %v6500_v22  ;;  %v6501_v4 = vmax.f32 %v6485_v40, 0.0  ;;  %v6486_v60 = vadd.f32 %v6470_v3, %v6454_v11  ;;  %v6455_v25 = vadd.f32 %v10489_v63, %v6427_v32  ;;  %v6400_v46 = vadd.f32 %v6399_v9, %v6326_v17  ;;  %v7111_v22 = vld [vmem:[%s9490_s21 + $0x78] sm:$0xff] }
 0x650   : > { %v6428_v38 = vmul.f32 %v10479_v51, %v6398_v0  ;;  %v6942_v51 = vpop.f32.mrf.mxu1 }
 0x651   : > { %6517 = vst [vmem:[%s10332_s25 + $0x168] sm:$0xff] %v6501_v4  ;;  %v6502_v15 = vmax.f32 %v6486_v60, 0.0  ;;  %v6487_v43 = vadd.f32 %v6471_v39, %v6455_v25  ;;  %v6429_v56 = vmul.f32 %v10485_v2, %v6400_v46  ;;  %v7112_v46 = vld [vmem:[%s9490_s21 + $0xb0] sm:$0xff] }
 0x652   : > { %v6456_v5 = vadd.f32 %v10482_v24, %v6428_v38  ;;  %v6944_v31 = vpop.f32.mrf.mxu1  ;;  %v7052_v24 = vld [vmem:[%s10694_s8 + $0x6] sm:$0x3] }
 0x653   : > { %6518 = vst [vmem:[%s10332_s25 + $0x1a0] sm:$0xff] %v6502_v15  ;;  %v6503_v37 = vmax.f32 %v6487_v43, 0.0  ;;  %v6457_v48 = vadd.f32 %v10489_v63, %v6429_v56  ;;  %v7080_v63 = vld [vmem:[%s10695_s9 + $0x6] sm:$0x3]  ;;  %v10561_v29 = vrot.slane %v7052_v24, %v9762_v55  ;;  %v10567_v28 = vrot.slane %v7052_v24, %v9771_v1 }
 0x654   : > { %v6488_v30 = vadd.f32 %v6472_v19, %v6456_v5  ;;  %v6946_v50 = vpop.f32.mrf.mxu1  ;;  %v10564_v49 = vrot.slane %v7080_v63, %v9762_v55  ;;  %v10571_v54 = vrot.slane %v7080_v63, %v9771_v1  ;;  %v7110_v1 = vld [vmem:[%s9490_s21 + $0x70] sm:$0xff]  ;;  %v7113_v56 = vld [vmem:[%s9490_s21 + $0xb8] sm:$0xff] }
 0x655   : > { %6519 = vst [vmem:[%s10332_s25 + $0x1a8] sm:$0xff] %v6503_v37  ;;  %v6489_v21 = vadd.f32 %v6473_v27, %v6457_v48 }
 0x656   : > { %v6504_v52 = vmax.f32 %v6488_v30, 0.0  ;;  %v6950_v7 = vpop.f32.mrf.mxu1 }
 0x657   : > { %v6505_v61 = vmax.f32 %v6489_v21, 0.0  ;;  %v7114_v21 = vld [vmem:[%s9490_s21 + $0xf0] sm:$0xff] }
 0x658   : > { %6520 = vst [vmem:[%s10332_s25 + $0x1e0] sm:$0xff] %v6504_v52  ;;  %v6952_v2 = vpop.f32.mrf.mxu1 }
 0x659   : > { %6521 = vst [vmem:[%s10332_s25 + $0x1e8] sm:$0xff] %v6505_v61 }
 0x65a   : > { %v6954_v62 = vpop.f32.mrf.mxu1 }
 0x65c   : > { %v6956_v16 = vpop.f32.mrf.mxu1 }
 0x65e   : > { %v6960_v36 = vpop.f32.mrf.mxu1 }
 0x660   : > { %v6962_v13 = vpop.f32.mrf.mxu1 }
 0x662   : > { %v6964_v14 = vpop.f32.mrf.mxu1 }
 0x664   : > { %v6966_v43 = vpop.f32.mrf.mxu1 }
 0x670   : > { %v7013_v33 = vpop.f32.mrf.mxu0 }
 0x671   : > { %v7014_v47 = vadd.f32 %v7013_v33, %v6940_v44 }
 0x672   : > { %v7015_v35 = vpop.f32.mrf.mxu0 }
 0x673   : > { %v7064_v41 = vmul.f32 %v10561_v29, %v7014_v47  ;;  %v7016_v58 = vadd.f32 %v7015_v35, %v6942_v51  ;;  %v7116_v35 = vld [vmem:[%s9490_s21 + $0x130] sm:$0xff] }
 0x674   : > { %v7017_v53 = vpop.f32.mrf.mxu0 }
 0x675   : > { %v7092_v42 = vadd.f32 %v10564_v49, %v7064_v41  ;;  %v7065_v23 = vmul.f32 %v10567_v28, %v7016_v58  ;;  %v7018_v55 = vadd.f32 %v7017_v53, %v6944_v31 }
 0x676   : > { %v7019_v59 = vpop.f32.mrf.mxu0 }
 0x677   : > { %v7124_v12 = vadd.f32 %v7108_v8, %v7092_v42  ;;  %v7093_v20 = vadd.f32 %v10571_v54, %v7065_v23  ;;  %v7066_v26 = vmul.f32 %v10561_v29, %v7018_v55  ;;  %v7020_v10 = vadd.f32 %v7019_v59, %v6946_v50 }
 0x678   : > { %v7023_v6 = vpop.f32.mrf.mxu0 }
 0x679   : > { %v7140_v34 = vmax.f32 %v7124_v12, 0.0  ;;  %v7125_v57 = vadd.f32 %v7109_v18, %v7093_v20  ;;  %v7094_v45 = vadd.f32 %v10564_v49, %v7066_v26  ;;  %v7067_v3 = vmul.f32 %v10567_v28, %v7020_v10  ;;  %v7117_v20 = vld [vmem:[%s9490_s21 + $0x138] sm:$0xff] }
 0x67a   : > { %v7024_v40 = vadd.f32 %v7023_v6, %v6950_v7  ;;  %v7025_v11 = vpop.f32.mrf.mxu0  ;;  %v6970_v7 = vpop.f32.mrf.mxu1 }
 0x67b   : > { %7156 = vst [vmem:[%s10332_s25 + $0x30] sm:$0xff] %v7140_v34  ;;  %v7141_v32 = vmax.f32 %v7125_v57, 0.0  ;;  %v7126_v17 = vadd.f32 %v7110_v1, %v7094_v45  ;;  %v7095_v39 = vadd.f32 %v10571_v54, %v7067_v3  ;;  %v7026_v0 = vadd.f32 %v7025_v11, %v6952_v2  ;;  %v7118_v1 = vld [vmem:[%s9490_s21 + $0x170] sm:$0xff] }
 0x67c   : > { %v7068_v9 = vmul.f32 %v10561_v29, %v7024_v40  ;;  %v7027_v4 = vpop.f32.mrf.mxu0  ;;  %v6972_v23 = vpop.f32.mrf.mxu1  ;;  %v7119_v40 = vld [vmem:[%s9490_s21 + $0x178] sm:$0xff] }
 0x67d   : > { %7157 = vst [vmem:[%s10332_s25 + $0x38] sm:$0xff] %v7141_v32  ;;  %v7142_v60 = vmax.f32 %v7126_v17, 0.0  ;;  %v7127_v25 = vadd.f32 %v7111_v22, %v7095_v39  ;;  %v7069_v38 = vmul.f32 %v10567_v28, %v7026_v0  ;;  %v7028_v15 = vadd.f32 %v7027_v4, %v6954_v62  ;;  %v7115_v62 = vld [vmem:[%s9490_s21 + $0xf8] sm:$0xff]  ;;  %v7120_v4 = vld [vmem:[%s9490_s21 + $0x1b0] sm:$0xff] }
 0x67e   : > { %v7096_v19 = vadd.f32 %v10564_v49, %v7068_v9  ;;  %v7029_v44 = vpop.f32.mrf.mxu0 }
 0x67f   : > { %7158 = vst [vmem:[%s10332_s25 + $0x70] sm:$0xff] %v7142_v60  ;;  %v7143_v5 = vmax.f32 %v7127_v25, 0.0  ;;  %v7097_v27 = vadd.f32 %v10571_v54, %v7069_v38  ;;  %v7070_v37 = vmul.f32 %v10561_v29, %v7028_v15  ;;  %v7030_v48 = vadd.f32 %v7029_v44, %v6956_v16 }
 0x680   : > { %v7128_v30 = vadd.f32 %v7112_v46, %v7096_v19  ;;  %v7033_v51 = vpop.f32.mrf.mxu0  ;;  %v7121_v19 = vld [vmem:[%s9490_s21 + $0x1b8] sm:$0xff] }
 0x681   : > { %7159 = vst [vmem:[%s10332_s25 + $0x78] sm:$0xff] %v7143_v5  ;;  %v7129_v52 = vadd.f32 %v7113_v56, %v7097_v27  ;;  %v7098_v61 = vadd.f32 %v10564_v49, %v7070_v37  ;;  %v7071_v31 = vmul.f32 %v10567_v28, %v7030_v48  ;;  %v7034_v50 = vadd.f32 %v7033_v51, %v6960_v36 }
 0x682   : > { %v7144_v2 = vmax.f32 %v7128_v30, 0.0  ;;  %v7035_v24 = vpop.f32.mrf.mxu0 }
 0x683   : > { %v7145_v63 = vmax.f32 %v7129_v52, 0.0  ;;  %v7130_v16 = vadd.f32 %v7114_v21, %v7098_v61  ;;  %v7099_v33 = vadd.f32 %v10571_v54, %v7071_v31  ;;  %v7072_v47 = vmul.f32 %v10561_v29, %v7034_v50  ;;  %v7122_v52 = vld [vmem:[%s9490_s21 + $0x1f0] sm:$0xff]  ;;  %v7123_v50 = vld [vmem:[%s9490_s21 + $0x1f8] sm:$0xff]  ;;  %s7173_s21 = scalar_lea.sflag [#allocation6], %s9484_s26 }
 0x684   : > { %7160 = vst [vmem:[%s10332_s25 + $0xb0] sm:$0xff] %v7144_v2  ;;  %v7036_v41 = vadd.f32 %v7035_v24, %v6962_v13  ;;  %v7037_v58 = vpop.f32.mrf.mxu0 }
 0x685   : > { %7161 = vst [vmem:[%s10332_s25 + $0xb8] sm:$0xff] %v7145_v63  ;;  %v7146_v8 = vmax.f32 %v7130_v16, 0.0  ;;  %v7131_v36 = vadd.f32 %v7115_v62, %v7099_v33  ;;  %v7100_v53 = vadd.f32 %v10564_v49, %v7072_v47  ;;  %v7038_v42 = vadd.f32 %v7037_v58, %v6964_v14  ;;  %v6974_v14 = vpop.f32.mrf.mxu1 }
 0x686   : > { %v7073_v55 = vmul.f32 %v10567_v28, %v7036_v41  ;;  %v7039_v18 = vpop.f32.mrf.mxu0 }
 0x687   : > { %7162 = vst [vmem:[%s10332_s25 + $0xf0] sm:$0xff] %v7146_v8  ;;  %v7147_v59 = vmax.f32 %v7131_v36, 0.0  ;;  %v7132_v12 = vadd.f32 %v7116_v35, %v7100_v53  ;;  %v7074_v13 = vmul.f32 %v10561_v29, %v7038_v42  ;;  %v7040_v26 = vadd.f32 %v7039_v18, %v6966_v43  ;;  %v6976_v43 = vpop.f32.mrf.mxu1 }
 0x688   : > { %v7101_v10 = vadd.f32 %v10571_v54, %v7073_v55  ;;  %v7043_v6 = vpop.f32.mrf.mxu0 }
 0x689   : > { %7163 = vst [vmem:[%s10332_s25 + $0xf8] sm:$0xff] %v7147_v59  ;;  %v7148_v34 = vmax.f32 %v7132_v12, 0.0  ;;  %v7102_v57 = vadd.f32 %v10564_v49, %v7074_v13  ;;  %v7075_v45 = vmul.f32 %v10567_v28, %v7040_v26  ;;  %v7044_v3 = vadd.f32 %v7043_v6, %v6970_v7 }
 0x68a   : > { %v7133_v22 = vadd.f32 %v7117_v20, %v7101_v10  ;;  %v7045_v11 = vpop.f32.mrf.mxu0 }
 0x68b   : > { %7164 = vst [vmem:[%s10332_s25 + $0x130] sm:$0xff] %v7148_v34  ;;  %v7134_v32 = vadd.f32 %v7118_v1, %v7102_v57  ;;  %v7103_v17 = vadd.f32 %v10571_v54, %v7075_v45  ;;  %v7076_v39 = vmul.f32 %v10561_v29, %v7044_v3  ;;  %v7046_v0 = vadd.f32 %v7045_v11, %v6972_v23 }
 0x68c   : > { %v7149_v9 = vmax.f32 %v7133_v22, 0.0  ;;  %v7047_v60 = vpop.f32.mrf.mxu0 }
 0x68d   : > { %v7150_v25 = vmax.f32 %v7134_v32, 0.0  ;;  %v7135_v46 = vadd.f32 %v7119_v40, %v7103_v17  ;;  %v7104_v38 = vadd.f32 %v10564_v49, %v7076_v39  ;;  %v7077_v15 = vmul.f32 %v10567_v28, %v7046_v0 }
 0x68e   : > { %7165 = vst [vmem:[%s10332_s25 + $0x138] sm:$0xff] %v7149_v9  ;;  %v7048_v56 = vadd.f32 %v7047_v60, %v6974_v14  ;;  %v7049_v44 = vpop.f32.mrf.mxu0 }
 0x68f   : > { %7166 = vst [vmem:[%s10332_s25 + $0x170] sm:$0xff] %v7150_v25  ;;  %v7151_v5 = vmax.f32 %v7135_v46, 0.0  ;;  %v7136_v27 = vadd.f32 %v7120_v4, %v7104_v38  ;;  %v7105_v37 = vadd.f32 %v10571_v54, %v7077_v15  ;;  %v7050_v48 = vadd.f32 %v7049_v44, %v6976_v43 }
 0x690   : > { %v7078_v30 = vmul.f32 %v10561_v29, %v7048_v56 }
 0x691   : > { %7167 = vst [vmem:[%s10332_s25 + $0x178] sm:$0xff] %v7151_v5  ;;  %v7152_v21 = vmax.f32 %v7136_v27, 0.0  ;;  %v7137_v51 = vadd.f32 %v7121_v19, %v7105_v37  ;;  %v7079_v61 = vmul.f32 %v10567_v28, %v7050_v48 }
 0x692   : > { %v7106_v31 = vadd.f32 %v10564_v49, %v7078_v30 }
 0x693   : > { %7168 = vst [vmem:[%s10332_s25 + $0x1b0] sm:$0xff] %v7152_v21  ;;  %v7153_v7 = vmax.f32 %v7137_v51, 0.0  ;;  %v7107_v2 = vadd.f32 %v10571_v54, %v7079_v61 }
 0x694   : > { %v7138_v29 = vadd.f32 %v7122_v52, %v7106_v31 }
 0x695   : > { %7169 = vst [vmem:[%s10332_s25 + $0x1b8] sm:$0xff] %v7153_v7  ;;  %v7139_v62 = vadd.f32 %v7123_v50, %v7107_v2 }
 0x696   : > { %v7154_v24 = vmax.f32 %v7138_v29, 0.0 }
 0x697   : > { %v7155_v49 = vmax.f32 %v7139_v62, 0.0 }
 0x698   : > { %7170 = vst [vmem:[%s10332_s25 + $0x1f0] sm:$0xff] %v7154_v24 }
 0x699   : > { %7171 = vst [vmem:[%s10332_s25 + $0x1f8] sm:$0xff] %v7155_v49 }
 0x69a   : > { %9154 = shalt.err (!%p9151_p11)
}
 0x69b   : > { %s9155_s25 = scalar_lea.hbm %s10639_s3, 8192  ;;  %s9159_s20 = scalar_lea.hbm %s10696_s10, 16384 }
 0x69c   : > { %p9156_p1 = scmp.ne.s32.totalorder %s10639_s3, %s9155_s25  ;;  %p9160_p0 = scmp.lt.s32.totalorder %s10639_s3, %s10696_s10 }
 0x69d   : > { %p9161_p4 = scmp.lt.s32.totalorder %s9159_s20, %s9155_s25 }
 0x69e   : > { %p9157_p12 = pnand %p9156_p1, %p10750_p8 }
 0x69f   : > { %p9162_p2 = por %p9161_p4, %p9160_p0 }
 0x6a0   : > { %p9158_p13 = pneg %p9157_p12 }
 0x6a2   : > { %p9163_p5 = pnand %p9162_p2, %p9158_p13 }
 0x6a4   : > { %9166 = shalt.err (!%p9163_p5)
}
 0x6a5   : > { %s9241_s30 = smov 1024   ;;  %s9242_s27 = smov 64  }
 0x6a6   : > { %8377 = dma.vmem_to_hbm [thread:$0]  (%p10750_p8), %s10641_s23, 8192, %s10639_s3, %s7173_s21, %s9241_s30, %s9241_s30, %s9242_s27  }
 0x6a7 PF: > { %s7202_s19 = sand.u32 1, %s9209_s13   ;;  %p10751_p3 = scmp.ne.s32.totalorder %s10719_s29, 0 }
 0x6a8   : > { %p10752_p10 = scmp.ge.s32.totalorder %s9221_s16, 2  ;;  %s7203_s11 = scalar_lea.sflag [#allocation6], %s7202_s19 }
 0x6aa   : > { %p8406_p7 = pnand %p10752_p10, %p10751_p3 }
 0x6ac   : > { %p8407_p6 = pneg %p8406_p7 }
 0x6ae   : > { %9204 = dma.done.wait (%p8407_p6), %s7203_s11, 8192  }
 0x6af   : > { %9206 = vsyncadd (%p8407_p6), %s7203_s11, 4294959104  ;;  %p27_p9 = scmp.ge.s32.totalorder %s9411_s18, 4   ;;  %s10753_s13 = smov %s9213_s14 }
 0x6b0   : > { %s10754_s14 = smov %s9217_s15  ;;  %s10755_s15 = smov %s9422_s28 }
 0x6b1   : > { %s10756_s16 = smov %s9411_s18  ;;  %29 = sbr.rel (!%p27_p9) target bundleno = 14 (0xe), region = 145 }
 0x6b6   :  { %7208 = vsyncpa [#allocation5], 1 }
 0x6b7   :  { %7210 = vsyncpa [#allocation5 + $0x1], 1 }
 0x6b8   :  { %7211 = vsyncpa [#allocation8], 1 }
 0x6b9   :  { %7212 = vsyncpa [#allocation11], 1 }
 0x6ba   :  { %7213 = vsyncpa [#allocation14], 1 }
 0x6bb   :  { %7214 = vsyncpa [#allocation17], 1 }
 0x6bc   :  { %7215 = vsyncpa [#allocation6], 1 }
 0x6bd   :  { %7217 = vsyncpa [#allocation6 + $0x1], 1 }

</bundles_post_ra>
